<compile_context>
chip_gen: v7x
topology: tpu7x:2x2x1
jax: 0.10.0
libtpu: 0.0.40
codegen_flags: <defaults>
</compile_context>

<pallas_src>
import math
import jax
import jax.numpy as jnp
from jax import lax
from jax.experimental import pallas as pl
from jax.experimental.pallas import tpu as pltpu


def _conv3x3_kernel(x_ref, w_ref, b_ref, o_ref, acc_ref):
    # x_ref:   (1, H+2, W+2, C)    padded input image (bf16), whole image
    # w_ref:   (3, 3, C, Coutp)    conv weights, HWIO (bf16), Coutp = lane-pad
    # b_ref:   (1, Coutp)          bias (f32)
    # o_ref:   (1, TH, W, Coutp)   output H-strip (f32)
    # acc_ref: (TH*W, Coutp) f32   VMEM accumulator scratch
    TH = o_ref.shape[1]
    W = o_ref.shape[2]
    C = x_ref.shape[3]
    Coutp = o_ref.shape[3]

    hs = pl.program_id(1)
    row0 = pl.multiple_of(hs * TH, TH)  # first padded-input row of this strip

    acc_ref[...] = jnp.zeros_like(acc_ref)

    # 3x3 conv as 9 shifted (TH*W, C) x (C, Coutp) matmuls on the MXU.
    # kx outermost: only 3 shifted slabs are materialized; each ky tap is a
    # contiguous row-range of the flattened slab (no per-tap relayout).
    for kx in range(3):
        slab = x_ref[0, pl.ds(row0, TH + 2), pl.ds(kx, W), :]      # (TH+2, W, C)
        slab = slab.reshape((TH + 2) * W, C)
        for ky in range(3):
            patch = slab[ky * W: ky * W + TH * W, :]               # (TH*W, C)
            acc_ref[...] += jnp.dot(patch, w_ref[ky, kx],
                                    preferred_element_type=jnp.float32)

    out = acc_ref[...] + b_ref[...]                                # bias broadcast
    o_ref[...] = out.reshape(1, TH, W, Coutp).astype(o_ref.dtype)


def _choose_strip(H, W, min_rows=256):
    """Smallest divisor TH of H with TH*W >= min_rows (MXU-friendly M); else H."""
    for d in range(1, H + 1):
        if H % d == 0 and d * W >= min_rows:
            return d
    return H


def conv3x3_same(x_nhwc, w_hwio, bias, *, strip=None, out_dtype=jnp.float32):
    """3x3, stride 1, padding 1 conv via Pallas. Grid = (batch, H-strips)."""
    N, H, W, C = x_nhwc.shape
    Cout = w_hwio.shape[-1]

    # Lane-pad output channels to a multiple of 128 for unmasked stores / full MXU N.
    Coutp = ((Cout + 127) // 128) * 128
    if Coutp != Cout:
        w_hwio = jnp.pad(w_hwio, ((0, 0), (0, 0), (0, 0), (0, Coutp - Cout)))
        bias = jnp.pad(bias, ((0, Coutp - Cout),))

    # bf16 feeds to the MXU (f32 accumulation inside the kernel).
    xb = x_nhwc.astype(jnp.bfloat16)
    wb = w_hwio.astype(jnp.bfloat16)
    b2d = bias.reshape(1, Coutp).astype(jnp.float32)

    # TODO(synk): the explicit jnp.pad is still one extra HBM pass; fold the halo
    # into the kernel (in-VMEM border zeroing) if it shows up in profiles.
    xp = jnp.pad(xb, ((0, 0), (1, 1), (1, 1), (0, 0)))

    TH = _choose_strip(H, W) if strip is None else strip
    assert H % TH == 0, "strip must divide H"
    n_strips = H // TH

    flops = 2 * N * H * W * C * Coutp * 9
    bytes_accessed = (xp.size * 2 + wb.size * 2 + b2d.size * 4
                      + N * H * W * Coutp * 4)

    out = pl.pallas_call(
        _conv3x3_kernel,
        out_shape=jax.ShapeDtypeStruct((N, H, W, Coutp), out_dtype),
        grid_spec=pltpu.PrefetchScalarGridSpec(
            num_scalar_prefetch=0,
            grid=(N, n_strips),
            in_specs=[
                # whole padded image per batch element; block index only changes
                # with n, so the DMA is skipped across strips of the same image.
                pl.BlockSpec((1, H + 2, W + 2, C), lambda n, hs: (n, 0, 0, 0)),
                pl.BlockSpec((3, 3, C, Coutp), lambda n, hs: (0, 0, 0, 0)),
                pl.BlockSpec((1, Coutp), lambda n, hs: (0, 0)),
            ],
            out_specs=pl.BlockSpec((1, TH, W, Coutp), lambda n, hs: (n, hs, 0, 0)),
            scratch_shapes=[pltpu.VMEM((TH * W, Coutp), jnp.float32)],
        ),
        compiler_params=pltpu.CompilerParams(
            dimension_semantics=("parallel", "parallel"),
            vmem_limit_bytes=32 * 1024 * 1024),
        cost_estimate=pl.CostEstimate(flops=flops, transcendentals=0,
                                      bytes_accessed=bytes_accessed),
    )(xp, wb, b2d)

    return out[..., :Cout]  # drop lane padding


def init_prediction_params(key, in_channels, n_classes, n_boxes=4):
    """Xavier-uniform weights (HWIO layout), zero bias — mirrors init_params()."""
    k = 3
    c_box = n_boxes * 4
    c_cls = n_boxes * n_classes

    def xavier(key, cout):
        fan_in = in_channels * k * k
        fan_out = cout * k * k
        bound = math.sqrt(6.0 / (fan_in + fan_out))
        return jax.random.uniform(key, (k, k, in_channels, cout),
                                  dtype=jnp.float32, minval=-bound, maxval=bound)

    kb, kc = jax.random.split(key)
    return {
        "w_box": xavier(kb, c_box),
        "b_box": jnp.zeros((c_box,), jnp.float32),
        "w_cls": xavier(kc, c_cls),
        "b_cls": jnp.zeros((c_cls,), jnp.float32),
    }


def prediction_layers_forward(feature_map_nchw, params, n_classes, n_boxes=4,
                              strip=None):
    """Pallas equivalent of PredictionLayers.forward.

    feature_map_nchw: (N, 512, H, W) -> (pred_box  (N, H*W*n_boxes, 4),
                                         pred_class (N, H*W*n_boxes, n_classes))
    """
    N = feature_map_nchw.shape[0]
    x = jnp.transpose(feature_map_nchw, (0, 2, 3, 1))  # NCHW -> NHWC

    # Fuse both heads into one conv along output channels.
    w = jnp.concatenate([params["w_box"], params["w_cls"]], axis=-1)
    b = jnp.concatenate([params["b_box"], params["b_cls"]], axis=0)
    out = conv3x3_same(x, w, b, strip=strip)  # (N, H, W, n_boxes*(4+n_classes))

    c_box = n_boxes * 4
    pred_box = out[..., :c_box].reshape(N, -1, 4)
    pred_class = out[..., c_box:].reshape(N, -1, n_classes)
    return pred_box, pred_class


def _reference_forward(feature_map_nchw, params, n_classes, n_boxes=4):
    """Pure-JAX reference (lax.conv, same bf16 feeds + f32 accumulation)."""
    N = feature_map_nchw.shape[0]
    x = jnp.transpose(feature_map_nchw, (0, 2, 3, 1)).astype(jnp.bfloat16)
    w = jnp.concatenate([params["w_box"], params["w_cls"]],
                        axis=-1).astype(jnp.bfloat16)
    b = jnp.concatenate([params["b_box"], params["b_cls"]], axis=0)
    out = lax.conv_general_dilated(
        x, w, window_strides=(1, 1), padding="SAME",
        dimension_numbers=("NHWC", "HWIO", "NHWC"),
        preferred_element_type=jnp.float32) + b
    c_box = n_boxes * 4
    return (out[..., :c_box].reshape(N, -1, 4),
            out[..., c_box:].reshape(N, -1, n_classes))


if __name__ == "__main__":
    # Small but module-consistent shapes: in_channels=512 is fixed by the
    # module; use a small spatial size instead of 38x38.
    N, C_IN, H, W = 2, 512, 8, 8
    N_CLASSES = 4

    key = jax.random.PRNGKey(0)
    k_x, k_p = jax.random.split(key)
    feature_map = jax.random.normal(k_x, (N, C_IN, H, W), dtype=jnp.float32)
    params = init_prediction_params(k_p, C_IN, N_CLASSES)

    ref_box, ref_cls = _reference_forward(feature_map, params, N_CLASSES)

    # Exercise both the single-strip (auto) and multi-strip tilings.
    for strip in (None, 4):
        pred_box, pred_class = prediction_layers_forward(
            feature_map, params, N_CLASSES, strip=strip)
        pred_box = jax.block_until_ready(pred_box)
        pred_class = jax.block_until_ready(pred_class)

        assert pred_box.shape == (N, H * W * 4, 4)
        assert pred_class.shape == (N, H * W * 4, N_CLASSES)
        assert jnp.allclose(pred_box, ref_box, atol=5e-2, rtol=5e-2)
        assert jnp.allclose(pred_class, ref_cls, atol=5e-2, rtol=5e-2)

    print("KERNEL_OK")
</pallas_src>

<mosaic_0001>
module attributes {stable_mosaic.version = 11 : i64} {
  func.func @_conv3x3_kernel(%arg0: i32, %arg1: i32, %arg2: memref<1x10x10x512xbf16, #tpu.memory_space<vmem>>, %arg3: memref<3x3x512x128xbf16, #tpu.memory_space<vmem>>, %arg4: memref<1x128xf32, #tpu.memory_space<vmem>>, %arg5: memref<1x8x8x128xf32, #tpu.memory_space<vmem>>, %arg6: memref<64x128xf32, #tpu.memory_space<vmem>>) attributes {dimension_semantics = [#tpu.dimension_semantics<parallel>, #tpu.dimension_semantics<parallel>], iteration_bounds = array<i64: 2, 1>, scalar_prefetch = 0 : i64, scratch_operands = 1 : i64, tpu.core_type = #tpu.core_type<tc>, window_params = [{transform_indices = @transform_0, window_bounds = array<i64: 1, 10, 10, 512>}, {pipeline_mode = #tpu.pipeline_mode<synchronous>, transform_indices = @transform_1, window_bounds = array<i64: 3, 3, 512, 128>}, {pipeline_mode = #tpu.pipeline_mode<synchronous>, transform_indices = @transform_2, window_bounds = array<i64: 1, 128>}, {transform_indices = @transform_3, window_bounds = array<i64: 1, 8, 8, 128>}]} {
    %c8_i32 = arith.constant 8 : i32
    %0 = arith.muli %arg1, %c8_i32 : i32
    %1 = tpu.assume_multiple %0, 8 : i32
    %cst = arith.constant 0.000000e+00 : f32
    %2 = vector.broadcast %cst : f32 to vector<64x128xf32>
    %c0 = arith.constant 0 : index
    %c0_0 = arith.constant 0 : index
    %3 = vector.load %arg6[%c0, %c0_0] : memref<64x128xf32, #tpu.memory_space<vmem>>, vector<64x128xf32>
    tpu.vector_store %arg6[%c0, %c0_0], %2 {strides = array<i32>} : memref<64x128xf32, #tpu.memory_space<vmem>>, vector<64x128xf32>,
    %c0_1 = arith.constant 0 : index
    %4 = arith.index_cast %1 : i32 to index
    %c0_2 = arith.constant 0 : index
    %c0_3 = arith.constant 0 : index
    %5 = vector.load %arg2[%c0_1, %4, %c0_2, %c0_3] : memref<1x10x10x512xbf16, #tpu.memory_space<vmem>>, vector<1x10x8x512xbf16>
    %6 = vector.shape_cast %5 : vector<1x10x8x512xbf16> to vector<10x8x512xbf16>
    %7 = vector.shape_cast %6 : vector<10x8x512xbf16> to vector<80x512xbf16>
    %8 = vector.extract_strided_slice %7 {offsets = [0, 0], sizes = [64, 512], strides = [1, 1]} : vector<80x512xbf16> to vector<64x512xbf16>
    %c0_4 = arith.constant 0 : index
    %c0_5 = arith.constant 0 : index
    %9 = vector.load %arg6[%c0_4, %c0_5] : memref<64x128xf32, #tpu.memory_space<vmem>>, vector<64x128xf32>
    %c0_6 = arith.constant 0 : index
    %c0_7 = arith.constant 0 : index
    %c0_8 = arith.constant 0 : index
    %c0_9 = arith.constant 0 : index
    %10 = vector.load %arg3[%c0_6, %c0_7, %c0_8, %c0_9] : memref<3x3x512x128xbf16, #tpu.memory_space<vmem>>, vector<1x1x512x128xbf16>
    %11 = vector.shape_cast %10 : vector<1x1x512x128xbf16> to vector<512x128xbf16>
    %cst_10 = arith.constant dense<0.000000e+00> : vector<64x128xf32>
    %12 = tpu.matmul %8, %11, %cst_10 {dimension_numbers = #tpu.dot_dimension_numbers<[1], [0], [0], [1], [0, 0, 1, 1], [], []>} : vector<64x512xbf16>, vector<512x128xbf16>, vector<64x128xf32> -> vector<64x128xf32>
    %13 = arith.addf %9, %12 : vector<64x128xf32>
    %c0_11 = arith.constant 0 : index
    %c0_12 = arith.constant 0 : index
    %14 = vector.load %arg6[%c0_11, %c0_12] : memref<64x128xf32, #tpu.memory_space<vmem>>, vector<64x128xf32>
    tpu.vector_store %arg6[%c0_11, %c0_12], %13 {strides = array<i32>} : memref<64x128xf32, #tpu.memory_space<vmem>>, vector<64x128xf32>,
    %15 = vector.extract_strided_slice %7 {offsets = [8, 0], sizes = [64, 512], strides = [1, 1]} : vector<80x512xbf16> to vector<64x512xbf16>
    %c0_13 = arith.constant 0 : index
    %c0_14 = arith.constant 0 : index
    %16 = vector.load %arg6[%c0_13, %c0_14] : memref<64x128xf32, #tpu.memory_space<vmem>>, vector<64x128xf32>
    %c1 = arith.constant 1 : index
    %c0_15 = arith.constant 0 : index
    %c0_16 = arith.constant 0 : index
    %c0_17 = arith.constant 0 : index
    %17 = vector.load %arg3[%c1, %c0_15, %c0_16, %c0_17] : memref<3x3x512x128xbf16, #tpu.memory_space<vmem>>, vector<1x1x512x128xbf16>
    %18 = vector.shape_cast %17 : vector<1x1x512x128xbf16> to vector<512x128xbf16>
    %cst_18 = arith.constant dense<0.000000e+00> : vector<64x128xf32>
    %19 = tpu.matmul %15, %18, %cst_18 {dimension_numbers = #tpu.dot_dimension_numbers<[1], [0], [0], [1], [0, 0, 1, 1], [], []>} : vector<64x512xbf16>, vector<512x128xbf16>, vector<64x128xf32> -> vector<64x128xf32>
    %20 = arith.addf %16, %19 : vector<64x128xf32>
    %c0_19 = arith.constant 0 : index
    %c0_20 = arith.constant 0 : index
    %21 = vector.load %arg6[%c0_19, %c0_20] : memref<64x128xf32, #tpu.memory_space<vmem>>, vector<64x128xf32>
    tpu.vector_store %arg6[%c0_19, %c0_20], %20 {strides = array<i32>} : memref<64x128xf32, #tpu.memory_space<vmem>>, vector<64x128xf32>,
    %22 = vector.extract_strided_slice %7 {offsets = [16, 0], sizes = [64, 512], strides = [1, 1]} : vector<80x512xbf16> to vector<64x512xbf16>
    %c0_21 = arith.constant 0 : index
    %c0_22 = arith.constant 0 : index
    %23 = vector.load %arg6[%c0_21, %c0_22] : memref<64x128xf32, #tpu.memory_space<vmem>>, vector<64x128xf32>
    %c2 = arith.constant 2 : index
    %c0_23 = arith.constant 0 : index
    %c0_24 = arith.constant 0 : index
    %c0_25 = arith.constant 0 : index
    %24 = vector.load %arg3[%c2, %c0_23, %c0_24, %c0_25] : memref<3x3x512x128xbf16, #tpu.memory_space<vmem>>, vector<1x1x512x128xbf16>
    %25 = vector.shape_cast %24 : vector<1x1x512x128xbf16> to vector<512x128xbf16>
    %cst_26 = arith.constant dense<0.000000e+00> : vector<64x128xf32>
    %26 = tpu.matmul %22, %25, %cst_26 {dimension_numbers = #tpu.dot_dimension_numbers<[1], [0], [0], [1], [0, 0, 1, 1], [], []>} : vector<64x512xbf16>, vector<512x128xbf16>, vector<64x128xf32> -> vector<64x128xf32>
    %27 = arith.addf %23, %26 : vector<64x128xf32>
    %c0_27 = arith.constant 0 : index
    %c0_28 = arith.constant 0 : index
    %28 = vector.load %arg6[%c0_27, %c0_28] : memref<64x128xf32, #tpu.memory_space<vmem>>, vector<64x128xf32>
    tpu.vector_store %arg6[%c0_27, %c0_28], %27 {strides = array<i32>} : memref<64x128xf32, #tpu.memory_space<vmem>>, vector<64x128xf32>,
    %c0_29 = arith.constant 0 : index
    %29 = arith.index_cast %1 : i32 to index
    %c1_30 = arith.constant 1 : index
    %c0_31 = arith.constant 0 : index
    %30 = vector.load %arg2[%c0_29, %29, %c1_30, %c0_31] : memref<1x10x10x512xbf16, #tpu.memory_space<vmem>>, vector<1x10x8x512xbf16>
    %31 = vector.shape_cast %30 : vector<1x10x8x512xbf16> to vector<10x8x512xbf16>
    %32 = vector.shape_cast %31 : vector<10x8x512xbf16> to vector<80x512xbf16>
    %33 = vector.extract_strided_slice %32 {offsets = [0, 0], sizes = [64, 512], strides = [1, 1]} : vector<80x512xbf16> to vector<64x512xbf16>
    %c0_32 = arith.constant 0 : index
    %c0_33 = arith.constant 0 : index
    %34 = vector.load %arg6[%c0_32, %c0_33] : memref<64x128xf32, #tpu.memory_space<vmem>>, vector<64x128xf32>
    %c0_34 = arith.constant 0 : index
    %c1_35 = arith.constant 1 : index
    %c0_36 = arith.constant 0 : index
    %c0_37 = arith.constant 0 : index
    %35 = vector.load %arg3[%c0_34, %c1_35, %c0_36, %c0_37] : memref<3x3x512x128xbf16, #tpu.memory_space<vmem>>, vector<1x1x512x128xbf16>
    %36 = vector.shape_cast %35 : vector<1x1x512x128xbf16> to vector<512x128xbf16>
    %cst_38 = arith.constant dense<0.000000e+00> : vector<64x128xf32>
    %37 = tpu.matmul %33, %36, %cst_38 {dimension_numbers = #tpu.dot_dimension_numbers<[1], [0], [0], [1], [0, 0, 1, 1], [], []>} : vector<64x512xbf16>, vector<512x128xbf16>, vector<64x128xf32> -> vector<64x128xf32>
    %38 = arith.addf %34, %37 : vector<64x128xf32>
    %c0_39 = arith.constant 0 : index
    %c0_40 = arith.constant 0 : index
    %39 = vector.load %arg6[%c0_39, %c0_40] : memref<64x128xf32, #tpu.memory_space<vmem>>, vector<64x128xf32>
    tpu.vector_store %arg6[%c0_39, %c0_40], %38 {strides = array<i32>} : memref<64x128xf32, #tpu.memory_space<vmem>>, vector<64x128xf32>,
    %40 = vector.extract_strided_slice %32 {offsets = [8, 0], sizes = [64, 512], strides = [1, 1]} : vector<80x512xbf16> to vector<64x512xbf16>
    %c0_41 = arith.constant 0 : index
    %c0_42 = arith.constant 0 : index
    %41 = vector.load %arg6[%c0_41, %c0_42] : memref<64x128xf32, #tpu.memory_space<vmem>>, vector<64x128xf32>
    %c1_43 = arith.constant 1 : index
    %c1_44 = arith.constant 1 : index
    %c0_45 = arith.constant 0 : index
    %c0_46 = arith.constant 0 : index
    %42 = vector.load %arg3[%c1_43, %c1_44, %c0_45, %c0_46] : memref<3x3x512x128xbf16, #tpu.memory_space<vmem>>, vector<1x1x512x128xbf16>
    %43 = vector.shape_cast %42 : vector<1x1x512x128xbf16> to vector<512x128xbf16>
    %cst_47 = arith.constant dense<0.000000e+00> : vector<64x128xf32>
    %44 = tpu.matmul %40, %43, %cst_47 {dimension_numbers = #tpu.dot_dimension_numbers<[1], [0], [0], [1], [0, 0, 1, 1], [], []>} : vector<64x512xbf16>, vector<512x128xbf16>, vector<64x128xf32> -> vector<64x128xf32>
    %45 = arith.addf %41, %44 : vector<64x128xf32>
    %c0_48 = arith.constant 0 : index
    %c0_49 = arith.constant 0 : index
    %46 = vector.load %arg6[%c0_48, %c0_49] : memref<64x128xf32, #tpu.memory_space<vmem>>, vector<64x128xf32>
    tpu.vector_store %arg6[%c0_48, %c0_49], %45 {strides = array<i32>} : memref<64x128xf32, #tpu.memory_space<vmem>>, vector<64x128xf32>,
    %47 = vector.extract_strided_slice %32 {offsets = [16, 0], sizes = [64, 512], strides = [1, 1]} : vector<80x512xbf16> to vector<64x512xbf16>
    %c0_50 = arith.constant 0 : index
    %c0_51 = arith.constant 0 : index
    %48 = vector.load %arg6[%c0_50, %c0_51] : memref<64x128xf32, #tpu.memory_space<vmem>>, vector<64x128xf32>
    %c2_52 = arith.constant 2 : index
    %c1_53 = arith.constant 1 : index
    %c0_54 = arith.constant 0 : index
    %c0_55 = arith.constant 0 : index
    %49 = vector.load %arg3[%c2_52, %c1_53, %c0_54, %c0_55] : memref<3x3x512x128xbf16, #tpu.memory_space<vmem>>, vector<1x1x512x128xbf16>
    %50 = vector.shape_cast %49 : vector<1x1x512x128xbf16> to vector<512x128xbf16>
    %cst_56 = arith.constant dense<0.000000e+00> : vector<64x128xf32>
    %51 = tpu.matmul %47, %50, %cst_56 {dimension_numbers = #tpu.dot_dimension_numbers<[1], [0], [0], [1], [0, 0, 1, 1], [], []>} : vector<64x512xbf16>, vector<512x128xbf16>, vector<64x128xf32> -> vector<64x128xf32>
    %52 = arith.addf %48, %51 : vector<64x128xf32>
    %c0_57 = arith.constant 0 : index
    %c0_58 = arith.constant 0 : index
    %53 = vector.load %arg6[%c0_57, %c0_58] : memref<64x128xf32, #tpu.memory_space<vmem>>, vector<64x128xf32>
    tpu.vector_store %arg6[%c0_57, %c0_58], %52 {strides = array<i32>} : memref<64x128xf32, #tpu.memory_space<vmem>>, vector<64x128xf32>,
    %c0_59 = arith.constant 0 : index
    %54 = arith.index_cast %1 : i32 to index
    %c2_60 = arith.constant 2 : index
    %c0_61 = arith.constant 0 : index
    %55 = vector.load %arg2[%c0_59, %54, %c2_60, %c0_61] : memref<1x10x10x512xbf16, #tpu.memory_space<vmem>>, vector<1x10x8x512xbf16>
    %56 = vector.shape_cast %55 : vector<1x10x8x512xbf16> to vector<10x8x512xbf16>
    %57 = vector.shape_cast %56 : vector<10x8x512xbf16> to vector<80x512xbf16>
    %58 = vector.extract_strided_slice %57 {offsets = [0, 0], sizes = [64, 512], strides = [1, 1]} : vector<80x512xbf16> to vector<64x512xbf16>
    %c0_62 = arith.constant 0 : index
    %c0_63 = arith.constant 0 : index
    %59 = vector.load %arg6[%c0_62, %c0_63] : memref<64x128xf32, #tpu.memory_space<vmem>>, vector<64x128xf32>
    %c0_64 = arith.constant 0 : index
    %c2_65 = arith.constant 2 : index
    %c0_66 = arith.constant 0 : index
    %c0_67 = arith.constant 0 : index
    %60 = vector.load %arg3[%c0_64, %c2_65, %c0_66, %c0_67] : memref<3x3x512x128xbf16, #tpu.memory_space<vmem>>, vector<1x1x512x128xbf16>
    %61 = vector.shape_cast %60 : vector<1x1x512x128xbf16> to vector<512x128xbf16>
    %cst_68 = arith.constant dense<0.000000e+00> : vector<64x128xf32>
    %62 = tpu.matmul %58, %61, %cst_68 {dimension_numbers = #tpu.dot_dimension_numbers<[1], [0], [0], [1], [0, 0, 1, 1], [], []>} : vector<64x512xbf16>, vector<512x128xbf16>, vector<64x128xf32> -> vector<64x128xf32>
    %63 = arith.addf %59, %62 : vector<64x128xf32>
    %c0_69 = arith.constant 0 : index
    %c0_70 = arith.constant 0 : index
    %64 = vector.load %arg6[%c0_69, %c0_70] : memref<64x128xf32, #tpu.memory_space<vmem>>, vector<64x128xf32>
    tpu.vector_store %arg6[%c0_69, %c0_70], %63 {strides = array<i32>} : memref<64x128xf32, #tpu.memory_space<vmem>>, vector<64x128xf32>,
    %65 = vector.extract_strided_slice %57 {offsets = [8, 0], sizes = [64, 512], strides = [1, 1]} : vector<80x512xbf16> to vector<64x512xbf16>
    %c0_71 = arith.constant 0 : index
    %c0_72 = arith.constant 0 : index
    %66 = vector.load %arg6[%c0_71, %c0_72] : memref<64x128xf32, #tpu.memory_space<vmem>>, vector<64x128xf32>
    %c1_73 = arith.constant 1 : index
    %c2_74 = arith.constant 2 : index
    %c0_75 = arith.constant 0 : index
    %c0_76 = arith.constant 0 : index
    %67 = vector.load %arg3[%c1_73, %c2_74, %c0_75, %c0_76] : memref<3x3x512x128xbf16, #tpu.memory_space<vmem>>, vector<1x1x512x128xbf16>
    %68 = vector.shape_cast %67 : vector<1x1x512x128xbf16> to vector<512x128xbf16>
    %cst_77 = arith.constant dense<0.000000e+00> : vector<64x128xf32>
    %69 = tpu.matmul %65, %68, %cst_77 {dimension_numbers = #tpu.dot_dimension_numbers<[1], [0], [0], [1], [0, 0, 1, 1], [], []>} : vector<64x512xbf16>, vector<512x128xbf16>, vector<64x128xf32> -> vector<64x128xf32>
    %70 = arith.addf %66, %69 : vector<64x128xf32>
    %c0_78 = arith.constant 0 : index
    %c0_79 = arith.constant 0 : index
    %71 = vector.load %arg6[%c0_78, %c0_79] : memref<64x128xf32, #tpu.memory_space<vmem>>, vector<64x128xf32>
    tpu.vector_store %arg6[%c0_78, %c0_79], %70 {strides = array<i32>} : memref<64x128xf32, #tpu.memory_space<vmem>>, vector<64x128xf32>,
    %72 = vector.extract_strided_slice %57 {offsets = [16, 0], sizes = [64, 512], strides = [1, 1]} : vector<80x512xbf16> to vector<64x512xbf16>
    %c0_80 = arith.constant 0 : index
    %c0_81 = arith.constant 0 : index
    %73 = vector.load %arg6[%c0_80, %c0_81] : memref<64x128xf32, #tpu.memory_space<vmem>>, vector<64x128xf32>
    %c2_82 = arith.constant 2 : index
    %c2_83 = arith.constant 2 : index
    %c0_84 = arith.constant 0 : index
    %c0_85 = arith.constant 0 : index
    %74 = vector.load %arg3[%c2_82, %c2_83, %c0_84, %c0_85] : memref<3x3x512x128xbf16, #tpu.memory_space<vmem>>, vector<1x1x512x128xbf16>
    %75 = vector.shape_cast %74 : vector<1x1x512x128xbf16> to vector<512x128xbf16>
    %cst_86 = arith.constant dense<0.000000e+00> : vector<64x128xf32>
    %76 = tpu.matmul %72, %75, %cst_86 {dimension_numbers = #tpu.dot_dimension_numbers<[1], [0], [0], [1], [0, 0, 1, 1], [], []>} : vector<64x512xbf16>, vector<512x128xbf16>, vector<64x128xf32> -> vector<64x128xf32>
    %77 = arith.addf %73, %76 : vector<64x128xf32>
    %c0_87 = arith.constant 0 : index
    %c0_88 = arith.constant 0 : index
    %78 = vector.load %arg6[%c0_87, %c0_88] : memref<64x128xf32, #tpu.memory_space<vmem>>, vector<64x128xf32>
    tpu.vector_store %arg6[%c0_87, %c0_88], %77 {strides = array<i32>} : memref<64x128xf32, #tpu.memory_space<vmem>>, vector<64x128xf32>,
    %c0_89 = arith.constant 0 : index
    %c0_90 = arith.constant 0 : index
    %79 = vector.load %arg6[%c0_89, %c0_90] : memref<64x128xf32, #tpu.memory_space<vmem>>, vector<64x128xf32>
    %c0_91 = arith.constant 0 : index
    %c0_92 = arith.constant 0 : index
    %80 = vector.load %arg4[%c0_91, %c0_92] : memref<1x128xf32, #tpu.memory_space<vmem>>, vector<1x128xf32>
    %81 = vector.broadcast %80 : vector<1x128xf32> to vector<64x128xf32>
    %82 = arith.addf %79, %81 : vector<64x128xf32>
    %83 = vector.shape_cast %82 : vector<64x128xf32> to vector<1x8x8x128xf32>
    %c0_93 = arith.constant 0 : index
    %c0_94 = arith.constant 0 : index
    %c0_95 = arith.constant 0 : index
    %c0_96 = arith.constant 0 : index
    %84 = vector.load %arg5[%c0_93, %c0_94, %c0_95, %c0_96] : memref<1x8x8x128xf32, #tpu.memory_space<vmem>>, vector<1x8x8x128xf32>
    tpu.vector_store %arg5[%c0_93, %c0_94, %c0_95, %c0_96], %83 {strides = array<i32>} : memref<1x8x8x128xf32, #tpu.memory_space<vmem>>, vector<1x8x8x128xf32>,
    return
  }
  func.func @transform_0(%arg0: i32, %arg1: i32) -> (i32, i32, i32, i32) {
    %c0_i32 = arith.constant 0 : i32
    %c0_i32_0 = arith.constant 0 : i32
    %c0_i32_1 = arith.constant 0 : i32
    %c0_i32_2 = arith.constant 0 : i32
    return %arg0, %c0_i32, %c0_i32_0, %c0_i32_1 : i32, i32, i32, i32
  }
  func.func @transform_1(%arg0: i32, %arg1: i32) -> (i32, i32, i32, i32) {
    %c0_i32 = arith.constant 0 : i32
    %c0_i32_0 = arith.constant 0 : i32
    %c0_i32_1 = arith.constant 0 : i32
    %c0_i32_2 = arith.constant 0 : i32
    %c0_i32_3 = arith.constant 0 : i32
    return %c0_i32, %c0_i32_0, %c0_i32_1, %c0_i32_2 : i32, i32, i32, i32
  }
  func.func @transform_2(%arg0: i32, %arg1: i32) -> (i32, i32) {
    %c0_i32 = arith.constant 0 : i32
    %c0_i32_0 = arith.constant 0 : i32
    %c0_i32_1 = arith.constant 0 : i32
    return %c0_i32, %c0_i32_0 : i32, i32
  }
  func.func @transform_3(%arg0: i32, %arg1: i32) -> (i32, i32, i32, i32) {
    %c0_i32 = arith.constant 0 : i32
    %c0_i32_0 = arith.constant 0 : i32
    %c0_i32_1 = arith.constant 0 : i32
    return %arg0, %arg1, %c0_i32, %c0_i32_0 : i32, i32, i32, i32
  }
}

</mosaic_0001>

<bundles_post_ra>
// kernel: tpu_custom_call.1
= control target key start
LH: loop header
LB: loop body
LE: loop exit
PB: predicated region body
PF: predicated region fallthrough
CT: control target
= control target key end

     0   :  { %8 = vsyncpa [#allocation4], 0  ;;  %s7651_s0 = inlined_call_operand.vmem [shape: bf16[2,10,10,512], index: 0, kind: input, shape index: {}]   ;;  %s7652_s1 = inlined_call_operand.hbm [shape: bf16[3,3,512,128], index: 1, kind: input, shape index: {}]   ;;  %s7653_s2 = inlined_call_operand.hbm [shape: f32[1,128], index: 2, kind: input, shape index: {}]   ;;  %s7654_s3 = inlined_call_operand.hbm [shape: f32[2,8,8,128], index: 3, kind: output, shape index: {}]  }
   0x1   :  { %9 = vsyncpa [#allocation7], 0 }
   0x2   :  { %10 = vsyncpa [#allocation5], 0 }
   0x3   :  { %12 = vsyncpa [#allocation5 + $0x1], 0  ;;  %s6623_s12 = smov 0   ;;  %s6625_s13 = smov 0  }
   0x4   :  { %s6627_s14 = smov 0   ;;  %s6629_s15 = smov 0  }
   0x5   :  { %s6631_s16 = smov 0   ;;  %s6633_s17 = smov 0  }
   0x6 LB: > { %s4929_s18 = sadd.s32 4294967295, %s6594_s17   ;;  %s4930_s19 = sadd.s32 4294967294, %s6594_s17   ;;  %s6594_s17 = sphi %s6633_s17, %s18_s17   ;;  %s6590_s16 = sphi %s6631_s16, %s7676_s16   ;;  %s6586_s15 = sphi %s6629_s15, %s7675_s15   ;;  %s6582_s14 = sphi %s6627_s14, %s7674_s14   ;;  %s6578_s13 = sphi %s6625_s13, %s7673_s13   ;;  %s6574_s12 = sphi %s6623_s12, %s7672_s12  }
   0x7   : > { %s30_s20 = sadd.s32 1, %s6590_s16  ;;  %s107_s21 = sadd.s32 1, %s6582_s14 }
   0x8   : > { %p32_p0 = scmp.ge.s32.totalorder %s30_s20, 2  ;;  %p117_p1 = scmp.ne.s32.totalorder %s6582_s14, %s6578_s13 }
   0x9   : > { %p118_p2 = scmp.eq.s32.totalorder %s4929_s18, 1  ;;  %p123_p3 = scmp.ne.s32.totalorder %s6578_s13, %s6574_s12 }
   0xa   : > { %s7678_s20 = smov (%p32_p0, %s30_s20), 0  ;;  %p124_p5 = scmp.eq.s32.totalorder %s4930_s19, 1 }
   0xb   : > { %p6663_p4 = por %p118_p2, %p117_p1  ;;  %s102_s23 = ssub.s32 %s6590_s16, %s7678_s20 }
   0xc   : > { %p4931_p6 = scmp.ge.s32.totalorder %s6594_s17, 1  ;;  %p105_p7 = scmp.eq.s32.totalorder %s102_s23, 0 }
   0xd   : > { %s7659_s22 = scalar_select %p6663_p4, 1, 0 }
   0xe   : > { %p6670_p8 = por %p124_p5, %p123_p3  ;;  %p131_p9 = scmp.lt.s32.totalorder %s6594_s17, 3 }
   0xf   : > { %s6676_s25 = scalar_select %p105_p7, %s6582_s14, %s107_s21  }
  0x10   : > { %s7660_s24 = scalar_select %p6670_p8, 1, 0 }
  0x11   : > { %p6678_p10 = pnand %p4931_p6, %p131_p9  ;;  %p6682_p11 = scmp.eq.s32.totalorder %s4929_s18, 0 }
  0x12   : > { %s6596_s28 = smov [#allocation3]   ;;  %s6597_s4 = smov [#allocation6]  }
  0x13   : > { %s7661_s26 = scalar_select %p6678_p10, 1, 0 }
  0x14   : > { %s7662_s27 = scalar_select %p6682_p11, 1, 0 }
  0x15   : > { %p6094_p12 = pneg %p6678_p10  ;;  %s143_s29 = sshll.u32 %s6596_s28, 4  ;;  %s144_s29 = int_to_ptr.vmem [resolvable:$true] %s143_s29 }
  0x16   : > { %s157_s5 = sshll.u32 %s6597_s4, 4  ;;  %s6452_s8 = scalar_lea.hbm %s7652_s1, 36864  ;;  %s6694_s5 = int_to_ptr.vmem [resolvable:$true] %s157_s5 }
  0x17   : > { %p6690_p13 = pnand %p6682_p11, %p6094_p12  ;;  %p6453_p0 = scmp.ne.s32.totalorder %s7652_s1, %s6452_s8 }
  0x18   : > { %p6459_p5 = scmp.lt.u32.totalorder %s6452_s8, %s7652_s1 }
  0x19   : > { %p6454_p1 = pneg %p6690_p13 }
  0x1b   : > { %p6455_p2 = pnand %p6454_p1, %p6453_p0 }
  0x1d   : > { %p6456_p3 = pneg %p6455_p2 }
  0x1f   : > { %p6461_p6 = pnand %p6459_p5, %p6456_p3 }
  0x21   : > { %6464 = shalt.err (!%p6461_p6)
}
  0x22   : > { %s6465_s19 = scalar_lea.vmem %s144_s29, 36864  ;;  %p6473_p8 = scmp.lt.s32.totalorder %s144_s29, %s144_s29 }
  0x23   : > { %p6466_p7 = scmp.ne.s32.totalorder %s144_s29, %s6465_s19  ;;  %p6474_p4 = scmp.lt.s32.totalorder %s6465_s19, %s6465_s19 }
  0x25   : > { %p6468_p9 = pnand %p6466_p7, %p6454_p1  ;;  %p6475_p11 = por %p6474_p4, %p6473_p8 }
  0x27   : > { %p6469_p12 = pneg %p6468_p9 }
  0x29   : > { %p6476_p10 = pnand %p6475_p11, %p6469_p12 }
  0x2b   : > { %6479 = shalt.err (!%p6476_p10)
}
  0x2c   : > { %s6598_s21 = smov 64   ;;  %s6599_s23 = smov 4  }
  0x2d   : > { %6097 = dma.hbm_to_vmem [thread:$0]  (!%p6690_p13), %s7652_s1, 36864, %s144_s29, [#allocation4], %s6598_s21, %s6598_s21, %s6599_s23  }
  0x2e   : > { %s6480_s8 = scalar_lea.hbm %s7653_s2, 16 }
  0x2f   : > { %p6481_p0 = scmp.ne.s32.totalorder %s7653_s2, %s6480_s8  ;;  %p6487_p10 = scmp.lt.u32.totalorder %s6480_s8, %s7653_s2 }
  0x31   : > { %p6483_p4 = pnand %p6481_p0, %p6454_p1 }
  0x33   : > { %p6484_p8 = pneg %p6483_p4 }
  0x35   : > { %p6489_p11 = pnand %p6487_p10, %p6484_p8 }
  0x37   : > { %6492 = shalt.err (!%p6489_p11)
}
  0x38   : > { %s6493_s29 = scalar_lea.vmem %s6694_s5, 16  ;;  %s6500_s19 = scalar_lea.vmem %s6694_s5, 32 }
  0x39   : > { %p6494_p2 = scmp.ne.s32.totalorder %s6694_s5, %s6493_s29  ;;  %p6501_p6 = scmp.lt.s32.totalorder %s6694_s5, %s6694_s5 }
  0x3a   : > { %p6502_p7 = scmp.lt.s32.totalorder %s6500_s19, %s6493_s29 }
  0x3b   : > { %p6496_p3 = pnand %p6494_p2, %p6454_p1 }
  0x3c   : > { %p6503_p9 = por %p6502_p7, %p6501_p6 }
  0x3d   : > { %p6497_p5 = pneg %p6496_p3 }
  0x3f   : > { %p6504_p12 = pnand %p6503_p9, %p6497_p5 }
  0x41   : > { %6507 = shalt.err (!%p6504_p12)
}
  0x42   : > { %6100 = dma.hbm_to_vmem [thread:$0]  (!%p6690_p13), %s7653_s2, 16, %s6694_s5, [#allocation7]  }
  0x43   : > { %p7664_p0 = scmp.ne.s32.totalorder %s7661_s26, 0 }
  0x44   : > { %p7665_p1 = scmp.ne.s32.totalorder (!%p7664_p0), %s7662_s27, 0 }
  0x45   : > { %178 = sbr.rel (%p7664_p0) target bundleno = 652 (0x28c), region = 32 }
  0x4c   : > { %6561 = dma.done.wait (%p7665_p1), [#allocation4], 36864  }
  0x4d   : > { %6563 = vsyncadd (%p7665_p1), [#allocation4], 4294930432 }
  0x4e   : > { %6565 = dma.done.wait (%p7665_p1), [#allocation7], 16  }
  0x4f   : > { %6567 = vsyncadd (%p7665_p1), [#allocation7], 4294967280  ;;  %v6164_v0 = vld [vmem:[#allocation3 + $0x40] sm:$0xff]   ;;  %v6168_v4 = vld [vmem:[#allocation3 + $0x48] sm:$0xff]   ;;  %p206_p13 = scmp.lt.s32.totalorder %s6586_s15, 1  ;;  %vm3357_vm3 = vcmask 1042432  }
  0x50   : > { %v6165_v1 = vld [vmem:[#allocation3 + $0xc0] sm:$0xff]   ;;  %5363 = vmatprep.subr.bf16.mxu0 %v6164_v0  ;;  %v6169_v5 = vld [vmem:[#allocation3 + $0xc8] sm:$0xff]   ;;  %v6172_v8 = vld [vmem:[#allocation3 + $0x50] sm:$0xff]   ;;  %vm1649_vm0 = vsmask.f32 3328  ;;  %vm3358_vm4 = vcmask 1046532  }
  0x51   : > { %v6166_v2 = vld [vmem:[#allocation3] sm:$0xff]   ;;  %5403 = vmatprep.subr.bf16.mxu1 %v6165_v1  ;;  %v6170_v6 = vld [vmem:[#allocation3 + $0x8] sm:$0xff]   ;;  %v6173_v9 = vld [vmem:[#allocation3 + $0xd0] sm:$0xff]   ;;  %s207_s26 = scalar_select %p206_p13, %s6586_s15, 1  ;;  %vm1650_vm1 = vsmask.f32 7440 }
  0x52   : > { %v6167_v3 = vld [vmem:[#allocation3 + $0x80] sm:$0xff]   ;;  %5364 = vmatpush3.bf16.msra.mxu0 %v6166_v2  ;;  %v6171_v7 = vld [vmem:[#allocation3 + $0x88] sm:$0xff]   ;;  %v6174_v10 = vld [vmem:[#allocation3 + $0x10] sm:$0xff]   ;;  %s203_s4 = sand.u32 1, %s6578_s13   ;;  %s5362_s8 = sshll.u32 %s6586_s15, 10 }
  0x53   : > { %5404 = vmatpush3.bf16.msra.mxu1 %v6167_v3  ;;  %5365 = vmatprep.subr.bf16.mxu0 %v6168_v4  ;;  %v6175_v11 = vld [vmem:[#allocation3 + $0x90] sm:$0xff]   ;;  %v6176_v12 = vld [vmem:[#allocation3 + $0x58] sm:$0xff]   ;;  %v6180_v16 = vld [vmem:[#allocation3 + $0x60] sm:$0xff]   ;;  %s6083_s27 = smul.u32 320, %s207_s26  ;;  %s4938_s6 = sshll.u32 %s203_s4, 6 }
  0x54   : > { %5405 = vmatprep.subr.bf16.mxu1 %v6169_v5  ;;  %v6177_v13 = vld [vmem:[#allocation3 + $0xd8] sm:$0xff]   ;;  %v6181_v17 = vld [vmem:[#allocation3 + $0xe0] sm:$0xff]   ;;  %v6184_v20 = vld [vmem:[#allocation3 + $0x68] sm:$0xff]   ;;  %s7571_s7 = scalar_lea.vmem [#allocation8], %s4938_s6  ;;  %s7596_s18 = scalar_lea.hbm %s7654_s3, %s5362_s8 }
  0x55   : > { %v6178_v14 = vld [vmem:[#allocation3 + $0x18] sm:$0xff]   ;;  %v6182_v18 = vld [vmem:[#allocation3 + $0x20] sm:$0xff]   ;;  %v6185_v21 = vld [vmem:[#allocation3 + $0xe8] sm:$0xff]   ;;  %s6759_s28 = scalar_lea.vmem %s7651_s0, %s6083_s27  ;;  %s4832_s9 = sshll.u32 %s7571_s7, 4  ;;  %s7598_s9 = int_to_ptr.vmem [resolvable:$true] %s4832_s9 }
  0x56   : > { %5366 = vmatpush3.bf16.msra.mxu0 %v6170_v6  ;;  %v6179_v15 = vld [vmem:[#allocation3 + $0x98] sm:$0xff]   ;;  %v6183_v19 = vld [vmem:[#allocation3 + $0xa0] sm:$0xff]   ;;  %v6186_v22 = vld [vmem:[#allocation3 + $0x28] sm:$0xff]   ;;  %s7605_s15 = scalar_lea.sflag [#allocation5], %s203_s4  ;;  %s6508_s29 = scalar_lea.vmem %s7598_s9, 1024 }
  0x57   : > { %5406 = vmatpush3.bf16.msra.mxu1 %v6171_v7  ;;  %5367 = vmatprep.subr.bf16.mxu0 %v6172_v8  ;;  %v6187_v23 = vld [vmem:[#allocation3 + $0xa8] sm:$0xff]   ;;  %v6188_v24 = vld [vmem:[#allocation3 + $0x70] sm:$0xff]   ;;  %v6192_v28 = vld [vmem:[#allocation3 + $0x78] sm:$0xff]   ;;  %p6509_p4 = scmp.ne.s32.totalorder %s7598_s9, %s6508_s29  ;;  %p7670_p8 = scmp.ne.s32.totalorder %s7659_s22, 0 }
  0x58   : > { %5407 = vmatprep.subr.bf16.mxu1 %v6173_v9  ;;  %v6189_v25 = vld [vmem:[#allocation3 + $0xf0] sm:$0xff]   ;;  %v6193_v29 = vld [vmem:[#allocation3 + $0xf8] sm:$0xff]   ;;  %v6762_v32 = vld [vmem:[%s6759_s28] sm:$0xff]  ;;  %s6600_s19 = smov [#allocation8]  }
  0x59   : > { %v6190_v26 = vld [vmem:[#allocation3 + $0x30] sm:$0xff]   ;;  %v6194_v30 = vld [vmem:[#allocation3 + $0x38] sm:$0xff]   ;;  %v6765_v33 = vld [vmem:[%s6759_s28 + $0x20] sm:$0xff]  ;;  %p6510_p10 = pnand %p6509_p4, %p7670_p8  ;;  %s6512_s21 = sshll.u32 %s6600_s19, 4  ;;  %s6513_s21 = int_to_ptr.vmem [resolvable:$false] %s6512_s21 }
  0x5a   : > { %5368 = vmatpush3.bf16.msra.mxu0 %v6174_v10  ;;  %v6191_v27 = vld [vmem:[#allocation3 + $0xb0] sm:$0xff]   ;;  %v6195_v31 = vld [vmem:[#allocation3 + $0xb8] sm:$0xff]   ;;  %v4940_v34 = vcombine.low %v6762_v32, %v6765_v33  ;;  %v4941_v35 = vcombine.high %v6762_v32, %v6765_v33  ;;  %v6772_v36 = vld [vmem:[%s6759_s28 + $0x8] sm:$0xff]  ;;  %s6514_s23 = scalar_lea.vmem %s6513_s21, 2048  ;;  %p6515_p2 = scmp.lt.s32.totalorder %s7598_s9, %s6513_s21 }
  0x5b   : > { %5408 = vmatpush3.bf16.msra.mxu1 %v6175_v11  ;;  %5369 = vmatprep.subr.bf16.mxu0 %v6176_v12  ;;  %v6775_v37 = vld [vmem:[%s6759_s28 + $0x28] sm:$0xff]  ;;  %v6196_v40 = vld [vmem:[#allocation3 + $0x340] sm:$0xff]   ;;  %v6204_v56 = vld [vmem:[#allocation3 + $0x350] sm:$0xff]   ;;  %p6511_p11 = pneg %p6510_p10  ;;  %p6516_p3 = scmp.lt.s32.totalorder %s6514_s23, %s6508_s29 }
  0x5c   : > { %5409 = vmatprep.subr.bf16.mxu1 %v6177_v13  ;;  %v4942_v38 = vcombine.low %v6772_v36, %v6775_v37  ;;  %v4943_v39 = vcombine.high %v6772_v36, %v6775_v37  ;;  %621 = vmatprep.mubr.bf16.mxu0 %v4941_v35  ;;  %v6197_v41 = vld [vmem:[#allocation3 + $0x3c0] sm:$0xff]   ;;  %v6785_v45 = vld [vmem:[%s6759_s28 + $0x48] sm:$0xff]  ;;  %v6205_v57 = vld [vmem:[#allocation3 + $0x3d0] sm:$0xff]  }
  0x5d   : > { %v6198_v42 = vld [vmem:[#allocation3 + $0x300] sm:$0xff]   ;;  %v6200_v46 = vld [vmem:[#allocation3 + $0x348] sm:$0xff]   ;;  %v6206_v58 = vld [vmem:[#allocation3 + $0x310] sm:$0xff]   ;;  %p6517_p5 = por %p6516_p3, %p6515_p2 }
  0x5e   : > { %5370 = vmatpush3.bf16.msra.mxu0 %v6178_v14  ;;  %686 = vmatprep.mubr.bf16.mxu1 %v4943_v39  ;;  %v6199_v43 = vld [vmem:[#allocation3 + $0x380] sm:$0xff]   ;;  %v6201_v47 = vld [vmem:[#allocation3 + $0x3c8] sm:$0xff]   ;;  %v6207_v59 = vld [vmem:[#allocation3 + $0x390] sm:$0xff]   ;;  %v4990_v39 = vcombine.low %v6775_v37, %v6785_v45 }
  0x5f   : > { %5410 = vmatpush3.bf16.msra.mxu1 %v6179_v15  ;;  %5371 = vmatprep.subr.bf16.mxu0 %v6180_v16  ;;  %v6782_v44 = vld [vmem:[%s6759_s28 + $0x40] sm:$0xff]  ;;  %v6202_v48 = vld [vmem:[#allocation3 + $0x308] sm:$0xff]   ;;  %v6208_v60 = vld [vmem:[#allocation3 + $0x358] sm:$0xff]   ;;  %p6518_p6 = pnand %p6517_p5, %p6511_p11 }
  0x60   : > { %5411 = vmatprep.subr.bf16.mxu1 %v6181_v17  ;;  %v6203_v49 = vld [vmem:[#allocation3 + $0x388] sm:$0xff]   ;;  %v6788_v50 = vld [vmem:[%s6759_s28 + $0x60] sm:$0xff]  ;;  %v6209_v61 = vld [vmem:[#allocation3 + $0x3d8] sm:$0xff]   ;;  %v4988_v35 = vcombine.low %v6765_v33, %v6782_v44 }
  0x61   : > { %v6791_v51 = vld [vmem:[%s6759_s28 + $0x68] sm:$0xff]  ;;  %v6795_v52 = vcombine.high %v6782_v44, %v6788_v50  ;;  %v6803_v54 = vcombine.low %v6782_v44, %v6788_v50  ;;  %v6210_v62 = vld [vmem:[#allocation3 + $0x318] sm:$0xff]   ;;  %v6814_v0 = vld [vmem:[%s6759_s28 + $0x80] sm:$0xff] }
  0x62   : > { %5372 = vmatpush3.bf16.msra.mxu0 %v6182_v18  ;;  %v6799_v53 = vcombine.high %v6785_v45, %v6791_v51  ;;  %v6807_v55 = vcombine.low %v6785_v45, %v6791_v51  ;;  %v6211_v63 = vld [vmem:[#allocation3 + $0x398] sm:$0xff]   ;;  %v6817_v1 = vld [vmem:[%s6759_s28 + $0xa0] sm:$0xff]  ;;  %v6820_v2 = vld [vmem:[%s6759_s28 + $0x88] sm:$0xff] }
  0x63   : > { %5412 = vmatpush3.bf16.msra.mxu1 %v6183_v19  ;;  %5373 = vmatprep.subr.bf16.mxu0 %v6184_v20  ;;  %v6823_v3 = vld [vmem:[%s6759_s28 + $0xa8] sm:$0xff]  ;;  %v6827_v4 = vcombine.high %v6814_v0, %v6817_v1  ;;  %v6835_v6 = vcombine.low %v6814_v0, %v6817_v1  ;;  %v6212_v7 = vld [vmem:[#allocation3 + $0x360] sm:$0xff]   ;;  %vm6946_vm2 = vmor %vm1649_vm0, %vm1650_vm1 }
  0x64   : > { %5413 = vmatprep.subr.bf16.mxu1 %v6185_v21  ;;  %v6831_v5 = vcombine.high %v6820_v2, %v6823_v3  ;;  %v6839_v8 = vcombine.low %v6820_v2, %v6823_v3  ;;  %v6213_v9 = vld [vmem:[#allocation3 + $0x3e0] sm:$0xff]   ;;  %v6216_v12 = vld [vmem:[#allocation3 + $0x368] sm:$0xff]   ;;  %vm7161_vm5 = vmor %vm3357_vm3, %vm3358_vm4 }
  0x65   : > { %v6214_v10 = vld [vmem:[#allocation3 + $0x320] sm:$0xff]   ;;  %v6217_v13 = vld [vmem:[#allocation3 + $0x3e8] sm:$0xff]  }
  0x66   : > { %5374 = vmatpush3.bf16.msra.mxu0 %v6186_v22  ;;  %v6215_v11 = vld [vmem:[#allocation3 + $0x3a0] sm:$0xff]   ;;  %v6218_v14 = vld [vmem:[#allocation3 + $0x328] sm:$0xff]  }
  0x67   : > { %5414 = vmatpush3.bf16.msra.mxu1 %v6187_v23  ;;  %5375 = vmatprep.subr.bf16.mxu0 %v6188_v24  ;;  %v6219_v15 = vld [vmem:[#allocation3 + $0x3a8] sm:$0xff]   ;;  %v6846_v16 = vld [vmem:[%s6759_s28 + $0xc0] sm:$0xff]  ;;  %v6220_v24 = vld [vmem:[#allocation3 + $0x370] sm:$0xff]  }
  0x68   : > { %5415 = vmatprep.subr.bf16.mxu1 %v6189_v25  ;;  %v6849_v17 = vld [vmem:[%s6759_s28 + $0xe0] sm:$0xff]  ;;  %v6852_v18 = vld [vmem:[%s6759_s28 + $0xc8] sm:$0xff]  ;;  %v6221_v25 = vld [vmem:[#allocation3 + $0x3f0] sm:$0xff]  }
  0x69   : > { %v6856_v19 = vcombine.high %v6846_v16, %v6849_v17  ;;  %v6859_v20 = vld [vmem:[%s6759_s28 + $0xe8] sm:$0xff]  ;;  %v6863_v21 = vcombine.low %v6846_v16, %v6849_v17 }
  0x6a   : > { %5376 = vmatpush3.bf16.msra.mxu0 %v6190_v26  ;;  %v6867_v22 = vcombine.high %v6852_v18, %v6859_v20  ;;  %v6871_v23 = vcombine.low %v6852_v18, %v6859_v20  ;;  %v4989_v26 = vcombine.high %v6765_v33, %v6782_v44  ;;  %v6231_v44 = vld [vmem:[#allocation3 + $0x680] sm:$0xff]  }
  0x6b   : > { %5416 = vmatpush3.bf16.msra.mxu1 %v6191_v27  ;;  %5377 = vmatprep.subr.bf16.mxu0 %v6192_v28  ;;  %v6222_v27 = vld [vmem:[#allocation3 + $0x330] sm:$0xff]   ;;  %v4991_v28 = vcombine.high %v6775_v37, %v6785_v45  ;;  %v6233_v45 = vld [vmem:[#allocation3 + $0x6c8] sm:$0xff]  }
  0x6c   : > { %5417 = vmatprep.subr.bf16.mxu1 %v6193_v29  ;;  %v6223_v29 = vld [vmem:[#allocation3 + $0x3b0] sm:$0xff]  }
  0x6e   : > { %5378 = vmatpush3.bf16.msra.mxu0 %v6194_v30  ;;  %v6224_v30 = vld [vmem:[#allocation3 + $0x378] sm:$0xff]  }
  0x6f   : > { %5418 = vmatpush3.bf16.msra.mxu1 %v6195_v31  ;;  %5443 = vmatprep.subr.bf16.mxu0 %v6196_v40  ;;  %v6225_v31 = vld [vmem:[#allocation3 + $0x3f8] sm:$0xff]   ;;  %v6228_v40 = vld [vmem:[#allocation3 + $0x640] sm:$0xff]  }
  0x70   : > { %5483 = vmatprep.subr.bf16.mxu1 %v6197_v41  ;;  %v6229_v41 = vld [vmem:[#allocation3 + $0x6c0] sm:$0xff]  }
  0x71   : > { %622 = vmatmul.mubr.bf16.vlgmr.msra.gmra.mrb[0].mxu0 %v4940_v34  ;;  %v6226_v34 = vld [vmem:[#allocation3 + $0x338] sm:$0xff]  }
  0x72   : > { %687 = vmatmul.mubr.bf16.vlgmr.msra.gmra.mrb[0].mxu1 %v4942_v38  ;;  %5444 = vmatpush3.bf16.msra.mxu0 %v6198_v42  ;;  %v6227_v38 = vld [vmem:[#allocation3 + $0x3b8] sm:$0xff]   ;;  %v4993_v42 = vcombine.high %v6788_v50, %v6814_v0 }
  0x73   : > { %5484 = vmatpush3.bf16.msra.mxu1 %v6199_v43  ;;  %5445 = vmatprep.subr.bf16.mxu0 %v6200_v46  ;;  %v6230_v43 = vld [vmem:[#allocation3 + $0x600] sm:$0xff]   ;;  %v4995_v46 = vcombine.high %v6791_v51, %v6820_v2 }
  0x74   : > { %5485 = vmatprep.subr.bf16.mxu1 %v6201_v47  ;;  %629 = vmatprep.mubr.bf16.mxu0 %v6795_v52  ;;  %v6232_v47 = vld [vmem:[#allocation3 + $0x648] sm:$0xff]  }
  0x75   : > { %694 = vmatprep.mubr.bf16.mxu1 %v6799_v53 }
  0x76   : > { %5446 = vmatpush3.bf16.msra.mxu0 %v6202_v48  ;;  %v6234_v48 = vld [vmem:[#allocation3 + $0x608] sm:$0xff]  }
  0x77   : > { %5486 = vmatpush3.bf16.msra.mxu1 %v6203_v49  ;;  %5447 = vmatprep.subr.bf16.mxu0 %v6204_v56  ;;  %v6235_v49 = vld [vmem:[#allocation3 + $0x688] sm:$0xff]   ;;  %v4992_v56 = vcombine.low %v6788_v50, %v6814_v0  ;;  %v6240_v50 = vld [vmem:[#allocation3 + $0x658] sm:$0xff]  }
  0x78   : > { %5487 = vmatprep.subr.bf16.mxu1 %v6205_v57  ;;  %v4994_v57 = vcombine.low %v6791_v51, %v6820_v2  ;;  %v6241_v0 = vld [vmem:[#allocation3 + $0x6d8] sm:$0xff]  }
  0x79   : > { %630 = vmatmul.mubr.bf16.gmra.mrb[4].mxu0 %v6803_v54  ;;  %v6242_v51 = vld [vmem:[#allocation3 + $0x618] sm:$0xff]  }
  0x7a   : > { %695 = vmatmul.mubr.bf16.gmra.mrb[4].mxu1 %v6807_v55  ;;  %5448 = vmatpush3.bf16.msra.mxu0 %v6206_v58  ;;  %v6236_v58 = vld [vmem:[#allocation3 + $0x650] sm:$0xff]   ;;  %v6243_v2 = vld [vmem:[#allocation3 + $0x698] sm:$0xff]  }
  0x7b   : > { %5488 = vmatpush3.bf16.msra.mxu1 %v6207_v59  ;;  %5449 = vmatprep.subr.bf16.mxu0 %v6208_v60  ;;  %v6237_v59 = vld [vmem:[#allocation3 + $0x6d0] sm:$0xff]   ;;  %v4997_v60 = vcombine.high %v6817_v1, %v6846_v16 }
  0x7c   : > { %5489 = vmatprep.subr.bf16.mxu1 %v6209_v61  ;;  %637 = vmatprep.mubr.bf16.mxu0 %v6827_v4  ;;  %v6238_v61 = vld [vmem:[#allocation3 + $0x610] sm:$0xff]  }
  0x7d   : > { %702 = vmatprep.mubr.bf16.mxu1 %v6831_v5 }
  0x7e   : > { %5450 = vmatpush3.bf16.msra.mxu0 %v6210_v62  ;;  %v4999_v62 = vcombine.high %v6823_v3, %v6852_v18 }
  0x7f   : > { %5490 = vmatpush3.bf16.msra.mxu1 %v6211_v63  ;;  %5451 = vmatprep.subr.bf16.mxu0 %v6212_v7  ;;  %v6239_v63 = vld [vmem:[#allocation3 + $0x690] sm:$0xff]   ;;  %v4996_v7 = vcombine.low %v6817_v1, %v6846_v16  ;;  %v6250_v1 = vld [vmem:[#allocation3 + $0x628] sm:$0xff]  }
  0x80   : > { %5491 = vmatprep.subr.bf16.mxu1 %v6213_v9  ;;  %v4998_v9 = vcombine.low %v6823_v3, %v6852_v18  ;;  %v6251_v16 = vld [vmem:[#allocation3 + $0x6a8] sm:$0xff]   ;;  %v6902_v3 = vld [vmem:[%s6759_s28 + $0x100] sm:$0xff] }
  0x81   : > { %638 = vmatmul.mubr.bf16.gmra.mrb[8].mxu0 %v6835_v6  ;;  %v6905_v18 = vld [vmem:[%s6759_s28 + $0x108] sm:$0xff] }
  0x82   : > { %703 = vmatmul.mubr.bf16.gmra.mrb[8].mxu1 %v6839_v8  ;;  %5452 = vmatpush3.bf16.msra.mxu0 %v6214_v10  ;;  %v6244_v10 = vld [vmem:[#allocation3 + $0x660] sm:$0xff]  }
  0x83   : > { %5492 = vmatpush3.bf16.msra.mxu1 %v6215_v11  ;;  %5453 = vmatprep.subr.bf16.mxu0 %v6216_v12  ;;  %v6245_v11 = vld [vmem:[#allocation3 + $0x6e0] sm:$0xff]  }
  0x84   : > { %5493 = vmatprep.subr.bf16.mxu1 %v6217_v13  ;;  %645 = vmatprep.mubr.bf16.mxu0 %v6856_v19  ;;  %v6246_v12 = vld [vmem:[#allocation3 + $0x620] sm:$0xff]  }
  0x85   : > { %710 = vmatprep.mubr.bf16.mxu1 %v6867_v22  ;;  %v6247_v13 = vld [vmem:[#allocation3 + $0x6a0] sm:$0xff]  }
  0x86   : > { %5454 = vmatpush3.bf16.msra.mxu0 %v6218_v14  ;;  %v6248_v14 = vld [vmem:[#allocation3 + $0x668] sm:$0xff]  }
  0x87   : > { %5494 = vmatpush3.bf16.msra.mxu1 %v6219_v15  ;;  %5455 = vmatprep.subr.bf16.mxu0 %v6220_v24  ;;  %v6249_v15 = vld [vmem:[#allocation3 + $0x6e8] sm:$0xff]   ;;  %v5001_v24 = vcombine.high %v6849_v17, %v6902_v3 }
  0x88   : > { %5495 = vmatprep.subr.bf16.mxu1 %v6221_v25  ;;  %v5003_v25 = vcombine.high %v6859_v20, %v6905_v18 }
  0x89   : > { %646 = vmatmul.mubr.bf16.gmra.mrb[12].mxu0 %v6863_v21 }
  0x8a   : > { %711 = vmatmul.mubr.bf16.gmra.mrb[12].mxu1 %v6871_v23  ;;  %5456 = vmatpush3.bf16.msra.mxu0 %v6222_v27  ;;  %v5002_v27 = vcombine.low %v6859_v20, %v6905_v18  ;;  %v6259_v20 = vld [vmem:[#allocation3 + $0x6b8] sm:$0xff]  }
  0x8b   : > { %5496 = vmatpush3.bf16.msra.mxu1 %v6223_v29  ;;  %1070 = vmatprep.mubr.bf16.mxu0 %v4989_v26  ;;  %v5000_v26 = vcombine.low %v6849_v17, %v6902_v3  ;;  %v6253_v29 = vld [vmem:[#allocation3 + $0x6f0] sm:$0xff]   ;;  %v6258_v17 = vld [vmem:[#allocation3 + $0x638] sm:$0xff]  }
  0x8c   : > { %5457 = vmatprep.subr.bf16.mxu0 %v6224_v30  ;;  %1135 = vmatprep.mubr.bf16.mxu1 %v4991_v28  ;;  %v6252_v28 = vld [vmem:[#allocation3 + $0x670] sm:$0xff]  }
  0x8d   : > { %5497 = vmatprep.subr.bf16.mxu1 %v6225_v31  ;;  %v6254_v30 = vld [vmem:[#allocation3 + $0x630] sm:$0xff]  }
  0x8e   : > { %5458 = vmatpush3.bf16.msra.mxu0 %v6226_v34  ;;  %v6255_v31 = vld [vmem:[#allocation3 + $0x6b0] sm:$0xff]   ;;  %v6256_v34 = vld [vmem:[#allocation3 + $0x678] sm:$0xff]  }
  0x8f   : > { %5498 = vmatpush3.bf16.msra.mxu1 %v6227_v38  ;;  %5523 = vmatprep.subr.bf16.mxu0 %v6228_v40  ;;  %v6260_v38 = vld [vmem:[#allocation3 + $0x140] sm:$0xff]  }
  0x90   : > { %5563 = vmatprep.subr.bf16.mxu1 %v6229_v41  ;;  %v6262_v40 = vld [vmem:[#allocation3 + $0x100] sm:$0xff]  }
  0x91   : > { %1071 = vmatmul.mubr.bf16.vlgmr.msra.gmra.mrb[16].mxu0 %v4988_v35  ;;  %v6257_v35 = vld [vmem:[#allocation3 + $0x6f8] sm:$0xff]   ;;  %v6263_v41 = vld [vmem:[#allocation3 + $0x180] sm:$0xff]  }
  0x92   : > { %1136 = vmatmul.mubr.bf16.vlgmr.msra.gmra.mrb[16].mxu1 %v4990_v39  ;;  %5524 = vmatpush3.bf16.msra.mxu0 %v6230_v43  ;;  %v6261_v39 = vld [vmem:[#allocation3 + $0x1c0] sm:$0xff]   ;;  %v6266_v43 = vld [vmem:[#allocation3 + $0x108] sm:$0xff]  }
  0x93   : > { %5564 = vmatpush3.bf16.msra.mxu1 %v6231_v44  ;;  %1078 = vmatprep.mubr.bf16.mxu0 %v4993_v42  ;;  %v6264_v42 = vld [vmem:[#allocation3 + $0x148] sm:$0xff]   ;;  %v6269_v44 = vld [vmem:[#allocation3 + $0x1d0] sm:$0xff]  }
  0x94   : > { %5525 = vmatprep.subr.bf16.mxu0 %v6232_v47  ;;  %1143 = vmatprep.mubr.bf16.mxu1 %v4995_v46  ;;  %v6268_v46 = vld [vmem:[#allocation3 + $0x150] sm:$0xff]  }
  0x95   : > { %5565 = vmatprep.subr.bf16.mxu1 %v6233_v45  ;;  %v6271_v47 = vld [vmem:[#allocation3 + $0x190] sm:$0xff]   ;;  %v1656_v45 = vshll.u32 %v6762_v32, 16 }
  0x96   : > { %5526 = vmatpush3.bf16.msra.mxu0 %v6234_v48  ;;  %v1681_v48 = vshrl.u32 %v6765_v33, 16 }
  0x97   : > { %5566 = vmatpush3.bf16.msra.mxu1 %v6235_v49  ;;  %5527 = vmatprep.subr.bf16.mxu0 %v6236_v58  ;;  %v6274_v49 = vld [vmem:[#allocation3 + $0x118] sm:$0xff]   ;;  %v6276_v58 = vld [vmem:[#allocation3 + $0x160] sm:$0xff]  }
  0x98   : > { %5567 = vmatprep.subr.bf16.mxu1 %v6237_v59  ;;  %v1683_v59 = vrot.slane %v1681_v48, 4 }
  0x99   : > { %1079 = vmatmul.mubr.bf16.gmra.mrb[20].mxu0 %v4992_v56 }
  0x9a   : > { %1144 = vmatmul.mubr.bf16.gmra.mrb[20].mxu1 %v4994_v57  ;;  %5528 = vmatpush3.bf16.msra.mxu0 %v6238_v61  ;;  %v6275_v57 = vld [vmem:[#allocation3 + $0x198] sm:$0xff]   ;;  %v1667_v61 = vshrl.u32 %v6772_v36, 16 }
  0x9b   : > { %5568 = vmatpush3.bf16.msra.mxu1 %v6239_v63  ;;  %1086 = vmatprep.mubr.bf16.mxu0 %v4997_v60  ;;  %v6278_v60 = vld [vmem:[#allocation3 + $0x120] sm:$0xff]   ;;  %v6281_v63 = vld [vmem:[#allocation3 + $0x1e8] sm:$0xff]  }
  0x9c   : > { %5529 = vmatprep.subr.bf16.mxu0 %v6240_v50  ;;  %1151 = vmatprep.mubr.bf16.mxu1 %v4999_v62  ;;  %v6279_v62 = vld [vmem:[#allocation3 + $0x1a0] sm:$0xff]   ;;  %v1698_v50 = vshll.u32 %v6775_v37, 16 }
  0x9d   : > { %5569 = vmatprep.subr.bf16.mxu1 %v6241_v0  ;;  %v6282_v0 = vld [vmem:[#allocation3 + $0x128] sm:$0xff]  }
  0x9e   : > { %5530 = vmatpush3.bf16.msra.mxu0 %v6242_v51 }
  0x9f   : > { %5570 = vmatpush3.bf16.msra.mxu1 %v6243_v2  ;;  %5531 = vmatprep.subr.bf16.mxu0 %v6244_v10  ;;  %v6283_v2 = vld [vmem:[#allocation3 + $0x1a8] sm:$0xff]  }
  0xa0   : > { %5571 = vmatprep.subr.bf16.mxu1 %v6245_v11 }
  0xa1   : > { %1087 = vmatmul.mubr.bf16.gmra.mrb[24].mxu0 %v4996_v7  ;;  %v244_v7 = vld [vmem:[%s6759_s28 + $0x128] sm:$0xff] }
  0xa2   : > { %1152 = vmatmul.mubr.bf16.gmra.mrb[24].mxu1 %v4998_v9  ;;  %5532 = vmatpush3.bf16.msra.mxu0 %v6246_v12  ;;  %v5039_v11 = vcombine.high %v6905_v18, %v244_v7  ;;  %v6284_v12 = vld [vmem:[#allocation3 + $0x170] sm:$0xff]  }
  0xa3   : > { %5572 = vmatpush3.bf16.msra.mxu1 %v6247_v13  ;;  %5533 = vmatprep.subr.bf16.mxu0 %v6248_v14  ;;  %v1700_v13 = vrot.slane %v1698_v50, 5  ;;  %v5038_v14 = vcombine.low %v6905_v18, %v244_v7  ;;  %v6289_v18 = vld [vmem:[#allocation3 + $0x1f8] sm:$0xff]  }
  0xa4   : > { %5573 = vmatprep.subr.bf16.mxu1 %v6249_v15  ;;  %1094 = vmatprep.mubr.bf16.mxu0 %v5001_v24  ;;  %v6285_v15 = vld [vmem:[#allocation3 + $0x1f0] sm:$0xff]   ;;  %v1620_v7 = vld [vmem:[%s6759_s28 + $0x58] sm:$0x11] }
  0xa5   : > { %1159 = vmatprep.mubr.bf16.mxu1 %v5003_v25  ;;  %v6287_v25 = vld [vmem:[#allocation3 + $0x1b0] sm:$0xff]  }
  0xa6   : > { %5534 = vmatpush3.bf16.msra.mxu0 %v6250_v1 }
  0xa7   : > { %5574 = vmatpush3.bf16.msra.mxu1 %v6251_v16  ;;  %5535 = vmatprep.subr.bf16.mxu0 %v6252_v28  ;;  %v6286_v16 = vld [vmem:[#allocation3 + $0x130] sm:$0xff]  }
  0xa8   : > { %5575 = vmatprep.subr.bf16.mxu1 %v6253_v29  ;;  %v6290_v29 = vld [vmem:[#allocation3 + $0x138] sm:$0xff]  }
  0xa9   : > { %1095 = vmatmul.mubr.bf16.gmra.mrb[28].mxu0 %v5000_v26 }
  0xaa   : > { %1160 = vmatmul.mubr.bf16.gmra.mrb[28].mxu1 %v5002_v27  ;;  %5536 = vmatpush3.bf16.msra.mxu0 %v6254_v30 }
  0xab   : > { %5576 = vmatpush3.bf16.msra.mxu1 %v6255_v31  ;;  %5537 = vmatprep.subr.bf16.mxu0 %v6256_v34  ;;  %v6291_v31 = vld [vmem:[#allocation3 + $0x1b8] sm:$0xff]   ;;  %v1611_v34 = vld [vmem:[%s6759_s28 + $0x10] sm:$0x11] }
  0xac   : > { %1495 = vmatprep.mubr.bf16.mxu0 %v6795_v52  ;;  %5577 = vmatprep.subr.bf16.mxu1 %v6257_v35  ;;  %v6265_v52 = vld [vmem:[#allocation3 + $0x1c8] sm:$0xff]  }
  0xad   : > { %1560 = vmatprep.mubr.bf16.mxu1 %v6799_v53  ;;  %v6267_v53 = vld [vmem:[#allocation3 + $0x188] sm:$0xff]  }
  0xae   : > { %5538 = vmatpush3.bf16.msra.mxu0 %v6258_v17  ;;  %v1615_v17 = vld [vmem:[%s6759_s28 + $0x30] sm:$0x11] }
  0xaf   : > { %5578 = vmatpush3.bf16.msra.mxu1 %v6259_v20  ;;  %5603 = vmatprep.subr.bf16.mxu0 %v6260_v38  ;;  %v1662_v20 = vshll.u32 %v1611_v34, 16  ;;  %v1612_v38 = vld [vmem:[%s6759_s28 + $0x18] sm:$0x11] }
  0xb0   : > { %5643 = vmatprep.subr.bf16.mxu1 %v6261_v39 }
  0xb1   : > { %1496 = vmatmul.mubr.bf16.vlgmr.msra.gmra.mrb[32].mxu0 %v6803_v54  ;;  %v6270_v54 = vld [vmem:[#allocation3 + $0x110] sm:$0xff]  }
  0xb2   : > { %1561 = vmatmul.mubr.bf16.vlgmr.msra.gmra.mrb[32].mxu1 %v6807_v55  ;;  %5604 = vmatpush3.bf16.msra.mxu0 %v6262_v40  ;;  %v1653_v55 = vshrl.u32 %v6762_v32, 16  ;;  %v1658_v32 = vrot.slane %v1656_v45, 5  ;;  %v3283_v40 = vld [vmem:[%s6759_s28 + $0x30] sm:$0x11] }
  0xb3   : > { %5644 = vmatpush3.bf16.msra.mxu1 %v6263_v41  ;;  %5605 = vmatprep.subr.bf16.mxu0 %v6264_v42  ;;  %v1690_v41 = vshll.u32 %v1615_v17, 16  ;;  %v1616_v42 = vld [vmem:[%s6759_s28 + $0x38] sm:$0x11] }
  0xb4   : > { %1503 = vmatprep.mubr.bf16.mxu0 %v6827_v4  ;;  %5645 = vmatprep.subr.bf16.mxu1 %v6265_v52  ;;  %v6272_v4 = vld [vmem:[#allocation3 + $0x158] sm:$0xff]   ;;  %v1655_v56 = vrot.slane %v1653_v55, 4  ;;  %v1676_v52 = vshll.u32 %v1612_v38, 16 }
  0xb5   : > { %1568 = vmatprep.mubr.bf16.mxu1 %v6831_v5  ;;  %v6273_v5 = vld [vmem:[#allocation3 + $0x1d8] sm:$0xff]  }
  0xb6   : > { %5606 = vmatpush3.bf16.msra.mxu0 %v6266_v43  ;;  %v1659_v1 = vor.u32 %v1658_v32, %v1655_v56  ;;  %v1664_v43 = vrot.slane %v1662_v20, 5  ;;  %v1678_v55 = vrot.slane %v1676_v52, 5  ;;  %v6302_v52 = vld [vmem:[#allocation3 + $0x410] sm:$0xff]  }
  0xb7   : > { %5646 = vmatpush3.bf16.msra.mxu1 %v6267_v53  ;;  %5607 = vmatprep.subr.bf16.mxu0 %v6268_v46  ;;  %v1704_v53 = vshll.u32 %v1616_v42, 16  ;;  %v6292_v46 = vld [vmem:[#allocation3 + $0x440] sm:$0xff]  }
  0xb8   : > { %5647 = vmatprep.subr.bf16.mxu1 %v6269_v44  ;;  %v1660_v28 = vrot.slane %v1659_v1, 4  ;;  %v6293_v44 = vld [vmem:[#allocation3 + $0x4c0] sm:$0xff]  }
  0xb9   : > { %1504 = vmatmul.mubr.bf16.gmra.mrb[36].mxu0 %v6835_v6  ;;  %v1684_v6 = vshll.u32 %v6765_v33, 16  ;;  %v1695_v33 = vshrl.u32 %v6775_v37, 16  ;;  %v1706_v45 = vrot.slane %v1704_v53, 5 }
  0xba   : > { %1569 = vmatmul.mubr.bf16.gmra.mrb[36].mxu1 %v6839_v8  ;;  %5608 = vmatpush3.bf16.msra.mxu0 %v6270_v54  ;;  %v6277_v8 = vld [vmem:[#allocation3 + $0x1e0] sm:$0xff]   ;;  %v1692_v54 = vrot.slane %v1690_v41, 5 }
  0xbb   : > { %5648 = vmatpush3.bf16.msra.mxu1 %v6271_v47  ;;  %5609 = vmatprep.subr.bf16.mxu0 %v6272_v4  ;;  %v1686_v51 = vrot.slane %v1684_v6, 5  ;;  %v1697_v9 = vrot.slane %v1695_v33, 4  ;;  %v1665_v47 = vsel %vm6946_vm2, %v1660_v28, %v1664_v43  ;;  %v6294_v4 = vld [vmem:[#allocation3 + $0x400] sm:$0xff]   ;;  %v1623_v33 = vld [vmem:[%s6759_s28 + $0x70] sm:$0x11] }
  0xbc   : > { %1511 = vmatprep.mubr.bf16.mxu0 %v6856_v19  ;;  %5649 = vmatprep.subr.bf16.mxu1 %v6273_v5  ;;  %v1670_v19 = vshll.u32 %v6772_v36, 16  ;;  %v1669_v36 = vrot.slane %v1667_v61, 4  ;;  %v6299_v61 = vld [vmem:[#allocation3 + $0x488] sm:$0xff]  }
  0xbd   : > { %1576 = vmatprep.mubr.bf16.mxu1 %v6867_v22  ;;  %v6280_v22 = vld [vmem:[#allocation3 + $0x168] sm:$0xff]   ;;  %v1687_v24 = vor.u32 %v1686_v51, %v1683_v59  ;;  %v1701_v27 = vor.u32 %v1700_v13, %v1697_v9 }
  0xbe   : > { %5610 = vmatpush3.bf16.msra.mxu0 %v6274_v49  ;;  %v6295_v49 = vld [vmem:[#allocation3 + $0x480] sm:$0xff]   ;;  %v6297_v59 = vld [vmem:[#allocation3 + $0x4c8] sm:$0xff]  }
  0xbf   : > { %5650 = vmatpush3.bf16.msra.mxu1 %v6275_v57  ;;  %5611 = vmatprep.subr.bf16.mxu0 %v6276_v58  ;;  %v1688_v30 = vrot.slane %v1687_v24, 4  ;;  %v1702_v39 = vrot.slane %v1701_v27, 4  ;;  %v6296_v58 = vld [vmem:[#allocation3 + $0x448] sm:$0xff]   ;;  %v1732_v24 = vshll.u32 %v1620_v7, 16  ;;  %v1632_v7 = vld [vmem:[%s6759_s28 + $0xb8] sm:$0x11] }
  0xc0   : > { %5651 = vmatprep.subr.bf16.mxu1 %v6277_v8 }
  0xc1   : > { %1512 = vmatmul.mubr.bf16.gmra.mrb[40].mxu0 %v6863_v21  ;;  %v243_v21 = vld [vmem:[%s6759_s28 + $0x120] sm:$0xff]  ;;  %v6955_v5 = vsel %vm6946_vm2, %v1688_v30, %v1692_v54  ;;  %v6963_v32 = vsel %vm6946_vm2, %v1702_v39, %v1706_v45  ;;  %v6301_v30 = vld [vmem:[#allocation3 + $0x4d0] sm:$0xff]   ;;  %v1734_v38 = vrot.slane %v1732_v24, 5 }
  0xc2   : > { %1577 = vmatmul.mubr.bf16.gmra.mrb[40].mxu1 %v6871_v23  ;;  %5612 = vmatpush3.bf16.msra.mxu0 %v6278_v60  ;;  %v1672_v23 = vrot.slane %v1670_v19, 5  ;;  %v5037_v10 = vcombine.high %v6902_v3, %v243_v21  ;;  %v5036_v37 = vcombine.low %v6902_v3, %v243_v21  ;;  %v6288_v3 = vld [vmem:[#allocation3 + $0x178] sm:$0xff]   ;;  %v5072_v56 = vcombine.low %v1665_v47, %v6955_v5  ;;  %v6298_v60 = vld [vmem:[#allocation3 + $0x408] sm:$0xff]   ;;  %v1619_v19 = vld [vmem:[%s6759_s28 + $0x50] sm:$0x11] }
  0xc3   : > { %5652 = vmatpush3.bf16.msra.mxu1 %v6279_v62  ;;  %5613 = vmatprep.subr.bf16.mxu0 %v6280_v22  ;;  %v5073_v57 = vcombine.high %v1665_v47, %v6955_v5  ;;  %v1617_v62 = vld [vmem:[%s6759_s28 + $0x40] sm:$0xff]  ;;  %v1618_v21 = vld [vmem:[%s6759_s28 + $0x48] sm:$0xff]  ;;  %v6304_v47 = vld [vmem:[#allocation3 + $0x458] sm:$0xff]  }
  0xc4   : > { %5653 = vmatprep.subr.bf16.mxu1 %v6281_v63  ;;  %1519 = vmatprep.mubr.bf16.mxu0 %v5037_v10  ;;  %v1673_v26 = vor.u32 %v1672_v23, %v1669_v36  ;;  %v1621_v22 = vld [vmem:[%s6759_s28 + $0x60] sm:$0xff]  ;;  %v1709_v63 = vshrl.u32 %v1617_v62, 16  ;;  %v1712_v50 = vshll.u32 %v1617_v62, 16  ;;  %v1746_v36 = vshll.u32 %v1623_v33, 16  ;;  %v1622_v23 = vld [vmem:[%s6759_s28 + $0x68] sm:$0xff] }
  0xc5   : > { %1584 = vmatprep.mubr.bf16.mxu1 %v5039_v11  ;;  %v1737_v51 = vshrl.u32 %v1621_v22, 16  ;;  %v1726_v1 = vshll.u32 %v1618_v21, 16 }
  0xc6   : > { %5614 = vmatpush3.bf16.msra.mxu0 %v6282_v0  ;;  %v1674_v35 = vrot.slane %v1673_v26, 4  ;;  %v1718_v0 = vshll.u32 %v1619_v19, 16  ;;  %v1711_v9 = vrot.slane %v1709_v63, 4  ;;  %v1714_v10 = vrot.slane %v1712_v50, 5  ;;  %v1626_v50 = vld [vmem:[%s6759_s28 + $0x88] sm:$0xff] }
  0xc7   : > { %5654 = vmatpush3.bf16.msra.mxu1 %v6283_v2  ;;  %5615 = vmatprep.subr.bf16.mxu0 %v6284_v12  ;;  %v1740_v2 = vshll.u32 %v1621_v22, 16  ;;  %v1624_v12 = vld [vmem:[%s6759_s28 + $0x78] sm:$0x11]  ;;  %v1754_v26 = vshll.u32 %v1622_v23, 16  ;;  %v1728_v28 = vrot.slane %v1726_v1, 5 }
  0xc8   : > { %5655 = vmatprep.subr.bf16.mxu1 %v6285_v15  ;;  %v1679_v48 = vsel %vm6946_vm2, %v1674_v35, %v1678_v55  ;;  %v1720_v11 = vrot.slane %v1718_v0, 5  ;;  %v1723_v15 = vshrl.u32 %v1618_v21, 16  ;;  %v1628_v0 = vld [vmem:[%s6759_s28 + $0x98] sm:$0x11]  ;;  %v1630_v21 = vld [vmem:[%s6759_s28 + $0xa8] sm:$0xff] }
  0xc9   : > { %1520 = vmatmul.mubr.bf16.gmra.mrb[44].mxu0 %v5036_v37  ;;  %v5074_v6 = vcombine.low %v1679_v48, %v6963_v32  ;;  %v5075_v8 = vcombine.high %v1679_v48, %v6963_v32  ;;  %v1739_v37 = vrot.slane %v1737_v51, 4  ;;  %v1742_v13 = vrot.slane %v1740_v2, 5 }
  0xca   : > { %1585 = vmatmul.mubr.bf16.gmra.mrb[44].mxu1 %v5038_v14  ;;  %5616 = vmatpush3.bf16.msra.mxu0 %v6286_v16  ;;  %v1748_v14 = vrot.slane %v1746_v36, 5  ;;  %v1715_v16 = vor.u32 %v1714_v10, %v1711_v9  ;;  %v1756_v35 = vrot.slane %v1754_v26, 5  ;;  %v1810_v24 = vshll.u32 %v1630_v21, 16  ;;  %v6309_v26 = vld [vmem:[#allocation3 + $0x4e0] sm:$0xff]  }
  0xcb   : > { %5656 = vmatpush3.bf16.msra.mxu1 %v6287_v25  ;;  %5617 = vmatprep.subr.bf16.mxu0 %v6288_v3  ;;  %v1751_v25 = vshrl.u32 %v1622_v23, 16  ;;  %v6300_v3 = vld [vmem:[#allocation3 + $0x450] sm:$0xff]   ;;  %v1743_v27 = vor.u32 %v1742_v13, %v1739_v37  ;;  %v1788_v13 = vshll.u32 %v1628_v0, 16 }
  0xcc   : > { %5657 = vmatprep.subr.bf16.mxu1 %v6289_v18  ;;  %2293 = vmatprep.mubr.bf16.mxu0 %v5073_v57  ;;  %v1725_v18 = vrot.slane %v1723_v15, 4  ;;  %v6308_v15 = vld [vmem:[#allocation3 + $0x460] sm:$0xff]  }
  0xcd   : > { %2358 = vmatprep.mubr.bf16.mxu1 %v5075_v8  ;;  %v1753_v34 = vrot.slane %v1751_v25, 4  ;;  %v1744_v17 = vrot.slane %v1743_v27, 4  ;;  %v1627_v8 = vld [vmem:[%s6759_s28 + $0x90] sm:$0x11]  ;;  %v1816_v25 = vshll.u32 %v1632_v7, 16 }
  0xce   : > { %5618 = vmatpush3.bf16.msra.mxu0 %v6290_v29  ;;  %v1760_v29 = vshll.u32 %v1624_v12, 16  ;;  %v1729_v20 = vor.u32 %v1728_v28, %v1725_v18  ;;  %v1774_v19 = vshll.u32 %v1627_v8, 16  ;;  %v1782_v12 = vshll.u32 %v1626_v50, 16  ;;  %v1633_v8 = vld [vmem:[%s6759_s28 + $0xc0] sm:$0xff] }
  0xcf   : > { %5658 = vmatpush3.bf16.msra.mxu1 %v6291_v31  ;;  %5683 = vmatprep.subr.bf16.mxu0 %v6292_v46  ;;  %v1716_v31 = vrot.slane %v1715_v16, 4  ;;  %v1757_v41 = vor.u32 %v1756_v35, %v1753_v34  ;;  %v6981_v43 = vsel %vm6946_vm2, %v1744_v17, %v1748_v14  ;;  %v6303_v46 = vld [vmem:[#allocation3 + $0x490] sm:$0xff]   ;;  %v1807_v14 = vshrl.u32 %v1630_v21, 16 }
  0xd0   : > { %5723 = vmatprep.subr.bf16.mxu1 %v6293_v44  ;;  %v1762_v42 = vrot.slane %v1760_v29, 5  ;;  %v1730_v53 = vrot.slane %v1729_v20, 4  ;;  %v1776_v36 = vrot.slane %v1774_v19, 5  ;;  %v1784_v27 = vrot.slane %v1782_v12, 5  ;;  %v1639_v19 = vld [vmem:[%s6759_s28 + $0xf0] sm:$0x11] }
  0xd1   : > { %2294 = vmatmul.mubr.bf16.vlgmr.msra.gmra.mrb[48].mxu0 %v5072_v56  ;;  %v6977_v39 = vsel %vm6946_vm2, %v1716_v31, %v1720_v11  ;;  %v1758_v54 = vrot.slane %v1757_v41, 4  ;;  %v1779_v11 = vshrl.u32 %v1626_v50, 16  ;;  %v1809_v18 = vrot.slane %v1807_v14, 4  ;;  %v6310_v31 = vld [vmem:[#allocation3 + $0x420] sm:$0xff]  }
  0xd2   : > { %2359 = vmatmul.mubr.bf16.vlgmr.msra.gmra.mrb[48].mxu1 %v5074_v6  ;;  %5684 = vmatpush3.bf16.msra.mxu0 %v6294_v4  ;;  %v6985_v44 = vcombine.high %v6977_v39, %v6981_v43  ;;  %v6989_v55 = vcombine.low %v6977_v39, %v6981_v43  ;;  %v6993_v45 = vsel %vm6946_vm2, %v1730_v53, %v1734_v38  ;;  %v6305_v4 = vld [vmem:[#allocation3 + $0x4d8] sm:$0xff]   ;;  %v1625_v6 = vld [vmem:[%s6759_s28 + $0x80] sm:$0xff]  ;;  %v1790_v29 = vrot.slane %v1788_v13, 5 }
  0xd3   : > { %5724 = vmatpush3.bf16.msra.mxu1 %v6295_v49  ;;  %5685 = vmatprep.subr.bf16.mxu0 %v6296_v58  ;;  %v6998_v48 = vsel %vm6946_vm2, %v1758_v54, %v1762_v42  ;;  %v6306_v49 = vld [vmem:[#allocation3 + $0x418] sm:$0xff]   ;;  %v1768_v62 = vshll.u32 %v1625_v6, 16  ;;  %v1781_v16 = vrot.slane %v1779_v11, 4  ;;  %v1818_v38 = vrot.slane %v1816_v25, 5  ;;  %v6311_v41 = vld [vmem:[#allocation3 + $0x4a0] sm:$0xff]  }
  0xd4   : > { %5725 = vmatprep.subr.bf16.mxu1 %v6297_v59  ;;  %2301 = vmatprep.mubr.bf16.mxu0 %v6985_v44  ;;  %v7002_v56 = vcombine.high %v6993_v45, %v6998_v48  ;;  %v7007_v57 = vcombine.low %v6993_v45, %v6998_v48  ;;  %v6307_v58 = vld [vmem:[#allocation3 + $0x498] sm:$0xff]   ;;  %v1629_v59 = vld [vmem:[%s6759_s28 + $0xa0] sm:$0xff] }
  0xd5   : > { %v1793_v22 = vshrl.u32 %v1629_v59, 16  ;;  %v1796_v33 = vshll.u32 %v1629_v59, 16  ;;  %v1770_v2 = vrot.slane %v1768_v62, 5  ;;  %v1785_v35 = vor.u32 %v1784_v27, %v1781_v16  ;;  %v1635_v59 = vld [vmem:[%s6759_s28 + $0xd0] sm:$0x11]  ;;  %v1637_v62 = vld [vmem:[%s6759_s28 + $0xe0] sm:$0xff] }
  0xd6   : > { %5686 = vmatpush3.bf16.msra.mxu0 %v6298_v60  ;;  %v1631_v60 = vld [vmem:[%s6759_s28 + $0xb0] sm:$0x11]  ;;  %2366 = vmatprep.mubr.bf16.mxu1 %v7002_v56  ;;  %v1830_v50 = vshll.u32 %v1635_v59, 16  ;;  %v1849_v0 = vshrl.u32 %v1637_v62, 16 }
  0xd7   : > { %5726 = vmatpush3.bf16.msra.mxu1 %v6299_v61  ;;  %5687 = vmatprep.subr.bf16.mxu0 %v6300_v3  ;;  %v1765_v61 = vshrl.u32 %v1625_v6, 16  ;;  %v1802_v63 = vshll.u32 %v1631_v60, 16  ;;  %v1795_v23 = vrot.slane %v1793_v22, 4  ;;  %v1798_v9 = vrot.slane %v1796_v33, 5  ;;  %v6315_v6 = vld [vmem:[#allocation3 + $0x4a8] sm:$0xff]  }
  0xd8   : > { %5727 = vmatprep.subr.bf16.mxu1 %v6301_v30  ;;  %v1812_v30 = vrot.slane %v1810_v24, 5  ;;  %v1821_v22 = vshrl.u32 %v1633_v8, 16  ;;  %v1824_v33 = vshll.u32 %v1633_v8, 16  ;;  %v1832_v11 = vrot.slane %v1830_v50, 5  ;;  %v6316_v24 = vld [vmem:[#allocation3 + $0x470] sm:$0xff]   ;;  %v6322_v50 = vld [vmem:[#allocation3 + $0x438] sm:$0xff]  }
  0xd9   : > { %2302 = vmatmul.mubr.bf16.gmra.mrb[52].mxu0 %v6989_v55  ;;  %v1767_v51 = vrot.slane %v1765_v61, 4  ;;  %v1804_v10 = vrot.slane %v1802_v63, 5  ;;  %v1799_v1 = vor.u32 %v1798_v9, %v1795_v23  ;;  %v1634_v63 = vld [vmem:[%s6759_s28 + $0xc8] sm:$0xff]  ;;  %v1640_v9 = vld [vmem:[%s6759_s28 + $0xf8] sm:$0x11] }
  0xda   : > { %5688 = vmatpush3.bf16.msra.mxu0 %v6302_v52  ;;  %2367 = vmatmul.mubr.bf16.gmra.mrb[52].mxu1 %v7007_v57  ;;  %v1813_v20 = vor.u32 %v1812_v30, %v1809_v18  ;;  %v1786_v52 = vrot.slane %v1785_v35, 4  ;;  %v1823_v21 = vrot.slane %v1821_v22, 4  ;;  %v1826_v7 = vrot.slane %v1824_v33, 5  ;;  %v1638_v23 = vld [vmem:[%s6759_s28 + $0xe8] sm:$0xff]  ;;  %v6317_v18 = vld [vmem:[#allocation3 + $0x4f0] sm:$0xff]   ;;  %v6321_v33 = vld [vmem:[#allocation3 + $0x4f8] sm:$0xff]  }
  0xdb   : > { %5728 = vmatpush3.bf16.msra.mxu1 %v6303_v46  ;;  %5689 = vmatprep.subr.bf16.mxu0 %v6304_v47  ;;  %v1771_v37 = vor.u32 %v1770_v2, %v1767_v51  ;;  %v1800_v28 = vrot.slane %v1799_v1, 4  ;;  %v6312_v46 = vld [vmem:[#allocation3 + $0x468] sm:$0xff]   ;;  %v1852_v51 = vshll.u32 %v1637_v62, 16  ;;  %v1858_v2 = vshll.u32 %v1639_v19, 16  ;;  %v6318_v30 = vld [vmem:[#allocation3 + $0x430] sm:$0xff]   ;;  %v6320_v62 = vld [vmem:[#allocation3 + $0x478] sm:$0xff]  }
  0xdc   : > { %5729 = vmatprep.subr.bf16.mxu1 %v6305_v4  ;;  %v1814_v54 = vrot.slane %v1813_v20, 4  ;;  %v6313_v47 = vld [vmem:[#allocation3 + $0x4e8] sm:$0xff]   ;;  %v7038_v4 = vsel %vm6946_vm2, %v1786_v52, %v1790_v29  ;;  %v1827_v14 = vor.u32 %v1826_v7, %v1823_v21  ;;  %v1838_v1 = vshll.u32 %v1634_v63, 16  ;;  %v6324_v7 = vld [vmem:[#allocation3 + $0x740] sm:$0xff]  }
  0xdd   : > { %v1772_v3 = vrot.slane %v1771_v37, 4  ;;  %v7025_v17 = vsel %vm6946_vm2, %v1800_v28, %v1804_v10  ;;  %v1835_v10 = vshrl.u32 %v1634_v63, 16  ;;  %v1851_v37 = vrot.slane %v1849_v0, 4 }
  0xde   : > { %5690 = vmatpush3.bf16.msra.mxu0 %v6306_v49  ;;  %v6314_v49 = vld [vmem:[#allocation3 + $0x428] sm:$0xff]   ;;  %v1854_v12 = vrot.slane %v1852_v51, 5  ;;  %v1860_v13 = vrot.slane %v1858_v2, 5  ;;  %v1872_v27 = vshll.u32 %v1640_v9, 16  ;;  %v1828_v28 = vrot.slane %v1827_v14, 4  ;;  %v6323_v51 = vld [vmem:[#allocation3 + $0x4b8] sm:$0xff]  }
  0xdf   : > { %5730 = vmatpush3.bf16.msra.mxu1 %v6307_v58  ;;  %5691 = vmatprep.subr.bf16.mxu0 %v6308_v15  ;;  %v7021_v34 = vsel %vm6946_vm2, %v1772_v3, %v1776_v36  ;;  %v7042_v58 = vsel %vm6946_vm2, %v1814_v54, %v1818_v38  ;;  %v1636_v36 = vld [vmem:[%s6759_s28 + $0xd8] sm:$0x11]  ;;  %v1837_v15 = vrot.slane %v1835_v10, 4  ;;  %v1866_v3 = vshll.u32 %v1638_v23, 16  ;;  %v6326_v10 = vld [vmem:[#allocation3 + $0x700] sm:$0xff]   ;;  %v6330_v14 = vld [vmem:[#allocation3 + $0x708] sm:$0xff]  }
  0xe0   : > { %5731 = vmatprep.subr.bf16.mxu1 %v6309_v26  ;;  %v7029_v42 = vcombine.high %v7021_v34, %v7025_v17  ;;  %v7033_v53 = vcombine.low %v7021_v34, %v7025_v17  ;;  %v7049_v60 = vcombine.high %v7038_v4, %v7042_v58  ;;  %v7053_v61 = vcombine.low %v7038_v4, %v7042_v58 }
  0xe1   : > { %v1844_v16 = vshll.u32 %v1636_v36, 16  ;;  %v1855_v25 = vor.u32 %v1854_v12, %v1851_v37  ;;  %v1863_v26 = vshrl.u32 %v1638_v23, 16  ;;  %v1840_v29 = vrot.slane %v1838_v1, 5  ;;  %v6325_v23 = vld [vmem:[#allocation3 + $0x7c0] sm:$0xff]   ;;  %v6328_v37 = vld [vmem:[#allocation3 + $0x748] sm:$0xff]   ;;  %v6332_v1 = vld [vmem:[#allocation3 + $0x750] sm:$0xff]  }
  0xe2   : > { %5692 = vmatpush3.bf16.msra.mxu0 %v6310_v31  ;;  %2309 = vmatprep.mubr.bf16.mxu0 %v7029_v42  ;;  %v1868_v38 = vrot.slane %v1866_v3, 5  ;;  %v5121_v19 = vcombine.high %v6955_v5, %v6977_v39  ;;  %v5123_v21 = vcombine.high %v6963_v32, %v6993_v45  ;;  %v5120_v9 = vcombine.low %v6955_v5, %v6977_v39  ;;  %v6331_v39 = vld [vmem:[#allocation3 + $0x788] sm:$0xff]   ;;  %v6335_v3 = vld [vmem:[#allocation3 + $0x790] sm:$0xff]  }
  0xe3   : > { %5732 = vmatpush3.bf16.msra.mxu1 %v6311_v41  ;;  %5693 = vmatprep.subr.bf16.mxu0 %v6312_v46  ;;  %v1856_v31 = vrot.slane %v1855_v25, 4  ;;  %v1846_v35 = vrot.slane %v1844_v16, 5  ;;  %v1865_v20 = vrot.slane %v1863_v26, 4  ;;  %v7065_v41 = vsel %vm6946_vm2, %v1828_v28, %v1832_v11  ;;  %v6334_v25 = vld [vmem:[#allocation3 + $0x710] sm:$0xff]   ;;  %v6340_v28 = vld [vmem:[#allocation3 + $0x760] sm:$0xff]  }
  0xe4   : > { %2310 = vmatmul.mubr.bf16.gmra.mrb[56].mxu0 %v7033_v53  ;;  %5733 = vmatprep.subr.bf16.mxu1 %v6313_v47  ;;  %v1841_v52 = vor.u32 %v1840_v29, %v1837_v15  ;;  %v1874_v47 = vrot.slane %v1872_v27, 5  ;;  %v5125_v11 = vcombine.high %v6981_v43, %v7021_v34  ;;  %v5122_v12 = vcombine.low %v6963_v32, %v6993_v45  ;;  %v6329_v15 = vld [vmem:[#allocation3 + $0x7c8] sm:$0xff]   ;;  %v6336_v32 = vld [vmem:[#allocation3 + $0x758] sm:$0xff]  }
  0xe5   : > { %2374 = vmatprep.mubr.bf16.mxu1 %v7049_v60  ;;  %v7069_v46 = vsel %vm6946_vm2, %v1856_v31, %v1860_v13  ;;  %v1869_v54 = vor.u32 %v1868_v38, %v1865_v20  ;;  %v6327_v13 = vld [vmem:[#allocation3 + $0x780] sm:$0xff]   ;;  %v5127_v5 = vcombine.high %v6998_v48, %v7038_v4  ;;  %v5124_v16 = vcombine.low %v6981_v43, %v7021_v34  ;;  %v6338_v27 = vld [vmem:[#allocation3 + $0x718] sm:$0xff]   ;;  %v6345_v20 = vld [vmem:[#allocation3 + $0x7e8] sm:$0xff]  }
  0xe6   : > { %5694 = vmatpush3.bf16.msra.mxu0 %v6314_v49  ;;  %2375 = vmatmul.mubr.bf16.gmra.mrb[56].mxu1 %v7053_v61  ;;  %v6319_v49 = vld [vmem:[#allocation3 + $0x4b0] sm:$0xff]   ;;  %v1842_v8 = vrot.slane %v1841_v52, 4  ;;  %v7077_v59 = vcombine.low %v7065_v41, %v7069_v46  ;;  %v5129_v45 = vcombine.high %v7025_v17, %v7065_v41  ;;  %v5126_v26 = vcombine.low %v6998_v48, %v7038_v4  ;;  %v6337_v43 = vld [vmem:[#allocation3 + $0x7d8] sm:$0xff]   ;;  %v6341_v48 = vld [vmem:[#allocation3 + $0x7e0] sm:$0xff]  }
  0xe7   : > { %5734 = vmatpush3.bf16.msra.mxu1 %v6315_v6  ;;  %5695 = vmatprep.subr.bf16.mxu0 %v6316_v24  ;;  %v7073_v6 = vcombine.high %v7065_v41, %v7069_v46  ;;  %v1870_v22 = vrot.slane %v1869_v54, 4  ;;  %v6333_v24 = vld [vmem:[#allocation3 + $0x7d0] sm:$0xff]   ;;  %v5128_v29 = vcombine.low %v7025_v17, %v7065_v41  ;;  %v6342_v4 = vld [vmem:[#allocation3 + $0x720] sm:$0xff]   ;;  %v6346_v38 = vld [vmem:[#allocation3 + $0x728] sm:$0xff]  }
  0xe8   : > { %5735 = vmatprep.subr.bf16.mxu1 %v6317_v18  ;;  %v7084_v63 = vsel %vm6946_vm2, %v1842_v8, %v1846_v35  ;;  %v6339_v18 = vld [vmem:[#allocation3 + $0x798] sm:$0xff]   ;;  %v6343_v31 = vld [vmem:[#allocation3 + $0x7a0] sm:$0xff]   ;;  %v1643_v54 = vld [vmem:[%s6759_s28 + $0x110] sm:$0x11] }
  0xe9   : > { %2317 = vmatprep.mubr.bf16.mxu0 %v7073_v6  ;;  %v7088_v0 = vsel %vm6946_vm2, %v1870_v22, %v1874_v47  ;;  %v5131_v34 = vcombine.high %v7042_v58, %v7084_v63  ;;  %v5130_v35 = vcombine.low %v7042_v58, %v7084_v63  ;;  %v1641_v52 = vld [vmem:[%s6759_s28 + $0x100] sm:$0xff]  ;;  %v1886_v47 = vshll.u32 %v1643_v54, 16  ;;  %v1644_v8 = vld [vmem:[%s6759_s28 + $0x118] sm:$0x11]  ;;  %v6378_v54 = vld [vmem:[#allocation3 + $0x228] sm:$0xff]  }
  0xea   : > { %5696 = vmatpush3.bf16.msra.mxu0 %v6318_v30  ;;  %v7093_v2 = vcombine.high %v7084_v63, %v7088_v0  ;;  %v7097_v36 = vcombine.low %v7084_v63, %v7088_v0  ;;  %v6344_v30 = vld [vmem:[#allocation3 + $0x768] sm:$0xff]   ;;  %v1877_v17 = vshrl.u32 %v1641_v52, 16  ;;  %v1880_v41 = vshll.u32 %v1641_v52, 16 }
  0xeb   : > { %5736 = vmatpush3.bf16.msra.mxu1 %v6319_v49  ;;  %5697 = vmatprep.subr.bf16.mxu0 %v6320_v62  ;;  %v1642_v49 = vld [vmem:[%s6759_s28 + $0x108] sm:$0xff]  ;;  %v1900_v22 = vshll.u32 %v1644_v8, 16  ;;  %v1888_v63 = vrot.slane %v1886_v47, 5  ;;  %v1648_v47 = vld [vmem:[%s6759_s28 + $0x138] sm:$0x11] }
  0xec   : > { %2318 = vmatmul.mubr.bf16.gmra.mrb[60].mxu0 %v7077_v59  ;;  %5737 = vmatprep.subr.bf16.mxu1 %v6321_v33  ;;  %v1891_v62 = vshrl.u32 %v1642_v49, 16  ;;  %v6348_v33 = vld [vmem:[#allocation3 + $0x770] sm:$0xff]   ;;  %v1882_v58 = vrot.slane %v1880_v41, 5  ;;  %v1646_v52 = vld [vmem:[%s6759_s28 + $0x128] sm:$0xff]  ;;  %v1928_v8 = vshll.u32 %v1648_v47, 16 }
  0xed   : > { %2740 = vmatprep.mubr.bf16.mxu0 %v5121_v19  ;;  %2382 = vmatprep.mubr.bf16.mxu1 %v7093_v2  ;;  %v1894_v19 = vshll.u32 %v1642_v49, 16  ;;  %v1919_v49 = vshrl.u32 %v1646_v52, 16 }
  0xee   : > { %5698 = vmatpush3.bf16.msra.mxu0 %v6322_v50  ;;  %2383 = vmatmul.mubr.bf16.gmra.mrb[60].mxu1 %v7097_v36  ;;  %v6347_v50 = vld [vmem:[#allocation3 + $0x7a8] sm:$0xff]  }
  0xef   : > { %5738 = vmatpush3.bf16.msra.mxu1 %v6323_v51  ;;  %5763 = vmatprep.subr.bf16.mxu0 %v6324_v7  ;;  %v1879_v51 = vrot.slane %v1877_v17, 4  ;;  %v1896_v7 = vrot.slane %v1894_v19, 5 }
  0xf0   : > { %5803 = vmatprep.subr.bf16.mxu1 %v6325_v23  ;;  %2805 = vmatprep.mubr.bf16.mxu1 %v5123_v21  ;;  %v1893_v21 = vrot.slane %v1891_v62, 4  ;;  %v6350_v23 = vld [vmem:[#allocation3 + $0x730] sm:$0xff]   ;;  %v6379_v62 = vld [vmem:[#allocation3 + $0x2a8] sm:$0xff]  }
  0xf4   : > { %2741 = vmatmul.mubr.bf16.vlgmr.msra.gmra.mrb[64].mxu0 %v5120_v9  ;;  %v1883_v9 = vor.u32 %v1882_v58, %v1879_v51  ;;  %v6380_v51 = vld [vmem:[#allocation3 + $0x270] sm:$0xff]  }
  0xf5   : > { %5764 = vmatpush3.bf16.msra.mxu0 %v6326_v10  ;;  %2748 = vmatprep.mubr.bf16.mxu0 %v5125_v11  ;;  %v1897_v10 = vor.u32 %v1896_v7, %v1893_v21  ;;  %v1902_v11 = vrot.slane %v1900_v22, 5  ;;  %v1930_v7 = vrot.slane %v1928_v8, 5  ;;  %v6392_v8 = vld [vmem:[#allocation3 + $0x548] sm:$0xff]  }
  0xf6   : > { %5765 = vmatprep.subr.bf16.mxu0 %v6328_v37  ;;  %2806 = vmatmul.mubr.bf16.vlgmr.msra.gmra.mrb[64].mxu1 %v5122_v12  ;;  %v6349_v37 = vld [vmem:[#allocation3 + $0x7f0] sm:$0xff]   ;;  %v1884_v12 = vrot.slane %v1883_v9, 4 }
  0xf7   : > { %5804 = vmatpush3.bf16.msra.mxu1 %v6327_v13  ;;  %2813 = vmatprep.mubr.bf16.mxu1 %v5127_v5  ;;  %v6352_v13 = vld [vmem:[#allocation3 + $0x778] sm:$0xff]   ;;  %v6382_v9 = vld [vmem:[#allocation3 + $0x230] sm:$0xff]  }
  0xf8   : > { %5805 = vmatprep.subr.bf16.mxu1 %v6329_v15  ;;  %v7129_v15 = vsel %vm6946_vm2, %v1884_v12, %v1888_v63  ;;  %v6381_v63 = vld [vmem:[#allocation3 + $0x2f0] sm:$0xff]  }
  0xf9   : > { %5766 = vmatpush3.bf16.msra.mxu0 %v6330_v14  ;;  %v1898_v14 = vrot.slane %v1897_v10, 4  ;;  %v5133_v5 = vcombine.high %v7069_v46, %v7129_v15 }
  0xfa   : > { %5767 = vmatprep.subr.bf16.mxu0 %v6332_v1  ;;  %v5132_v1 = vcombine.low %v7069_v46, %v7129_v15  ;;  %v6357_v46 = vld [vmem:[#allocation3 + $0x2c0] sm:$0xff]  }
  0xfb   : > { %5806 = vmatpush3.bf16.msra.mxu1 %v6331_v39  ;;  %v7135_v39 = vsel %vm6946_vm2, %v1898_v14, %v1902_v11 }
  0xfc   : > { %2749 = vmatmul.mubr.bf16.gmra.mrb[68].mxu0 %v5124_v16  ;;  %5807 = vmatprep.subr.bf16.mxu1 %v6333_v24  ;;  %v6354_v16 = vld [vmem:[#allocation3 + $0x738] sm:$0xff]   ;;  %v5135_v24 = vcombine.high %v7088_v0, %v7135_v39 }
  0xfd   : > { %5768 = vmatpush3.bf16.msra.mxu0 %v6334_v25  ;;  %2756 = vmatprep.mubr.bf16.mxu0 %v5129_v45  ;;  %v5134_v25 = vcombine.low %v7088_v0, %v7135_v39  ;;  %v6353_v45 = vld [vmem:[#allocation3 + $0x7f8] sm:$0xff]   ;;  %v6360_v0 = vld [vmem:[#allocation3 + $0x248] sm:$0xff]  }
  0xfe   : > { %5769 = vmatprep.subr.bf16.mxu0 %v6336_v32  ;;  %2814 = vmatmul.mubr.bf16.gmra.mrb[68].mxu1 %v5126_v26  ;;  %v6351_v32 = vld [vmem:[#allocation3 + $0x7b0] sm:$0xff]   ;;  %v6356_v26 = vld [vmem:[#allocation3 + $0x240] sm:$0xff]  }
  0xff   : > { %5808 = vmatpush3.bf16.msra.mxu1 %v6335_v3  ;;  %2821 = vmatprep.mubr.bf16.mxu1 %v5131_v34  ;;  %v6355_v3 = vld [vmem:[#allocation3 + $0x7b8] sm:$0xff]   ;;  %v6361_v34 = vld [vmem:[#allocation3 + $0x2c8] sm:$0xff]  }
 0x100   : > { %5809 = vmatprep.subr.bf16.mxu1 %v6337_v43  ;;  %v6359_v43 = vld [vmem:[#allocation3 + $0x280] sm:$0xff]  }
 0x101   : > { %5770 = vmatpush3.bf16.msra.mxu0 %v6338_v27  ;;  %v6358_v27 = vld [vmem:[#allocation3 + $0x200] sm:$0xff]  }
 0x102   : > { %5771 = vmatprep.subr.bf16.mxu0 %v6340_v28  ;;  %v6363_v28 = vld [vmem:[#allocation3 + $0x288] sm:$0xff]  }
 0x103   : > { %5810 = vmatpush3.bf16.msra.mxu1 %v6339_v18  ;;  %v6362_v18 = vld [vmem:[#allocation3 + $0x208] sm:$0xff]  }
 0x104   : > { %2757 = vmatmul.mubr.bf16.gmra.mrb[72].mxu0 %v5128_v29  ;;  %5811 = vmatprep.subr.bf16.mxu1 %v6341_v48  ;;  %v6364_v29 = vld [vmem:[#allocation3 + $0x250] sm:$0xff]  }
 0x105   : > { %5772 = vmatpush3.bf16.msra.mxu0 %v6342_v4  ;;  %2764 = vmatprep.mubr.bf16.mxu0 %v5133_v5  ;;  %v6367_v48 = vld [vmem:[#allocation3 + $0x290] sm:$0xff]   ;;  %v6368_v4 = vld [vmem:[#allocation3 + $0x258] sm:$0xff]  }
 0x106   : > { %5773 = vmatprep.subr.bf16.mxu0 %v6344_v30  ;;  %2822 = vmatmul.mubr.bf16.gmra.mrb[72].mxu1 %v5130_v35  ;;  %v6370_v30 = vld [vmem:[#allocation3 + $0x218] sm:$0xff]   ;;  %v6375_v35 = vld [vmem:[#allocation3 + $0x2a0] sm:$0xff]  }
 0x107   : > { %5812 = vmatpush3.bf16.msra.mxu1 %v6343_v31  ;;  %2829 = vmatprep.mubr.bf16.mxu1 %v5135_v24  ;;  %v6374_v31 = vld [vmem:[#allocation3 + $0x220] sm:$0xff]   ;;  %v6385_v5 = vld [vmem:[#allocation3 + $0x2f8] sm:$0xff]  }
 0x108   : > { %5813 = vmatprep.subr.bf16.mxu1 %v6345_v20  ;;  %v6377_v20 = vld [vmem:[#allocation3 + $0x2e8] sm:$0xff]  }
 0x109   : > { %5774 = vmatpush3.bf16.msra.mxu0 %v6346_v38  ;;  %v1647_v38 = vld [vmem:[%s6759_s28 + $0x130] sm:$0x11] }
 0x10a   : > { %5775 = vmatprep.subr.bf16.mxu0 %v6348_v33 }
 0x10b   : > { %5814 = vmatpush3.bf16.msra.mxu1 %v6347_v50  ;;  %v1921_v50 = vrot.slane %v1919_v49, 4  ;;  %v6391_v49 = vld [vmem:[#allocation3 + $0x580] sm:$0xff]  }
 0x10c   : > { %5815 = vmatprep.subr.bf16.mxu1 %v6349_v37  ;;  %2765 = vmatmul.mubr.bf16.gmra.mrb[76].mxu0 %v5132_v1  ;;  %v6383_v37 = vld [vmem:[#allocation3 + $0x2b0] sm:$0xff]   ;;  %v6386_v1 = vld [vmem:[#allocation3 + $0x238] sm:$0xff]  }
 0x10d   : > { %5776 = vmatpush3.bf16.msra.mxu0 %v6350_v23  ;;  %3163 = vmatprep.mubr.bf16.mxu0 %v6985_v44  ;;  %v6365_v44 = vld [vmem:[#allocation3 + $0x2d0] sm:$0xff]  }
 0x10e   : > { %5777 = vmatprep.subr.bf16.mxu0 %v6352_v13  ;;  %2830 = vmatmul.mubr.bf16.gmra.mrb[76].mxu1 %v5134_v25  ;;  %v6384_v13 = vld [vmem:[#allocation3 + $0x278] sm:$0xff]  }
 0x10f   : > { %5816 = vmatpush3.bf16.msra.mxu1 %v6351_v32  ;;  %3228 = vmatprep.mubr.bf16.mxu1 %v7002_v56  ;;  %v6366_v56 = vld [vmem:[#allocation3 + $0x210] sm:$0xff]  }
 0x110   : > { %5817 = vmatprep.subr.bf16.mxu1 %v6353_v45  ;;  %v6387_v45 = vld [vmem:[#allocation3 + $0x2b8] sm:$0xff]  }
 0x111   : > { %5778 = vmatpush3.bf16.msra.mxu0 %v6354_v16 }
 0x112   : > { %5843 = vmatprep.subr.bf16.mxu0 %v6356_v26 }
 0x113   : > { %5818 = vmatpush3.bf16.msra.mxu1 %v6355_v3 }
 0x114   : > { %5883 = vmatprep.subr.bf16.mxu1 %v6357_v46  ;;  %3164 = vmatmul.mubr.bf16.vlgmr.msra.gmra.mrb[80].mxu0 %v6989_v55  ;;  %v6369_v55 = vld [vmem:[#allocation3 + $0x2d8] sm:$0xff]  }
 0x115   : > { %5844 = vmatpush3.bf16.msra.mxu0 %v6358_v27  ;;  %3171 = vmatprep.mubr.bf16.mxu0 %v7029_v42  ;;  %v6372_v42 = vld [vmem:[#allocation3 + $0x260] sm:$0xff]  }
 0x116   : > { %3229 = vmatmul.mubr.bf16.vlgmr.msra.gmra.mrb[80].mxu1 %v7007_v57  ;;  %5845 = vmatprep.subr.bf16.mxu0 %v6360_v0  ;;  %v6371_v57 = vld [vmem:[#allocation3 + $0x298] sm:$0xff]   ;;  %v3279_v0 = vld [vmem:[%s6759_s28 + $0x10] sm:$0x11] }
 0x117   : > { %5884 = vmatpush3.bf16.msra.mxu1 %v6359_v43  ;;  %3236 = vmatprep.mubr.bf16.mxu1 %v7049_v60  ;;  %v6373_v60 = vld [vmem:[#allocation3 + $0x2e0] sm:$0xff]  }
 0x118   : > { %5885 = vmatprep.subr.bf16.mxu1 %v6361_v34  ;;  %v3277_v43 = vld [vmem:[%s6759_s28] sm:$0xee] }
 0x119   : > { %5846 = vmatpush3.bf16.msra.mxu0 %v6362_v18  ;;  %v3281_v34 = vld [vmem:[%s6759_s28 + $0x20] sm:$0xee] }
 0x11a   : > { %5847 = vmatprep.subr.bf16.mxu0 %v6364_v29  ;;  %v5206_v29 = vrot.slane %v3281_v34, 9 }
 0x11b   : > { %5886 = vmatpush3.bf16.msra.mxu1 %v6363_v28  ;;  %v3362_v28 = vrot.slane %v3279_v0, 5  ;;  %v6397_v0 = vld [vmem:[#allocation3 + $0x5d0] sm:$0xff]  }
 0x11c   : > { %5887 = vmatprep.subr.bf16.mxu1 %v6365_v44  ;;  %3172 = vmatmul.mubr.bf16.gmra.mrb[84].mxu0 %v7033_v53  ;;  %v6376_v53 = vld [vmem:[#allocation3 + $0x268] sm:$0xff]   ;;  %v6388_v44 = vld [vmem:[#allocation3 + $0x540] sm:$0xff]  }
 0x11d   : > { %5848 = vmatpush3.bf16.msra.mxu0 %v6366_v56  ;;  %3179 = vmatprep.mubr.bf16.mxu0 %v7073_v6  ;;  %v1914_v6 = vshll.u32 %v1647_v38, 16  ;;  %v3370_v56 = vrot.slane %v3283_v40, 5  ;;  %v6398_v40 = vld [vmem:[#allocation3 + $0x510] sm:$0xff]  }
 0x11e   : > { %3237 = vmatmul.mubr.bf16.gmra.mrb[84].mxu1 %v7053_v61  ;;  %5849 = vmatprep.subr.bf16.mxu0 %v6368_v4  ;;  %v1645_v61 = vld [vmem:[%s6759_s28 + $0x120] sm:$0xff] }
 0x11f   : > { %5888 = vmatpush3.bf16.msra.mxu1 %v6367_v48  ;;  %3244 = vmatprep.mubr.bf16.mxu1 %v7093_v2  ;;  %v1905_v17 = vshrl.u32 %v1645_v61, 16  ;;  %v1908_v41 = vshll.u32 %v1645_v61, 16  ;;  %v1922_v2 = vshll.u32 %v1646_v52, 16  ;;  %v1916_v33 = vrot.slane %v1914_v6, 5  ;;  %v3280_v48 = vld [vmem:[%s6759_s28 + $0x18] sm:$0x11] }
 0x120   : > { %5889 = vmatprep.subr.bf16.mxu1 %v6369_v55  ;;  %v6389_v4 = vld [vmem:[#allocation3 + $0x5c0] sm:$0xff]  }
 0x121   : > { %5850 = vmatpush3.bf16.msra.mxu0 %v6370_v30  ;;  %v1907_v19 = vrot.slane %v1905_v17, 4  ;;  %v1910_v22 = vrot.slane %v1908_v41, 5  ;;  %v1924_v58 = vrot.slane %v1922_v2, 5  ;;  %v6390_v17 = vld [vmem:[#allocation3 + $0x500] sm:$0xff]  }
 0x122   : > { %5851 = vmatprep.subr.bf16.mxu0 %v6372_v42  ;;  %v3284_v42 = vld [vmem:[%s6759_s28 + $0x38] sm:$0x11] }
 0x123   : > { %5890 = vmatpush3.bf16.msra.mxu1 %v6371_v57  ;;  %v1911_v21 = vor.u32 %v1910_v22, %v1907_v19  ;;  %v1925_v23 = vor.u32 %v1924_v58, %v1921_v50  ;;  %v3282_v57 = vld [vmem:[%s6759_s28 + $0x28] sm:$0xee] }
 0x124   : > { %5891 = vmatprep.subr.bf16.mxu1 %v6373_v60  ;;  %3180 = vmatmul.mubr.bf16.gmra.mrb[88].mxu0 %v7077_v59  ;;  %v6393_v19 = vld [vmem:[#allocation3 + $0x5c8] sm:$0xff]  }
 0x125   : > { %5852 = vmatpush3.bf16.msra.mxu0 %v6374_v31  ;;  %v1912_v11 = vrot.slane %v1911_v21, 4  ;;  %v1926_v12 = vrot.slane %v1925_v23, 4  ;;  %v3366_v31 = vrot.slane %v3280_v48, 5  ;;  %v6394_v50 = vld [vmem:[#allocation3 + $0x508] sm:$0xff]   ;;  %v3285_v21 = vld [vmem:[%s6759_s28 + $0x40] sm:$0xee] }
 0x126   : > { %3245 = vmatmul.mubr.bf16.gmra.mrb[88].mxu1 %v7097_v36  ;;  %5853 = vmatprep.subr.bf16.mxu0 %v6376_v53  ;;  %v5207_v53 = vrot.slane %v3282_v57, 9  ;;  %v3289_v23 = vld [vmem:[%s6759_s28 + $0x60] sm:$0xee]  ;;  %v6400_v48 = vld [vmem:[#allocation3 + $0x558] sm:$0xff]  }
 0x127   : > { %5892 = vmatpush3.bf16.msra.mxu1 %v6375_v35  ;;  %v1917_v14 = vsel %vm6946_vm2, %v1912_v11, %v1916_v33  ;;  %v1931_v25 = vsel %vm6946_vm2, %v1926_v12, %v1930_v7  ;;  %v7187_v35 = vsel %vm7161_vm5, %v5206_v29, %v3370_v56  ;;  %v5208_v11 = vrot.slane %v3285_v21, 9  ;;  %v6401_v57 = vld [vmem:[#allocation3 + $0x5d8] sm:$0xff]  }
 0x128   : > { %5893 = vmatprep.subr.bf16.mxu1 %v6377_v20  ;;  %v5169_v24 = vcombine.high %v7129_v15, %v1917_v14  ;;  %v5168_v32 = vcombine.low %v7129_v15, %v1917_v14  ;;  %v5171_v46 = vcombine.high %v7135_v39, %v1931_v25  ;;  %v5170_v27 = vcombine.low %v7135_v39, %v1931_v25  ;;  %v3278_v39 = vld [vmem:[%s6759_s28 + $0x8] sm:$0xee] }
 0x129   : > { %5854 = vmatpush3.bf16.msra.mxu0 %v6378_v54  ;;  %v5204_v15 = vrot.slane %v3277_v43, 9  ;;  %v5205_v60 = vrot.slane %v3278_v39, 9  ;;  %v3374_v20 = vrot.slane %v3284_v42, 5  ;;  %v5210_v12 = vrot.slane %v3289_v23, 9  ;;  %v3286_v14 = vld [vmem:[%s6759_s28 + $0x48] sm:$0xee] }
 0x12a   : > { %5855 = vmatprep.subr.bf16.mxu0 %v6380_v51  ;;  %3187 = vmatprep.mubr.bf16.mxu0 %v5169_v24  ;;  %v6396_v43 = vld [vmem:[#allocation3 + $0x550] sm:$0xff]  }
 0x12b   : > { %5894 = vmatpush3.bf16.msra.mxu1 %v6379_v62  ;;  %3252 = vmatprep.mubr.bf16.mxu1 %v5171_v46  ;;  %v3363_v30 = vsel %vm7161_vm5, %v5204_v15, %v3362_v28  ;;  %v3367_v38 = vsel %vm7161_vm5, %v5205_v60, %v3366_v31  ;;  %v7195_v54 = vsel %vm7161_vm5, %v5207_v53, %v3374_v20  ;;  %v6402_v60 = vld [vmem:[#allocation3 + $0x518] sm:$0xff]  }
 0x12c   : > { %5895 = vmatprep.subr.bf16.mxu1 %v6381_v63  ;;  %3188 = vmatmul.mubr.bf16.gmra.mrb[92].mxu0 %v5168_v32  ;;  %v5225_v61 = vcombine.high %v3363_v30, %v7187_v35  ;;  %v5224_v52 = vcombine.low %v3363_v30, %v7187_v35  ;;  %v5226_v6 = vcombine.low %v3367_v38, %v7195_v54  ;;  %v6395_v63 = vld [vmem:[#allocation3 + $0x588] sm:$0xff]   ;;  %v5209_v32 = vrot.slane %v3286_v14, 9  ;;  %v6403_v20 = vld [vmem:[#allocation3 + $0x598] sm:$0xff]  }
 0x12d   : > { %5856 = vmatpush3.bf16.msra.mxu0 %v6382_v9  ;;  %v5227_v47 = vcombine.high %v3367_v38, %v7195_v54  ;;  %v3291_v9 = vld [vmem:[%s6759_s28 + $0x70] sm:$0x11] }
 0x12e   : > { %3253 = vmatmul.mubr.bf16.gmra.mrb[92].mxu1 %v5170_v27  ;;  %5857 = vmatprep.subr.bf16.mxu0 %v6384_v13  ;;  %v3386_v13 = vrot.slane %v3291_v9, 5  ;;  %v3295_v38 = vld [vmem:[%s6759_s28 + $0x90] sm:$0x11] }
 0x12f   : > { %5896 = vmatpush3.bf16.msra.mxu1 %v6383_v37  ;;  %3801 = vmatprep.mubr.bf16.mxu0 %v5225_v61  ;;  %v3293_v61 = vld [vmem:[%s6759_s28 + $0x80] sm:$0xee] }
 0x130   : > { %5897 = vmatprep.subr.bf16.mxu1 %v6385_v5  ;;  %3866 = vmatprep.mubr.bf16.mxu1 %v5227_v47  ;;  %v3288_v5 = vld [vmem:[%s6759_s28 + $0x58] sm:$0x11]  ;;  %v7215_v25 = vsel %vm7161_vm5, %v5210_v12, %v3386_v13  ;;  %v5212_v47 = vrot.slane %v3293_v61, 9  ;;  %v6404_v12 = vld [vmem:[#allocation3 + $0x560] sm:$0xff]  }
 0x131   : > { %5858 = vmatpush3.bf16.msra.mxu0 %v6386_v1  ;;  %v3290_v1 = vld [vmem:[%s6759_s28 + $0x68] sm:$0xee]  ;;  %v3305_v61 = vld [vmem:[%s6759_s28 + $0xe0] sm:$0xee] }
 0x132   : > { %5923 = vmatprep.subr.bf16.mxu0 %v6388_v44  ;;  %v6399_v44 = vld [vmem:[#allocation3 + $0x590] sm:$0xff]  }
 0x133   : > { %5898 = vmatpush3.bf16.msra.mxu1 %v6387_v45  ;;  %v3382_v45 = vrot.slane %v3288_v5, 5  ;;  %v6405_v5 = vld [vmem:[#allocation3 + $0x5e0] sm:$0xff]  }
 0x134   : > { %5963 = vmatprep.subr.bf16.mxu1 %v6389_v4  ;;  %3802 = vmatmul.mubr.bf16.vlgmr.msra.gmra.mrb[96].mxu0 %v5224_v52 }
 0x135   : > { %5924 = vmatpush3.bf16.msra.mxu0 %v6390_v17  ;;  %v7227_v34 = vsel %vm7161_vm5, %v5209_v32, %v3382_v45  ;;  %v6406_v45 = vld [vmem:[#allocation3 + $0x520] sm:$0xff]  }
 0x136   : > { %3867 = vmatmul.mubr.bf16.vlgmr.msra.gmra.mrb[96].mxu1 %v5226_v6  ;;  %5925 = vmatprep.subr.bf16.mxu0 %v6392_v8  ;;  %v3299_v6 = vld [vmem:[%s6759_s28 + $0xb0] sm:$0x11] }
 0x137   : > { %5964 = vmatpush3.bf16.msra.mxu1 %v6391_v49  ;;  %v3394_v49 = vrot.slane %v3295_v38, 5  ;;  %v3307_v38 = vld [vmem:[%s6759_s28 + $0xf0] sm:$0x11] }
 0x138   : > { %5965 = vmatprep.subr.bf16.mxu1 %v6393_v19  ;;  %v3294_v19 = vld [vmem:[%s6759_s28 + $0x88] sm:$0xee] }
 0x139   : > { %5926 = vmatpush3.bf16.msra.mxu0 %v6394_v50  ;;  %v3298_v50 = vld [vmem:[%s6759_s28 + $0xa8] sm:$0xee] }
 0x13a   : > { %5927 = vmatprep.subr.bf16.mxu0 %v6396_v43 }
 0x13b   : > { %5966 = vmatpush3.bf16.msra.mxu1 %v6395_v63 }
 0x13c   : > { %5967 = vmatprep.subr.bf16.mxu1 %v6397_v0 }
 0x13d   : > { %5928 = vmatpush3.bf16.msra.mxu0 %v6398_v40  ;;  %v6408_v40 = vld [vmem:[#allocation3 + $0x568] sm:$0xff]  }
 0x13e   : > { %5929 = vmatprep.subr.bf16.mxu0 %v6400_v48  ;;  %v6410_v48 = vld [vmem:[#allocation3 + $0x528] sm:$0xff]  }
 0x13f   : > { %5968 = vmatpush3.bf16.msra.mxu1 %v6399_v44 }
 0x140   : > { %5969 = vmatprep.subr.bf16.mxu1 %v6401_v57  ;;  %v6411_v57 = vld [vmem:[#allocation3 + $0x5a8] sm:$0xff]  }
 0x141   : > { %5930 = vmatpush3.bf16.msra.mxu0 %v6402_v60  ;;  %v3303_v60 = vld [vmem:[%s6759_s28 + $0xd0] sm:$0x11] }
 0x142   : > { %5931 = vmatprep.subr.bf16.mxu0 %v6404_v12 }
 0x143   : > { %5970 = vmatpush3.bf16.msra.mxu1 %v6403_v20 }
 0x144   : > { %v5379_v36 = vpop.f32.mrb[0].mxu0  ;;  %5971 = vmatprep.subr.bf16.mxu1 %v6405_v5  ;;  %v6412_v5 = vld [vmem:[#allocation3 + $0x570] sm:$0xff]  }
 0x145   : > { %v5419_v10 = vpop.f32.mrb[0].mxu1  ;;  %v5380_v16 = vpop.f32.mrb[1].mxu0  ;;  %5932 = vmatpush3.bf16.msra.mxu0 %v6406_v45 }
 0x146   : > { %v5381_v26 = vadd.f32 %v5380_v16, %v5379_v36  ;;  %v5420_v3 = vpop.f32.mrb[1].mxu1  ;;  %v5382_v41 = vpop.f32.mrb[2].mxu0  ;;  %v3287_v36 = vld [vmem:[%s6759_s28 + $0x50] sm:$0x11]  ;;  %v3292_v16 = vld [vmem:[%s6759_s28 + $0x78] sm:$0x11]  ;;  %5933 = vmatprep.subr.bf16.mxu0 %v6408_v40 }
 0x147   : > { %v5421_v18 = vadd.f32 %v5420_v3, %v5419_v10  ;;  %v5422_v2 = vpop.f32.mrb[2].mxu1  ;;  %v5383_v62 = vpop.f32.mrb[3].mxu0  ;;  %v3378_v37 = vrot.slane %v3287_v36, 5  ;;  %v5211_v3 = vrot.slane %v3290_v1, 9  ;;  %v3390_v46 = vrot.slane %v3292_v16, 5 }
 0x148   : > { %v5384_v22 = vadd.f32 %v5383_v62, %v5382_v41  ;;  %v5423_v33 = vpop.f32.mrb[3].mxu1  ;;  %v3297_v41 = vld [vmem:[%s6759_s28 + $0xa0] sm:$0xee]  ;;  %v3402_v62 = vrot.slane %v3299_v6, 5  ;;  %v5215_v36 = vrot.slane %v3298_v50, 9  ;;  %v5218_v6 = vrot.slane %v3305_v61, 9 }
 0x149   : > { %v7179_v55 = vadd.f32 %v5421_v18, %v5381_v26  ;;  %v5424_v51 = vadd.f32 %v5423_v33, %v5422_v2  ;;  %v7211_v24 = vsel %vm7161_vm5, %v5208_v11, %v3378_v37  ;;  %v7232_v18 = vsel %vm7161_vm5, %v5211_v3, %v3390_v46  ;;  %v6407_v46 = vld [vmem:[#allocation3 + $0x5a0] sm:$0xff]   ;;  %5934 = vmatpush3.bf16.msra.mxu0 %v6410_v48  ;;  %v6418_v61 = vld [vmem:[#allocation3 + $0x538] sm:$0xff]  }
 0x14a   : > { %v7219_v26 = vcombine.high %v7211_v24, %v7215_v25  ;;  %v7223_v27 = vcombine.low %v7211_v24, %v7215_v25  ;;  %v7236_v28 = vcombine.high %v7227_v34, %v7232_v18  ;;  %v7241_v29 = vcombine.low %v7227_v34, %v7232_v18  ;;  %5972 = vmatpush3.bf16.msra.mxu1 %v6407_v46 }
 0x14b   : > { %v7203_v10 = vadd.f32 %v5424_v51, %v5384_v22  ;;  %v5214_v8 = vrot.slane %v3297_v41, 9  ;;  %v3296_v22 = vld [vmem:[%s6759_s28 + $0x98] sm:$0x11]  ;;  %v7255_v33 = vsel %vm7161_vm5, %v5212_v47, %v3394_v49  ;;  %v3418_v47 = vrot.slane %v3307_v38, 5  ;;  %v3302_v49 = vld [vmem:[%s6759_s28 + $0xc8] sm:$0xee]  ;;  %5935 = vmatprep.subr.bf16.mxu0 %v6412_v5 }
 0x14c   : > { %v5385_v58 = vpop.f32.mrb[4].mxu0  ;;  %3809 = vmatprep.mubr.bf16.mxu0 %v7219_v26  ;;  %3874 = vmatprep.mubr.bf16.mxu1 %v7236_v28  ;;  %v3300_v51 = vld [vmem:[%s6759_s28 + $0xb8] sm:$0x11]  ;;  %v3398_v63 = vrot.slane %v3296_v22, 5  ;;  %v5217_v22 = vrot.slane %v3302_v49, 9  ;;  %v5273_v46 = vcombine.high %v7187_v35, %v7211_v24  ;;  %v6420_v49 = vld [vmem:[#allocation3 + $0x840] sm:$0xff]  }
 0x14d   : > { %v5425_v7 = vpop.f32.mrb[4].mxu1  ;;  %v5386_v15 = vpop.f32.mrb[5].mxu0  ;;  %3810 = vmatmul.mubr.bf16.gmra.mrb[100].mxu0 %v7223_v27  ;;  %3875 = vmatmul.mubr.bf16.gmra.mrb[100].mxu1 %v7241_v29  ;;  %v3406_v23 = vrot.slane %v3300_v51, 5 }
 0x14e   : > { %v5387_v56 = vadd.f32 %v5386_v15, %v5385_v58  ;;  %v5426_v39 = vpop.f32.mrb[5].mxu1  ;;  %v5388_v30 = vpop.f32.mrb[6].mxu0  ;;  %v5213_v58 = vrot.slane %v3294_v19, 9  ;;  %v3308_v19 = vld [vmem:[%s6759_s28 + $0xf8] sm:$0x11] }
 0x14f   : > { %v5427_v4 = vadd.f32 %v5426_v39, %v5425_v7  ;;  %v5428_v42 = vpop.f32.mrb[6].mxu1  ;;  %v5389_v53 = vpop.f32.mrb[7].mxu0  ;;  %v7263_v7 = vsel %vm7161_vm5, %v5214_v8, %v3402_v62  ;;  %v7279_v14 = vsel %vm7161_vm5, %v5215_v36, %v3406_v23  ;;  %v3306_v62 = vld [vmem:[%s6759_s28 + $0xe8] sm:$0xee]  ;;  %v3422_v36 = vrot.slane %v3308_v19, 5 }
 0x150   : > { %v5390_v52 = vadd.f32 %v5389_v53, %v5388_v30  ;;  %v5429_v17 = vpop.f32.mrb[7].mxu1  ;;  %v7267_v9 = vcombine.high %v7255_v33, %v7263_v7  ;;  %v7271_v11 = vsel %vm7161_vm5, %v5213_v58, %v3398_v63  ;;  %v7275_v37 = vcombine.low %v7255_v33, %v7263_v7 }
 0x151   : > { %v7245_v31 = vadd.f32 %v5427_v4, %v5387_v56  ;;  %v5430_v2 = vadd.f32 %v5429_v17, %v5428_v42  ;;  %v7284_v16 = vcombine.high %v7271_v11, %v7279_v14  ;;  %v7288_v32 = vcombine.low %v7271_v11, %v7279_v14  ;;  %v6409_v56 = vld [vmem:[#allocation3 + $0x5e8] sm:$0xff]   ;;  %v3301_v42 = vld [vmem:[%s6759_s28 + $0xc0] sm:$0xee] }
 0x152   : > { %3817 = vmatprep.mubr.bf16.mxu0 %v7267_v9  ;;  %5973 = vmatprep.subr.bf16.mxu1 %v6409_v56  ;;  %v3410_v17 = vrot.slane %v3303_v60, 5  ;;  %v7311_v58 = vsel %vm7161_vm5, %v5218_v6, %v3418_v47  ;;  %v5219_v63 = vrot.slane %v3306_v62, 9  ;;  %v6415_v56 = vld [vmem:[#allocation3 + $0x5b0] sm:$0xff]  }
 0x153   : > { %v7259_v21 = vadd.f32 %v5430_v2, %v5390_v52  ;;  %3882 = vmatprep.mubr.bf16.mxu1 %v7284_v16  ;;  %v5216_v52 = vrot.slane %v3301_v42, 9  ;;  %v3304_v2 = vld [vmem:[%s6759_s28 + $0xd8] sm:$0x11]  ;;  %5974 = vmatpush3.bf16.msra.mxu1 %v6411_v57 }
 0x154   : > { %v5391_v13 = vpop.f32.mrb[8].mxu0  ;;  %v3414_v50 = vrot.slane %v3304_v2, 5  ;;  %v7327_v45 = vsel %vm7161_vm5, %v5219_v63, %v3422_v36  ;;  %v6416_v57 = vld [vmem:[#allocation3 + $0x578] sm:$0xff]   ;;  %v5277_v2 = vcombine.high %v7215_v25, %v7255_v33  ;;  %v6422_v36 = vld [vmem:[#allocation3 + $0x800] sm:$0xff]  }
 0x155   : > { %v5431_v1 = vpop.f32.mrb[8].mxu1  ;;  %v5392_v3 = vpop.f32.mrb[9].mxu0  ;;  %3818 = vmatmul.mubr.bf16.gmra.mrb[104].mxu0 %v7275_v37  ;;  %3883 = vmatmul.mubr.bf16.gmra.mrb[104].mxu1 %v7288_v32  ;;  %v7303_v8 = vsel %vm7161_vm5, %v5216_v52, %v3410_v17  ;;  %v6419_v17 = vld [vmem:[#allocation3 + $0x5b8] sm:$0xff]  }
 0x156   : > { %v5393_v43 = vadd.f32 %v5392_v3, %v5391_v13  ;;  %v5432_v0 = vpop.f32.mrb[9].mxu1  ;;  %v5394_v44 = vpop.f32.mrb[10].mxu0  ;;  %v7315_v23 = vcombine.high %v7303_v8, %v7311_v58  ;;  %v7319_v12 = vsel %vm7161_vm5, %v5217_v22, %v3414_v50  ;;  %v7323_v13 = vcombine.low %v7303_v8, %v7311_v58  ;;  %v6413_v3 = vld [vmem:[#allocation3 + $0x5f0] sm:$0xff]   ;;  %v6421_v50 = vld [vmem:[#allocation3 + $0x8c0] sm:$0xff]  }
 0x157   : > { %v5433_v15 = vadd.f32 %v5432_v0, %v5431_v1  ;;  %v5434_v39 = vpop.f32.mrb[10].mxu1  ;;  %v5395_v30 = vpop.f32.mrb[11].mxu0  ;;  %v7334_v0 = vcombine.high %v7319_v12, %v7327_v45  ;;  %v7338_v40 = vcombine.low %v7319_v12, %v7327_v45  ;;  %5975 = vmatprep.subr.bf16.mxu1 %v6413_v3  ;;  %v5274_v22 = vcombine.low %v7195_v54, %v7227_v34 }
 0x158   : > { %v5396_v53 = vadd.f32 %v5395_v30, %v5394_v44  ;;  %v5435_v20 = vpop.f32.mrb[11].mxu1  ;;  %3825 = vmatprep.mubr.bf16.mxu0 %v7315_v23  ;;  %5976 = vmatpush3.bf16.msra.mxu1 %v6415_v56  ;;  %v6426_v56 = vld [vmem:[#allocation3 + $0x808] sm:$0xff]  }
 0x159   : > { %v7293_v4 = vadd.f32 %v5433_v15, %v5393_v43  ;;  %v5436_v41 = vadd.f32 %v5435_v20, %v5434_v39  ;;  %v6414_v15 = vld [vmem:[#allocation3 + $0x530] sm:$0xff]   ;;  %v5275_v39 = vcombine.high %v7195_v54, %v7227_v34  ;;  %3890 = vmatprep.mubr.bf16.mxu1 %v7334_v0 }
 0x15a   : > { %5936 = vmatpush3.bf16.msra.mxu0 %v6414_v15  ;;  %v6425_v15 = vld [vmem:[#allocation3 + $0x8c8] sm:$0xff]  }
 0x15b   : > { %v7307_v51 = vadd.f32 %v5436_v41, %v5396_v53  ;;  %v6417_v53 = vld [vmem:[#allocation3 + $0x5f8] sm:$0xff]   ;;  %5937 = vmatprep.subr.bf16.mxu0 %v6416_v57  ;;  %v5272_v41 = vcombine.low %v7187_v35, %v7211_v24  ;;  %v6423_v24 = vld [vmem:[#allocation3 + $0x880] sm:$0xff]   ;;  %v5276_v57 = vcombine.low %v7215_v25, %v7255_v33  ;;  %v6430_v25 = vld [vmem:[#allocation3 + $0x810] sm:$0xff]  }
 0x15c   : > { %v5397_v1 = vpop.f32.mrb[12].mxu0  ;;  %5977 = vmatprep.subr.bf16.mxu1 %v6417_v53  ;;  %v6428_v53 = vld [vmem:[#allocation3 + $0x850] sm:$0xff]  }
 0x15d   : > { %v5437_v43 = vpop.f32.mrb[12].mxu1  ;;  %v5398_v44 = vpop.f32.mrb[13].mxu0  ;;  %3826 = vmatmul.mubr.bf16.gmra.mrb[108].mxu0 %v7323_v13  ;;  %3891 = vmatmul.mubr.bf16.gmra.mrb[108].mxu1 %v7338_v40 }
 0x15e   : > { %v5399_v48 = vadd.f32 %v5398_v44, %v5397_v1  ;;  %v5438_v30 = vpop.f32.mrb[13].mxu1  ;;  %v5400_v60 = vpop.f32.mrb[14].mxu0  ;;  %4248 = vmatprep.mubr.bf16.mxu0 %v5273_v46  ;;  %4313 = vmatprep.mubr.bf16.mxu1 %v5275_v39  ;;  %v5279_v1 = vcombine.high %v7232_v18, %v7271_v11 }
 0x15f   : > { %v5439_v42 = vadd.f32 %v5438_v30, %v5437_v43  ;;  %v5440_v20 = vpop.f32.mrb[14].mxu1  ;;  %v5401_v52 = vpop.f32.mrb[15].mxu0  ;;  %5938 = vmatpush3.bf16.msra.mxu0 %v6418_v61  ;;  %5978 = vmatpush3.bf16.msra.mxu1 %v6419_v17  ;;  %v6424_v43 = vld [vmem:[#allocation3 + $0x848] sm:$0xff]  }
 0x160   : > { %v5402_v6 = vadd.f32 %v5401_v52, %v5400_v60  ;;  %v5441_v47 = vpop.f32.mrb[15].mxu1  ;;  %6003 = vmatprep.subr.bf16.mxu0 %v6420_v49  ;;  %6043 = vmatprep.subr.bf16.mxu1 %v6421_v50  ;;  %v6427_v30 = vld [vmem:[#allocation3 + $0x888] sm:$0xff]  }
 0x161   : > { %v7345_v38 = vadd.f32 %v5439_v42, %v5399_v48  ;;  %v5442_v62 = vadd.f32 %v5441_v47, %v5440_v20  ;;  %v5281_v20 = vcombine.high %v7263_v7, %v7303_v8 }
 0x163   : > { %v7353_v5 = vadd.f32 %v5442_v62, %v5402_v6  ;;  %v6429_v6 = vld [vmem:[#allocation3 + $0x8d0] sm:$0xff]   ;;  %v5283_v62 = vcombine.high %v7279_v14, %v7319_v12 }
 0x164   : > { %v5459_v19 = vpop.f32.mrb[16].mxu0 }
 0x165   : > { %v5499_v63 = vpop.f32.mrb[16].mxu1  ;;  %v5460_v35 = vpop.f32.mrb[17].mxu0  ;;  %4249 = vmatmul.mubr.bf16.vlgmr.msra.gmra.mrb[112].mxu0 %v5272_v41  ;;  %4314 = vmatmul.mubr.bf16.vlgmr.msra.gmra.mrb[112].mxu1 %v5274_v22  ;;  %v5278_v41 = vcombine.low %v7232_v18, %v7271_v11  ;;  %v6432_v22 = vld [vmem:[#allocation3 + $0x858] sm:$0xff]  }
 0x166   : > { %v5461_v3 = vadd.f32 %v5460_v35, %v5459_v19  ;;  %v5500_v46 = vpop.f32.mrb[17].mxu1  ;;  %6004 = vmatpush3.bf16.msra.mxu0 %v6422_v36  ;;  %4256 = vmatprep.mubr.bf16.mxu0 %v5277_v2  ;;  %v5462_v34 = vpop.f32.mrb[18].mxu0  ;;  %v6431_v2 = vld [vmem:[#allocation3 + $0x890] sm:$0xff]   ;;  %v6434_v35 = vld [vmem:[#allocation3 + $0x818] sm:$0xff]  }
 0x167   : > { %v5501_v54 = vadd.f32 %v5500_v46, %v5499_v63  ;;  %v5502_v44 = vpop.f32.mrb[18].mxu1  ;;  %6044 = vmatpush3.bf16.msra.mxu1 %v6423_v24  ;;  %6005 = vmatprep.subr.bf16.mxu0 %v6424_v43  ;;  %v5463_v48 = vpop.f32.mrb[19].mxu0  ;;  %v6433_v63 = vld [vmem:[#allocation3 + $0x8d8] sm:$0xff]   ;;  %v5280_v46 = vcombine.low %v7263_v7, %v7303_v8  ;;  %v6439_v7 = vld [vmem:[#allocation3 + $0x8a0] sm:$0xff]  }
 0x168   : > { %6045 = vmatprep.subr.bf16.mxu1 %v6425_v15  ;;  %4321 = vmatprep.mubr.bf16.mxu1 %v5279_v1  ;;  %v5464_v42 = vadd.f32 %v5463_v48, %v5462_v34  ;;  %v5503_v60 = vpop.f32.mrb[19].mxu1 }
 0x169   : > { %v1138_v39 = vadd.f32 %v5501_v54, %v5461_v3  ;;  %v5504_v52 = vadd.f32 %v5503_v60, %v5502_v44  ;;  %v6435_v3 = vld [vmem:[#allocation3 + $0x898] sm:$0xff]  }
 0x16a   : > { %6006 = vmatpush3.bf16.msra.mxu0 %v6426_v56  ;;  %v5282_v56 = vcombine.low %v7279_v14, %v7319_v12 }
 0x16b   : > { %v7362_v61 = vadd.f32 %v1138_v39, %v7179_v55  ;;  %6046 = vmatpush3.bf16.msra.mxu1 %v6427_v30  ;;  %6007 = vmatprep.subr.bf16.mxu0 %v6428_v53  ;;  %v1141_v33 = vadd.f32 %v5504_v52, %v5464_v42  ;;  %v6437_v39 = vld [vmem:[#allocation3 + $0x8e0] sm:$0xff]  }
 0x16c   : > { %v5465_v17 = vpop.f32.mrb[20].mxu0  ;;  %6047 = vmatprep.subr.bf16.mxu1 %v6429_v6  ;;  %v6438_v30 = vld [vmem:[#allocation3 + $0x820] sm:$0xff]  }
 0x16d   : > { %v5505_v47 = vpop.f32.mrb[20].mxu1  ;;  %v5466_v49 = vpop.f32.mrb[21].mxu0  ;;  %4257 = vmatmul.mubr.bf16.gmra.mrb[116].mxu0 %v5276_v57  ;;  %v7369_v18 = vadd.f32 %v1141_v33, %v7203_v10  ;;  %4322 = vmatmul.mubr.bf16.gmra.mrb[116].mxu1 %v5278_v41  ;;  %v6436_v10 = vld [vmem:[#allocation3 + $0x860] sm:$0xff]   ;;  %v3311_v33 = vld [vmem:[%s6759_s28 + $0x110] sm:$0x11] }
 0x16e   : > { %v5467_v55 = vadd.f32 %v5466_v49, %v5465_v17  ;;  %v5506_v19 = vpop.f32.mrb[21].mxu1  ;;  %6008 = vmatpush3.bf16.msra.mxu0 %v6430_v25  ;;  %4264 = vmatprep.mubr.bf16.mxu0 %v5281_v20  ;;  %v5468_v50 = vpop.f32.mrb[22].mxu0  ;;  %v6441_v20 = vld [vmem:[#allocation3 + $0x8e8] sm:$0xff]   ;;  %v3309_v25 = vld [vmem:[%s6759_s28 + $0x100] sm:$0xee] }
 0x16f   : > { %v5507_v11 = vadd.f32 %v5506_v19, %v5505_v47  ;;  %v5508_v36 = vpop.f32.mrb[22].mxu1  ;;  %6048 = vmatpush3.bf16.msra.mxu1 %v6431_v2  ;;  %6009 = vmatprep.subr.bf16.mxu0 %v6432_v22  ;;  %v5469_v1 = vpop.f32.mrb[23].mxu0  ;;  %v6442_v17 = vld [vmem:[#allocation3 + $0x828] sm:$0xff]   ;;  %v3312_v19 = vld [vmem:[%s6759_s28 + $0x118] sm:$0x11] }
 0x170   : > { %6049 = vmatprep.subr.bf16.mxu1 %v6433_v63  ;;  %4329 = vmatprep.mubr.bf16.mxu1 %v5283_v62  ;;  %v5470_v43 = vadd.f32 %v5469_v1, %v5468_v50  ;;  %v5509_v54 = vpop.f32.mrb[23].mxu1  ;;  %v6443_v47 = vld [vmem:[#allocation3 + $0x8a8] sm:$0xff]   ;;  %v3426_v62 = vrot.slane %v3311_v33, 5  ;;  %v3430_v63 = vrot.slane %v3312_v19, 5 }
 0x171   : > { %v1146_v24 = vadd.f32 %v5507_v11, %v5467_v55  ;;  %v5510_v15 = vadd.f32 %v5509_v54, %v5508_v36  ;;  %v3310_v55 = vld [vmem:[%s6759_s28 + $0x108] sm:$0xee] }
 0x172   : > { %6010 = vmatpush3.bf16.msra.mxu0 %v6434_v35  ;;  %v5221_v50 = vrot.slane %v3310_v55, 9  ;;  %v6444_v35 = vld [vmem:[#allocation3 + $0x870] sm:$0xff]  }
 0x173   : > { %v7374_v34 = vadd.f32 %v1146_v24, %v7245_v31  ;;  %6050 = vmatpush3.bf16.msra.mxu1 %v6435_v3  ;;  %6011 = vmatprep.subr.bf16.mxu0 %v6436_v10  ;;  %v1149_v57 = vadd.f32 %v5510_v15, %v5470_v43  ;;  %v6440_v31 = vld [vmem:[#allocation3 + $0x868] sm:$0xff]   ;;  %v6445_v43 = vld [vmem:[#allocation3 + $0x8f0] sm:$0xff]  }
 0x174   : > { %v5471_v44 = vpop.f32.mrb[24].mxu0  ;;  %6051 = vmatprep.subr.bf16.mxu1 %v6437_v39 }
 0x175   : > { %v5511_v48 = vpop.f32.mrb[24].mxu1  ;;  %v5472_v42 = vpop.f32.mrb[25].mxu0  ;;  %4265 = vmatmul.mubr.bf16.gmra.mrb[120].mxu0 %v5280_v46  ;;  %v7379_v53 = vadd.f32 %v1149_v57, %v7259_v21  ;;  %4330 = vmatmul.mubr.bf16.gmra.mrb[120].mxu1 %v5282_v56  ;;  %v5220_v21 = vrot.slane %v3309_v25, 9  ;;  %v7396_v46 = vsel %vm7161_vm5, %v5221_v50, %v3430_v63 }
 0x176   : > { %v5473_v8 = vadd.f32 %v5472_v42, %v5471_v44  ;;  %v5512_v60 = vpop.f32.mrb[25].mxu1  ;;  %6012 = vmatpush3.bf16.msra.mxu0 %v6438_v30  ;;  %v5474_v12 = vpop.f32.mrb[26].mxu0  ;;  %v5287_v10 = vcombine.high %v7327_v45, %v7396_v46  ;;  %v5286_v15 = vcombine.low %v7327_v45, %v7396_v46  ;;  %v6446_v44 = vld [vmem:[#allocation3 + $0x830] sm:$0xff]  }
 0x177   : > { %v5513_v14 = vadd.f32 %v5512_v60, %v5511_v48  ;;  %v5514_v52 = vpop.f32.mrb[26].mxu1  ;;  %6052 = vmatpush3.bf16.msra.mxu1 %v6439_v7  ;;  %6013 = vmatprep.subr.bf16.mxu0 %v6440_v31  ;;  %v5475_v6 = vpop.f32.mrb[27].mxu0  ;;  %v7390_v36 = vsel %vm7161_vm5, %v5220_v21, %v3426_v62  ;;  %v6447_v48 = vld [vmem:[#allocation3 + $0x8b0] sm:$0xff]   ;;  %v6450_v60 = vld [vmem:[#allocation3 + $0x838] sm:$0xff]  }
 0x178   : > { %6053 = vmatprep.subr.bf16.mxu1 %v6441_v20  ;;  %v5476_v49 = vadd.f32 %v5475_v6, %v5474_v12  ;;  %v5515_v2 = vpop.f32.mrb[27].mxu1  ;;  %v5285_v3 = vcombine.high %v7311_v58, %v7390_v36  ;;  %4337 = vmatprep.mubr.bf16.mxu1 %v5287_v10  ;;  %v3315_v10 = vld [vmem:[%s6759_s28 + $0x130] sm:$0x11] }
 0x179   : > { %v1154_v41 = vadd.f32 %v5513_v14, %v5473_v8  ;;  %v5516_v11 = vadd.f32 %v5515_v2, %v5514_v52  ;;  %v6449_v8 = vld [vmem:[#allocation3 + $0x8f8] sm:$0xff]  }
 0x17a   : > { %6014 = vmatpush3.bf16.msra.mxu0 %v6442_v17  ;;  %4272 = vmatprep.mubr.bf16.mxu0 %v5285_v3  ;;  %v6451_v14 = vld [vmem:[#allocation3 + $0x8b8] sm:$0xff]  }
 0x17b   : > { %v7386_v22 = vadd.f32 %v1154_v41, %v7293_v4  ;;  %6054 = vmatpush3.bf16.msra.mxu1 %v6443_v47  ;;  %v1157_v24 = vadd.f32 %v5516_v11, %v5476_v49  ;;  %v5284_v4 = vcombine.low %v7311_v58, %v7390_v36  ;;  %6015 = vmatprep.subr.bf16.mxu0 %v6444_v35  ;;  %v6448_v58 = vld [vmem:[#allocation3 + $0x878] sm:$0xff]  }
 0x17c   : > { %v5477_v1 = vpop.f32.mrb[28].mxu0  ;;  %6055 = vmatprep.subr.bf16.mxu1 %v6445_v43 }
 0x17d   : > { %v5517_v54 = vpop.f32.mrb[28].mxu1  ;;  %v7405_v56 = vadd.f32 %v1157_v24, %v7307_v51  ;;  %v5478_v39 = vpop.f32.mrb[29].mxu0  ;;  %4273 = vmatmul.mubr.bf16.gmra.mrb[124].mxu0 %v5284_v4  ;;  %4338 = vmatmul.mubr.bf16.gmra.mrb[124].mxu1 %v5286_v15 }
 0x17e   : > { %v5479_v30 = vadd.f32 %v5478_v39, %v5477_v1  ;;  %v5518_v57 = vpop.f32.mrb[29].mxu1  ;;  %v5480_v7 = vpop.f32.mrb[30].mxu0  ;;  %6016 = vmatpush3.bf16.msra.mxu0 %v6446_v44  ;;  %4671 = vmatprep.mubr.bf16.mxu0 %v7219_v26 }
 0x17f   : > { %v5519_v42 = vadd.f32 %v5518_v57, %v5517_v54  ;;  %v5520_v45 = vpop.f32.mrb[30].mxu1  ;;  %6056 = vmatpush3.bf16.msra.mxu1 %v6447_v48  ;;  %6017 = vmatprep.subr.bf16.mxu0 %v6448_v58  ;;  %v5481_v31 = vpop.f32.mrb[31].mxu0  ;;  %v3313_v54 = vld [vmem:[%s6759_s28 + $0x120] sm:$0xee]  ;;  %v3314_v48 = vld [vmem:[%s6759_s28 + $0x128] sm:$0xee] }
 0x180   : > { %6057 = vmatprep.subr.bf16.mxu1 %v6449_v8  ;;  %v5482_v12 = vadd.f32 %v5481_v31, %v5480_v7  ;;  %v5521_v20 = vpop.f32.mrb[31].mxu1  ;;  %4736 = vmatprep.mubr.bf16.mxu1 %v7236_v28 }
 0x181   : > { %v1162_v51 = vadd.f32 %v5519_v42, %v5479_v30  ;;  %v5522_v41 = vadd.f32 %v5521_v20, %v5520_v45  ;;  %v3316_v30 = vld [vmem:[%s6759_s28 + $0x138] sm:$0x11]  ;;  %v5222_v45 = vrot.slane %v3313_v54, 9  ;;  %v5223_v20 = vrot.slane %v3314_v48, 9 }
 0x182   : > { %6018 = vmatpush3.bf16.msra.mxu0 %v6450_v60  ;;  %v3434_v60 = vrot.slane %v3315_v10, 5 }
 0x183   : > { %v7410_v17 = vadd.f32 %v1162_v51, %v7345_v38  ;;  %6058 = vmatpush3.bf16.msra.mxu1 %v6451_v14  ;;  %v1165_v2 = vadd.f32 %v5522_v41, %v5482_v12 }
 0x184   : > { %v5539_v52 = vpop.f32.mrb[32].mxu0 }
 0x185   : > { %v5579_v6 = vpop.f32.mrb[32].mxu1  ;;  %v5540_v47 = vpop.f32.mrb[33].mxu0  ;;  %4672 = vmatmul.mubr.bf16.vlgmr.msra.gmra.mrb[128].mxu0 %v7223_v27  ;;  %v7414_v28 = vadd.f32 %v1165_v2, %v7353_v5 }
 0x186   : > { %v5541_v25 = vadd.f32 %v5540_v47, %v5539_v52  ;;  %v5580_v33 = vpop.f32.mrb[33].mxu1  ;;  %v5542_v49 = vpop.f32.mrb[34].mxu0  ;;  %4737 = vmatmul.mubr.bf16.vlgmr.msra.gmra.mrb[128].mxu1 %v7241_v29  ;;  %4679 = vmatprep.mubr.bf16.mxu0 %v7267_v9  ;;  %v3438_v52 = vrot.slane %v3316_v30, 5 }
 0x187   : > { %v5581_v21 = vadd.f32 %v5580_v33, %v5579_v6  ;;  %v5582_v62 = vpop.f32.mrb[34].mxu1  ;;  %v5543_v26 = vpop.f32.mrb[35].mxu0  ;;  %4744 = vmatprep.mubr.bf16.mxu1 %v7284_v16 }
 0x188   : > { %v5544_v55 = vadd.f32 %v5543_v26, %v5542_v49  ;;  %v5583_v19 = vpop.f32.mrb[35].mxu1 }
 0x189   : > { %v1563_v38 = vadd.f32 %v5581_v21, %v5541_v25  ;;  %v5584_v50 = vadd.f32 %v5583_v19, %v5582_v62 }
 0x18b   : > { %v7420_v27 = vadd.f32 %v1563_v38, %v7362_v61  ;;  %v1566_v5 = vadd.f32 %v5584_v50, %v5544_v55  ;;  %v3435_v55 = vsel %vm7161_vm5, %v5222_v45, %v3434_v60 }
 0x18c   : > { %v5545_v11 = vpop.f32.mrb[36].mxu0 }
 0x18d   : > { %v5585_v63 = vpop.f32.mrb[36].mxu1  ;;  %v5546_v35 = vpop.f32.mrb[37].mxu0  ;;  %v7425_v9 = vadd.f32 %v1566_v5, %v7369_v18  ;;  %4680 = vmatmul.mubr.bf16.gmra.mrb[132].mxu0 %v7275_v37 }
 0x18e   : > { %v5547_v24 = vadd.f32 %v5546_v35, %v5545_v11  ;;  %v5586_v1 = vpop.f32.mrb[37].mxu1  ;;  %v5548_v3 = vpop.f32.mrb[38].mxu0  ;;  %4745 = vmatmul.mubr.bf16.gmra.mrb[132].mxu1 %v7288_v32  ;;  %4687 = vmatprep.mubr.bf16.mxu0 %v7315_v23  ;;  %v3439_v32 = vsel %vm7161_vm5, %v5223_v20, %v3438_v52 }
 0x18f   : > { %v5588_v4 = vpop.f32.mrb[38].mxu1  ;;  %v5549_v43 = vpop.f32.mrb[39].mxu0  ;;  %v5587_v15 = vadd.f32 %v5586_v1, %v5585_v63  ;;  %4752 = vmatprep.mubr.bf16.mxu1 %v7334_v0  ;;  %v5321_v1 = vcombine.high %v7390_v36, %v3435_v55  ;;  %v5323_v5 = vcombine.high %v7396_v46, %v3439_v32 }
 0x190   : > { %v5550_v44 = vadd.f32 %v5549_v43, %v5548_v3  ;;  %v5589_v29 = vpop.f32.mrb[39].mxu1 }
 0x191   : > { %v5590_v57 = vadd.f32 %v5589_v29, %v5588_v4  ;;  %v1571_v42 = vadd.f32 %v5587_v15, %v5547_v24 }
 0x193   : > { %v1574_v51 = vadd.f32 %v5590_v57, %v5550_v44  ;;  %v7430_v18 = vadd.f32 %v1571_v42, %v7374_v34  ;;  %v5322_v42 = vcombine.low %v7396_v46, %v3439_v32 }
 0x194   : > { %v5551_v39 = vpop.f32.mrb[40].mxu0 }
 0x195   : > { %v5591_v58 = vpop.f32.mrb[40].mxu1  ;;  %v5552_v16 = vpop.f32.mrb[41].mxu0  ;;  %v7434_v25 = vadd.f32 %v1574_v51, %v7379_v53  ;;  %4688 = vmatmul.mubr.bf16.gmra.mrb[136].mxu0 %v7323_v13 }
 0x196   : > { %v5553_v61 = vadd.f32 %v5552_v16, %v5551_v39  ;;  %v5592_v7 = vpop.f32.mrb[41].mxu1  ;;  %v5554_v8 = vpop.f32.mrb[42].mxu0  ;;  %4753 = vmatmul.mubr.bf16.gmra.mrb[136].mxu1 %v7338_v40  ;;  %4695 = vmatprep.mubr.bf16.mxu0 %v5321_v1  ;;  %v5320_v16 = vcombine.low %v7390_v36, %v3435_v55 }
 0x197   : > { %v5593_v31 = vadd.f32 %v5592_v7, %v5591_v58  ;;  %v5594_v14 = vpop.f32.mrb[42].mxu1  ;;  %v5555_v12 = vpop.f32.mrb[43].mxu0  ;;  %4760 = vmatprep.mubr.bf16.mxu1 %v5323_v5 }
 0x198   : > { %v5556_v41 = vadd.f32 %v5555_v12, %v5554_v8  ;;  %v5595_v6 = vpop.f32.mrb[43].mxu1 }
 0x199   : > { %v1579_v33 = vadd.f32 %v5593_v31, %v5553_v61  ;;  %v5596_v49 = vadd.f32 %v5595_v6, %v5594_v14 }
 0x19b   : > { %v7442_v37 = vadd.f32 %v1579_v33, %v7386_v22  ;;  %v1582_v53 = vadd.f32 %v5596_v49, %v5556_v41 }
 0x19c   : > { %v5557_v47 = vpop.f32.mrb[44].mxu0 }
 0x19d   : > { %v5597_v2 = vpop.f32.mrb[44].mxu1  ;;  %v5558_v21 = vpop.f32.mrb[45].mxu0  ;;  %v7447_v63 = vadd.f32 %v1582_v53, %v7405_v56  ;;  %4696 = vmatmul.mubr.bf16.gmra.mrb[140].mxu0 %v5320_v16 }
 0x19e   : > { %v5559_v62 = vadd.f32 %v5558_v21, %v5557_v47  ;;  %v5598_v26 = vpop.f32.mrb[45].mxu1  ;;  %v5560_v34 = vpop.f32.mrb[46].mxu0  ;;  %4761 = vmatmul.mubr.bf16.gmra.mrb[140].mxu1 %v5322_v42 }
 0x19f   : > { %v5599_v19 = vadd.f32 %v5598_v26, %v5597_v2  ;;  %v5600_v11 = vpop.f32.mrb[46].mxu1  ;;  %v5561_v38 = vpop.f32.mrb[47].mxu0 }
 0x1a0   : > { %v5562_v50 = vadd.f32 %v5561_v38, %v5560_v34  ;;  %v5601_v23 = vpop.f32.mrb[47].mxu1 }
 0x1a1   : > { %v1587_v35 = vadd.f32 %v5599_v19, %v5559_v62  ;;  %v5602_v0 = vadd.f32 %v5601_v23, %v5600_v11 }
 0x1a3   : > { %v7452_v4 = vadd.f32 %v1587_v35, %v7410_v17  ;;  %v1590_v43 = vadd.f32 %v5602_v0, %v5562_v50 }
 0x1a4   : > { %v5619_v24 = vpop.f32.mrb[48].mxu0 }
 0x1a5   : > { %v5659_v3 = vpop.f32.mrb[48].mxu1  ;;  %v5620_v22 = vpop.f32.mrb[49].mxu0  ;;  %v7456_v29 = vadd.f32 %v1590_v43, %v7414_v28 }
 0x1a6   : > { %v5621_v59 = vadd.f32 %v5620_v22, %v5619_v24  ;;  %v5660_v54 = vpop.f32.mrb[49].mxu1  ;;  %v5622_v10 = vpop.f32.mrb[50].mxu0 }
 0x1a7   : > { %v5661_v15 = vadd.f32 %v5660_v54, %v5659_v3  ;;  %v5662_v44 = vpop.f32.mrb[50].mxu1  ;;  %v5623_v56 = vpop.f32.mrb[51].mxu0 }
 0x1a8   : > { %v5624_v39 = vadd.f32 %v5623_v56, %v5622_v10  ;;  %v5663_v48 = vpop.f32.mrb[51].mxu1 }
 0x1a9   : > { %v2361_v30 = vadd.f32 %v5661_v15, %v5621_v59  ;;  %v5664_v17 = vadd.f32 %v5663_v48, %v5662_v44 }
 0x1ab   : > { %v7460_v57 = vadd.f32 %v2361_v30, %v7420_v27  ;;  %v2364_v58 = vadd.f32 %v5664_v17, %v5624_v39 }
 0x1ac   : > { %v5625_v28 = vpop.f32.mrb[52].mxu0 }
 0x1ad   : > { %v7465_v13 = vadd.f32 %v2364_v58, %v7425_v9  ;;  %v5626_v61 = vpop.f32.mrb[53].mxu0  ;;  %v5665_v8 = vpop.f32.mrb[52].mxu1 }
 0x1ae   : > { %v5627_v40 = vadd.f32 %v5626_v61, %v5625_v28  ;;  %v5628_v7 = vpop.f32.mrb[54].mxu0  ;;  %v5666_v60 = vpop.f32.mrb[53].mxu1 }
 0x1af   : > { %v5629_v45 = vpop.f32.mrb[55].mxu0  ;;  %v5667_v27 = vadd.f32 %v5666_v60, %v5665_v8  ;;  %v5668_v31 = vpop.f32.mrb[54].mxu1 }
 0x1b0   : > { %v5630_v51 = vadd.f32 %v5629_v45, %v5628_v7  ;;  %v5669_v14 = vpop.f32.mrb[55].mxu1 }
 0x1b1   : > { %v2369_v12 = vadd.f32 %v5667_v27, %v5627_v40  ;;  %v5670_v36 = vadd.f32 %v5669_v14, %v5668_v31 }
 0x1b3   : > { %v7468_v46 = vadd.f32 %v2369_v12, %v7430_v18  ;;  %v2372_v9 = vadd.f32 %v5670_v36, %v5630_v51 }
 0x1b5   : > { %v7471_v20 = vadd.f32 %v2372_v9, %v7434_v25 }
 0x1b7   : > { %v5631_v52 = vpop.f32.mrb[56].mxu0 }
 0x1b8   : > { %v5632_v41 = vpop.f32.mrb[57].mxu0 }
 0x1b9   : > { %v5633_v6 = vadd.f32 %v5632_v41, %v5631_v52  ;;  %v5634_v47 = vpop.f32.mrb[58].mxu0  ;;  %v5671_v49 = vpop.f32.mrb[56].mxu1 }
 0x1ba   : > { %v5635_v33 = vpop.f32.mrb[59].mxu0  ;;  %v5672_v21 = vpop.f32.mrb[57].mxu1 }
 0x1bb   : > { %v5636_v2 = vadd.f32 %v5635_v33, %v5634_v47  ;;  %v5673_v62 = vadd.f32 %v5672_v21, %v5671_v49  ;;  %v5674_v26 = vpop.f32.mrb[58].mxu1 }
 0x1bc   : > { %v5675_v34 = vpop.f32.mrb[59].mxu1 }
 0x1bd   : > { %v2377_v55 = vadd.f32 %v5673_v62, %v5633_v6  ;;  %v5676_v53 = vadd.f32 %v5675_v34, %v5674_v26 }
 0x1bf   : > { %v7474_v18 = vadd.f32 %v2377_v55, %v7442_v37  ;;  %v2380_v19 = vadd.f32 %v5676_v53, %v5636_v2  ;;  %v5637_v11 = vpop.f32.mrb[60].mxu0 }
 0x1c0   : > { %v5638_v38 = vpop.f32.mrb[61].mxu0 }
 0x1c1   : > { %v7477_v25 = vadd.f32 %v2380_v19, %v7447_v63  ;;  %v5639_v32 = vadd.f32 %v5638_v38, %v5637_v11  ;;  %v5640_v50 = vpop.f32.mrb[62].mxu0  ;;  %v5677_v35 = vpop.f32.mrb[60].mxu1 }
 0x1c2   : > { %v5641_v23 = vpop.f32.mrb[63].mxu0  ;;  %v5678_v24 = vpop.f32.mrb[61].mxu1 }
 0x1c3   : > { %v5642_v0 = vadd.f32 %v5641_v23, %v5640_v50  ;;  %v5679_v1 = vadd.f32 %v5678_v24, %v5677_v35  ;;  %v5680_v3 = vpop.f32.mrb[62].mxu1 }
 0x1c4   : > { %v5681_v22 = vpop.f32.mrb[63].mxu1 }
 0x1c5   : > { %v2385_v5 = vadd.f32 %v5679_v1, %v5639_v32  ;;  %v5682_v43 = vadd.f32 %v5681_v22, %v5680_v3 }
 0x1c7   : > { %v5699_v59 = vpop.f32.mrb[64].mxu0  ;;  %v2397_v54 = vadd.f32 %v2385_v5, %v7452_v4  ;;  %v2388_v10 = vadd.f32 %v5682_v43, %v5642_v0 }
 0x1c8   : > { %v5700_v37 = vpop.f32.mrb[65].mxu0 }
 0x1c9   : > { %v5701_v63 = vadd.f32 %v5700_v37, %v5699_v59  ;;  %v5702_v15 = vpop.f32.mrb[66].mxu0  ;;  %v2398_v56 = vadd.f32 %v2388_v10, %v7456_v29  ;;  %v5739_v39 = vpop.f32.mrb[64].mxu1 }
 0x1ca   : > { %v5703_v44 = vpop.f32.mrb[67].mxu0  ;;  %v5740_v30 = vpop.f32.mrb[65].mxu1 }
 0x1cb   : > { %v5704_v48 = vadd.f32 %v5703_v44, %v5702_v15  ;;  %v5741_v17 = vadd.f32 %v5740_v30, %v5739_v39  ;;  %v5742_v58 = vpop.f32.mrb[66].mxu1 }
 0x1cc   : > { %v5743_v16 = vpop.f32.mrb[67].mxu1 }
 0x1cd   : > { %v2808_v42 = vadd.f32 %v5741_v17, %v5701_v63  ;;  %v5744_v28 = vadd.f32 %v5743_v16, %v5742_v58 }
 0x1cf   : > { %v5705_v61 = vpop.f32.mrb[68].mxu0  ;;  %v2838_v7 = vadd.f32 %v2808_v42, %v7460_v57  ;;  %v2811_v8 = vadd.f32 %v5744_v28, %v5704_v48 }
 0x1d0   : > { %v5706_v40 = vpop.f32.mrb[69].mxu0 }
 0x1d1   : > { %v5707_v4 = vadd.f32 %v5706_v40, %v5705_v61  ;;  %v5708_v45 = vpop.f32.mrb[70].mxu0  ;;  %v2839_v51 = vadd.f32 %v2811_v8, %v7465_v13  ;;  %v5745_v27 = vpop.f32.mrb[68].mxu1 }
 0x1d2   : > { %v5709_v60 = vpop.f32.mrb[71].mxu0  ;;  %v5746_v31 = vpop.f32.mrb[69].mxu1 }
 0x1d3   : > { %v5710_v29 = vadd.f32 %v5709_v60, %v5708_v45  ;;  %v5747_v14 = vadd.f32 %v5746_v31, %v5745_v27  ;;  %v5748_v12 = vpop.f32.mrb[70].mxu1 }
 0x1d4   : > { %v5749_v36 = vpop.f32.mrb[71].mxu1 }
 0x1d5   : > { %v2816_v9 = vadd.f32 %v5747_v14, %v5707_v4  ;;  %v5750_v52 = vadd.f32 %v5749_v36, %v5748_v12 }
 0x1d7   : > { %v5711_v41 = vpop.f32.mrb[72].mxu0  ;;  %v2840_v47 = vadd.f32 %v2816_v9, %v7468_v46  ;;  %v2819_v33 = vadd.f32 %v5750_v52, %v5710_v29 }
 0x1d8   : > { %v5712_v6 = vpop.f32.mrb[73].mxu0 }
 0x1d9   : > { %v5713_v57 = vadd.f32 %v5712_v6, %v5711_v41  ;;  %v5714_v49 = vpop.f32.mrb[74].mxu0  ;;  %v2841_v21 = vadd.f32 %v2819_v33, %v7471_v20  ;;  %v5751_v62 = vpop.f32.mrb[72].mxu1 }
 0x1da   : > { %v5715_v2 = vpop.f32.mrb[75].mxu0  ;;  %v5752_v26 = vpop.f32.mrb[73].mxu1 }
 0x1db   : > { %v5716_v13 = vadd.f32 %v5715_v2, %v5714_v49  ;;  %v5753_v34 = vadd.f32 %v5752_v26, %v5751_v62  ;;  %v5754_v55 = vpop.f32.mrb[74].mxu1 }
 0x1dc   : > { %v5755_v53 = vpop.f32.mrb[75].mxu1 }
 0x1dd   : > { %v2824_v19 = vadd.f32 %v5753_v34, %v5713_v57  ;;  %v5756_v11 = vadd.f32 %v5755_v53, %v5754_v55 }
 0x1df   : > { %v7486_v38 = vadd.f32 %v2824_v19, %v7474_v18  ;;  %v2827_v32 = vadd.f32 %v5756_v11, %v5716_v13  ;;  %v5717_v50 = vpop.f32.mrb[76].mxu0 }
 0x1e0   : > { %v5718_v35 = vpop.f32.mrb[77].mxu0 }
 0x1e1   : > { %v7489_v46 = vadd.f32 %v2827_v32, %v7477_v25  ;;  %v5757_v23 = vpop.f32.mrb[76].mxu1  ;;  %v5719_v0 = vadd.f32 %v5718_v35, %v5717_v50  ;;  %v5720_v24 = vpop.f32.mrb[78].mxu0 }
 0x1e2   : > { %v5758_v20 = vpop.f32.mrb[77].mxu1  ;;  %v5721_v22 = vpop.f32.mrb[79].mxu0 }
 0x1e3   : > { %v5759_v1 = vadd.f32 %v5758_v20, %v5757_v23  ;;  %v5760_v3 = vpop.f32.mrb[78].mxu1  ;;  %v5722_v5 = vadd.f32 %v5721_v22, %v5720_v24 }
 0x1e4   : > { %v5761_v43 = vpop.f32.mrb[79].mxu1 }
 0x1e5   : > { %v2832_v59 = vadd.f32 %v5759_v1, %v5719_v0  ;;  %v5762_v37 = vadd.f32 %v5761_v43, %v5760_v3 }
 0x1e7   : > { %v7491_v10 = vadd.f32 %v2832_v59, %v2397_v54  ;;  %v2835_v18 = vadd.f32 %v5762_v37, %v5722_v5  ;;  %v5779_v63 = vpop.f32.mrb[80].mxu0 }
 0x1e8   : > { %v5780_v44 = vpop.f32.mrb[81].mxu0 }
 0x1e9   : > { %v7493_v15 = vadd.f32 %v2835_v18, %v2398_v56  ;;  %v5819_v25 = vpop.f32.mrb[80].mxu1  ;;  %v5781_v39 = vadd.f32 %v5780_v44, %v5779_v63  ;;  %v5782_v30 = vpop.f32.mrb[82].mxu0 }
 0x1ea   : > { %v5820_v48 = vpop.f32.mrb[81].mxu1  ;;  %v5783_v16 = vpop.f32.mrb[83].mxu0 }
 0x1eb   : > { %v5821_v17 = vadd.f32 %v5820_v48, %v5819_v25  ;;  %v5822_v58 = vpop.f32.mrb[82].mxu1  ;;  %v5784_v42 = vadd.f32 %v5783_v16, %v5782_v30 }
 0x1ec   : > { %v5823_v28 = vpop.f32.mrb[83].mxu1 }
 0x1ed   : > { %v3231_v61 = vadd.f32 %v5821_v17, %v5781_v39  ;;  %v5824_v40 = vadd.f32 %v5823_v28, %v5822_v58 }
 0x1ef   : > { %v7495_v8 = vadd.f32 %v3231_v61, %v2838_v7  ;;  %v3234_v54 = vadd.f32 %v5824_v40, %v5784_v42  ;;  %v5785_v4 = vpop.f32.mrb[84].mxu0 }
 0x1f0   : > { %v5786_v60 = vpop.f32.mrb[85].mxu0 }
 0x1f1   : > { %v7497_v45 = vadd.f32 %v3234_v54, %v2839_v51  ;;  %v5825_v56 = vpop.f32.mrb[84].mxu1  ;;  %v5787_v27 = vadd.f32 %v5786_v60, %v5785_v4  ;;  %v5788_v31 = vpop.f32.mrb[86].mxu0 }
 0x1f2   : > { %v5826_v29 = vpop.f32.mrb[85].mxu1  ;;  %v5789_v36 = vpop.f32.mrb[87].mxu0 }
 0x1f3   : > { %v5827_v14 = vadd.f32 %v5826_v29, %v5825_v56  ;;  %v5828_v12 = vpop.f32.mrb[86].mxu1  ;;  %v5790_v9 = vadd.f32 %v5789_v36, %v5788_v31 }
 0x1f4   : > { %v5829_v52 = vpop.f32.mrb[87].mxu1 }
 0x1f5   : > { %v3239_v41 = vadd.f32 %v5827_v14, %v5787_v27  ;;  %v5830_v6 = vadd.f32 %v5829_v52, %v5828_v12 }
 0x1f7   : > { %v7499_v33 = vadd.f32 %v3239_v41, %v2840_v47  ;;  %v3242_v7 = vadd.f32 %v5830_v6, %v5790_v9  ;;  %v5791_v57 = vpop.f32.mrb[88].mxu0 }
 0x1f8   : > { %v5792_v2 = vpop.f32.mrb[89].mxu0 }
 0x1f9   : > { %v7501_v49 = vadd.f32 %v3242_v7, %v2841_v21  ;;  %v5831_v51 = vpop.f32.mrb[88].mxu1  ;;  %v5793_v62 = vadd.f32 %v5792_v2, %v5791_v57  ;;  %v5794_v26 = vpop.f32.mrb[90].mxu0 }
 0x1fa   : > { %v5832_v13 = vpop.f32.mrb[89].mxu1  ;;  %v5795_v53 = vpop.f32.mrb[91].mxu0 }
 0x1fb   : > { %v5833_v34 = vadd.f32 %v5832_v13, %v5831_v51  ;;  %v5834_v55 = vpop.f32.mrb[90].mxu1  ;;  %v5796_v19 = vadd.f32 %v5795_v53, %v5794_v26 }
 0x1fc   : > { %v5835_v11 = vpop.f32.mrb[91].mxu1 }
 0x1fd   : > { %v3247_v32 = vadd.f32 %v5833_v34, %v5793_v62  ;;  %v5836_v50 = vadd.f32 %v5835_v11, %v5834_v55 }
 0x1ff   : > { %v7504_v23 = vadd.f32 %v3247_v32, %v7486_v38  ;;  %v3250_v47 = vadd.f32 %v5836_v50, %v5796_v19  ;;  %v5797_v21 = vpop.f32.mrb[92].mxu0 }
 0x200   : > { %v5798_v20 = vpop.f32.mrb[93].mxu0 }
 0x201   : > { %v7507_v35 = vadd.f32 %v3250_v47, %v7489_v46  ;;  %v5837_v0 = vpop.f32.mrb[92].mxu1  ;;  %v5799_v24 = vadd.f32 %v5798_v20, %v5797_v21  ;;  %v5800_v3 = vpop.f32.mrb[94].mxu0 }
 0x202   : > { %v5838_v1 = vpop.f32.mrb[93].mxu1  ;;  %v5801_v43 = vpop.f32.mrb[95].mxu0 }
 0x203   : > { %v5839_v22 = vadd.f32 %v5838_v1, %v5837_v0  ;;  %v5840_v5 = vpop.f32.mrb[94].mxu1  ;;  %v5802_v59 = vadd.f32 %v5801_v43, %v5800_v3 }
 0x204   : > { %v5841_v37 = vpop.f32.mrb[95].mxu1 }
 0x205   : > { %v3255_v18 = vadd.f32 %v5839_v22, %v5799_v24  ;;  %v5842_v63 = vadd.f32 %v5841_v37, %v5840_v5 }
 0x207   : > { %v7510_v38 = vadd.f32 %v3255_v18, %v7491_v10  ;;  %v3258_v25 = vadd.f32 %v5842_v63, %v5802_v59  ;;  %v5859_v44 = vpop.f32.mrb[96].mxu0 }
 0x208   : > { %v5860_v48 = vpop.f32.mrb[97].mxu0 }
 0x209   : > { %v7513_v46 = vadd.f32 %v3258_v25, %v7493_v15  ;;  %v5899_v39 = vpop.f32.mrb[96].mxu1  ;;  %v5861_v30 = vadd.f32 %v5860_v48, %v5859_v44  ;;  %v5862_v58 = vpop.f32.mrb[98].mxu0 }
 0x20a   : > { %v5900_v17 = vpop.f32.mrb[97].mxu1  ;;  %v5863_v28 = vpop.f32.mrb[99].mxu0 }
 0x20b   : > { %v5901_v16 = vadd.f32 %v5900_v17, %v5899_v39  ;;  %v5902_v42 = vpop.f32.mrb[98].mxu1  ;;  %v5864_v61 = vadd.f32 %v5863_v28, %v5862_v58 }
 0x20c   : > { %v5903_v40 = vpop.f32.mrb[99].mxu1 }
 0x20d   : > { %v3869_v54 = vadd.f32 %v5901_v16, %v5861_v30  ;;  %v5904_v4 = vadd.f32 %v5903_v40, %v5902_v42 }
 0x20f   : > { %v7516_v10 = vadd.f32 %v3869_v54, %v7495_v8  ;;  %v3872_v56 = vadd.f32 %v5904_v4, %v5864_v61 }
 0x211   : > { %v7519_v60 = vadd.f32 %v3872_v56, %v7497_v45 }
 0x220   : > { %v5865_v15 = vpop.f32.mrb[100].mxu0  ;;  %v5905_v14 = vpop.f32.mrb[100].mxu1 }
 0x221   : > { %v5866_v27 = vpop.f32.mrb[101].mxu0  ;;  %v5906_v36 = vpop.f32.mrb[101].mxu1 }
 0x222   : > { %v5867_v29 = vadd.f32 %v5866_v27, %v5865_v15  ;;  %v5868_v31 = vpop.f32.mrb[102].mxu0  ;;  %v5907_v52 = vadd.f32 %v5906_v36, %v5905_v14  ;;  %v5908_v41 = vpop.f32.mrb[102].mxu1 }
 0x223   : > { %v5869_v12 = vpop.f32.mrb[103].mxu0  ;;  %v5909_v6 = vpop.f32.mrb[103].mxu1 }
 0x224   : > { %v5870_v9 = vadd.f32 %v5869_v12, %v5868_v31  ;;  %v3877_v7 = vadd.f32 %v5907_v52, %v5867_v29  ;;  %v5910_v57 = vadd.f32 %v5909_v6, %v5908_v41 }
 0x226   : > { %v7522_v8 = vadd.f32 %v3877_v7, %v7499_v33  ;;  %v3880_v51 = vadd.f32 %v5910_v57, %v5870_v9 }
 0x228   : > { %v7525_v45 = vadd.f32 %v3880_v51, %v7501_v49  ;;  %v5871_v2 = vpop.f32.mrb[104].mxu0  ;;  %v5911_v13 = vpop.f32.mrb[104].mxu1 }
 0x229   : > { %v5872_v62 = vpop.f32.mrb[105].mxu0  ;;  %v5912_v55 = vpop.f32.mrb[105].mxu1 }
 0x22a   : > { %v5873_v26 = vadd.f32 %v5872_v62, %v5871_v2  ;;  %v5874_v34 = vpop.f32.mrb[106].mxu0  ;;  %v5913_v19 = vadd.f32 %v5912_v55, %v5911_v13  ;;  %v5914_v11 = vpop.f32.mrb[106].mxu1 }
 0x22b   : > { %v5875_v53 = vpop.f32.mrb[107].mxu0  ;;  %v5915_v50 = vpop.f32.mrb[107].mxu1 }
 0x22c   : > { %v5876_v32 = vadd.f32 %v5875_v53, %v5874_v34  ;;  %v3885_v47 = vadd.f32 %v5913_v19, %v5873_v26  ;;  %v5916_v21 = vadd.f32 %v5915_v50, %v5914_v11 }
 0x22e   : > { %v7528_v33 = vadd.f32 %v3885_v47, %v7504_v23  ;;  %v3888_v0 = vadd.f32 %v5916_v21, %v5876_v32 }
 0x230   : > { %v7531_v49 = vadd.f32 %v3888_v0, %v7507_v35  ;;  %v5877_v20 = vpop.f32.mrb[108].mxu0  ;;  %v5917_v1 = vpop.f32.mrb[108].mxu1 }
 0x231   : > { %v5878_v24 = vpop.f32.mrb[109].mxu0  ;;  %v5918_v5 = vpop.f32.mrb[109].mxu1 }
 0x232   : > { %v5879_v3 = vadd.f32 %v5878_v24, %v5877_v20  ;;  %v5880_v22 = vpop.f32.mrb[110].mxu0  ;;  %v5919_v59 = vadd.f32 %v5918_v5, %v5917_v1  ;;  %v5920_v37 = vpop.f32.mrb[110].mxu1 }
 0x233   : > { %v5881_v43 = vpop.f32.mrb[111].mxu0  ;;  %v5921_v63 = vpop.f32.mrb[111].mxu1 }
 0x234   : > { %v5882_v18 = vadd.f32 %v5881_v43, %v5880_v22  ;;  %v3893_v25 = vadd.f32 %v5919_v59, %v5879_v3  ;;  %v5922_v44 = vadd.f32 %v5921_v63, %v5920_v37 }
 0x236   : > { %v7534_v23 = vadd.f32 %v3893_v25, %v7510_v38  ;;  %v3896_v39 = vadd.f32 %v5922_v44, %v5882_v18 }
 0x238   : > { %v5939_v48 = vpop.f32.mrb[112].mxu0  ;;  %v7537_v30 = vadd.f32 %v3896_v39, %v7513_v46  ;;  %v5979_v17 = vpop.f32.mrb[112].mxu1 }
 0x239   : > { %v5940_v35 = vpop.f32.mrb[113].mxu0  ;;  %v5980_v42 = vpop.f32.mrb[113].mxu1 }
 0x23a   : > { %v5941_v58 = vadd.f32 %v5940_v35, %v5939_v48  ;;  %v5942_v16 = vpop.f32.mrb[114].mxu0  ;;  %v5981_v61 = vadd.f32 %v5980_v42, %v5979_v17  ;;  %v5982_v40 = vpop.f32.mrb[114].mxu1 }
 0x23b   : > { %v5943_v28 = vpop.f32.mrb[115].mxu0  ;;  %v5983_v4 = vpop.f32.mrb[115].mxu1 }
 0x23c   : > { %v5944_v54 = vadd.f32 %v5943_v28, %v5942_v16  ;;  %v4316_v56 = vadd.f32 %v5981_v61, %v5941_v58  ;;  %v5984_v15 = vadd.f32 %v5983_v4, %v5982_v40 }
 0x23e   : > { %v7540_v38 = vadd.f32 %v4316_v56, %v7516_v10  ;;  %v4319_v27 = vadd.f32 %v5984_v15, %v5944_v54 }
 0x240   : > { %v5945_v29 = vpop.f32.mrb[116].mxu0  ;;  %v7543_v46 = vadd.f32 %v4319_v27, %v7519_v60  ;;  %v5985_v14 = vpop.f32.mrb[116].mxu1 }
 0x241   : > { %v5946_v31 = vpop.f32.mrb[117].mxu0  ;;  %v5986_v9 = vpop.f32.mrb[117].mxu1 }
 0x242   : > { %v5947_v12 = vadd.f32 %v5946_v31, %v5945_v29  ;;  %v5948_v36 = vpop.f32.mrb[118].mxu0  ;;  %v5987_v41 = vadd.f32 %v5986_v9, %v5985_v14  ;;  %v5988_v6 = vpop.f32.mrb[118].mxu1  ;;  %v7566_v29 = vld [vmem:[#allocation6] ss:$0 sm:$0xff] }
 0x243   : > { %v5949_v52 = vpop.f32.mrb[119].mxu0  ;;  %v5989_v57 = vpop.f32.mrb[119].mxu1 }
 0x244   : > { %v5950_v7 = vadd.f32 %v5949_v52, %v5948_v36  ;;  %v4324_v51 = vadd.f32 %v5987_v41, %v5947_v12  ;;  %v5990_v2 = vadd.f32 %v5989_v57, %v5988_v6 }
 0x246   : > { %v7546_v10 = vadd.f32 %v4324_v51, %v7522_v8  ;;  %v4327_v62 = vadd.f32 %v5990_v2, %v5950_v7 }
 0x248   : > { %v5951_v13 = vpop.f32.mrb[120].mxu0  ;;  %v7549_v60 = vadd.f32 %v4327_v62, %v7525_v45  ;;  %v5991_v34 = vpop.f32.mrb[120].mxu1 }
 0x249   : > { %v5952_v26 = vpop.f32.mrb[121].mxu0  ;;  %v5992_v19 = vpop.f32.mrb[121].mxu1 }
 0x24a   : > { %v5953_v55 = vadd.f32 %v5952_v26, %v5951_v13  ;;  %v5954_v53 = vpop.f32.mrb[122].mxu0  ;;  %v5993_v32 = vadd.f32 %v5992_v19, %v5991_v34  ;;  %v5994_v50 = vpop.f32.mrb[122].mxu1 }
 0x24b   : > { %v5955_v11 = vpop.f32.mrb[123].mxu0  ;;  %v5995_v21 = vpop.f32.mrb[123].mxu1 }
 0x24c   : > { %v5956_v47 = vadd.f32 %v5955_v11, %v5954_v53  ;;  %v4332_v0 = vadd.f32 %v5993_v32, %v5953_v55  ;;  %v5996_v20 = vadd.f32 %v5995_v21, %v5994_v50 }
 0x24e   : > { %v7552_v8 = vadd.f32 %v4332_v0, %v7528_v33  ;;  %v4335_v24 = vadd.f32 %v5996_v20, %v5956_v47 }
 0x250   : > { %v7555_v1 = vadd.f32 %v4335_v24, %v7531_v49  ;;  %v5957_v45 = vpop.f32.mrb[124].mxu0  ;;  %v5997_v3 = vpop.f32.mrb[124].mxu1 }
 0x251   : > { %v5958_v22 = vpop.f32.mrb[125].mxu0  ;;  %v5998_v43 = vpop.f32.mrb[125].mxu1 }
 0x252   : > { %v5959_v5 = vadd.f32 %v5958_v22, %v5957_v45  ;;  %v5960_v59 = vpop.f32.mrb[126].mxu0  ;;  %v5999_v37 = vadd.f32 %v5998_v43, %v5997_v3  ;;  %v6000_v18 = vpop.f32.mrb[126].mxu1 }
 0x253   : > { %v5961_v63 = vpop.f32.mrb[127].mxu0  ;;  %v6001_v44 = vpop.f32.mrb[127].mxu1 }
 0x254   : > { %v5962_v25 = vadd.f32 %v5961_v63, %v5960_v59  ;;  %v4340_v39 = vadd.f32 %v5999_v37, %v5959_v5  ;;  %v6002_v48 = vadd.f32 %v6001_v44, %v6000_v18 }
 0x256   : > { %v7558_v33 = vadd.f32 %v4340_v39, %v7534_v23  ;;  %v4343_v49 = vadd.f32 %v6002_v48, %v5962_v25 }
 0x258   : > { %v6019_v35 = vpop.f32.mrb[128].mxu0  ;;  %v7561_v17 = vadd.f32 %v4343_v49, %v7537_v30 }
 0x259   : > { %v6059_v58 = vpop.f32.mrb[128].mxu1  ;;  %v6020_v16 = vpop.f32.mrb[129].mxu0 }
 0x25a   : > { %v6021_v42 = vadd.f32 %v6020_v16, %v6019_v35  ;;  %v6060_v28 = vpop.f32.mrb[129].mxu1  ;;  %v6022_v61 = vpop.f32.mrb[130].mxu0 }
 0x25b   : > { %v6061_v40 = vadd.f32 %v6060_v28, %v6059_v58  ;;  %v6062_v54 = vpop.f32.mrb[130].mxu1  ;;  %v6023_v4 = vpop.f32.mrb[131].mxu0 }
 0x25c   : > { %v6024_v56 = vadd.f32 %v6023_v4, %v6022_v61  ;;  %v6063_v15 = vpop.f32.mrb[131].mxu1 }
 0x25d   : > { %v4739_v23 = vadd.f32 %v6061_v40, %v6021_v42  ;;  %v6064_v27 = vadd.f32 %v6063_v15, %v6062_v54 }
 0x25f   : > { %v4769_v30 = vadd.f32 %v4739_v23, %v7540_v38  ;;  %v4742_v31 = vadd.f32 %v6064_v27, %v6024_v56 }
 0x260   : > { %v6025_v14 = vpop.f32.mrb[132].mxu0 }
 0x261   : > { %v4800_v12 = vadd.f32 %v7566_v29, %v4769_v30  ;;  %v4770_v36 = vadd.f32 %v4742_v31, %v7543_v46  ;;  %v6065_v9 = vpop.f32.mrb[132].mxu1  ;;  %v6026_v52 = vpop.f32.mrb[133].mxu0 }
 0x262   : > { %v6027_v41 = vadd.f32 %v6026_v52, %v6025_v14  ;;  %v6066_v6 = vpop.f32.mrb[133].mxu1  ;;  %v6028_v7 = vpop.f32.mrb[134].mxu0 }
 0x263   : > { %4808 = vst [vmem:[%s7571_s7] sm:$0xff] %v4800_v12  ;;  %v4801_v57 = vadd.f32 %v7566_v29, %v4770_v36  ;;  %v6067_v51 = vadd.f32 %v6066_v6, %v6065_v9  ;;  %v6068_v38 = vpop.f32.mrb[134].mxu1  ;;  %v6029_v2 = vpop.f32.mrb[135].mxu0 }
 0x264   : > { %v6030_v62 = vadd.f32 %v6029_v2, %v6028_v7  ;;  %v6069_v13 = vpop.f32.mrb[135].mxu1 }
 0x265   : > { %4809 = vst [vmem:[%s7571_s7 + $0x8] sm:$0xff] %v4801_v57  ;;  %v4747_v46 = vadd.f32 %v6067_v51, %v6027_v41  ;;  %v6070_v26 = vadd.f32 %v6069_v13, %v6068_v38 }
 0x267   : > { %v4771_v34 = vadd.f32 %v4747_v46, %v7546_v10  ;;  %v4750_v55 = vadd.f32 %v6070_v26, %v6030_v62 }
 0x268   : > { %v6031_v53 = vpop.f32.mrb[136].mxu0 }
 0x269   : > { %v4802_v19 = vadd.f32 %v7566_v29, %v4771_v34  ;;  %v4772_v11 = vadd.f32 %v4750_v55, %v7549_v60  ;;  %v6071_v32 = vpop.f32.mrb[136].mxu1  ;;  %v6032_v50 = vpop.f32.mrb[137].mxu0 }
 0x26a   : > { %v6033_v47 = vadd.f32 %v6032_v50, %v6031_v53  ;;  %v6072_v21 = vpop.f32.mrb[137].mxu1  ;;  %v6034_v0 = vpop.f32.mrb[138].mxu0 }
 0x26b   : > { %4810 = vst [vmem:[%s7571_s7 + $0x10] sm:$0xff] %v4802_v19  ;;  %v4803_v20 = vadd.f32 %v7566_v29, %v4772_v11  ;;  %v6073_v24 = vadd.f32 %v6072_v21, %v6071_v32  ;;  %v6074_v45 = vpop.f32.mrb[138].mxu1  ;;  %v6035_v3 = vpop.f32.mrb[139].mxu0 }
 0x26c   : > { %v6036_v10 = vadd.f32 %v6035_v3, %v6034_v0  ;;  %v6075_v22 = vpop.f32.mrb[139].mxu1 }
 0x26d   : > { %4811 = vst [vmem:[%s7571_s7 + $0x18] sm:$0xff] %v4803_v20  ;;  %v4755_v5 = vadd.f32 %v6073_v24, %v6033_v47  ;;  %v6076_v43 = vadd.f32 %v6075_v22, %v6074_v45 }
 0x26f   : > { %v4773_v59 = vadd.f32 %v4755_v5, %v7552_v8  ;;  %v4758_v60 = vadd.f32 %v6076_v43, %v6036_v10 }
 0x270   : > { %v6037_v37 = vpop.f32.mrb[140].mxu0 }
 0x271   : > { %v4804_v18 = vadd.f32 %v7566_v29, %v4773_v59  ;;  %v4774_v63 = vadd.f32 %v4758_v60, %v7555_v1  ;;  %v6077_v25 = vpop.f32.mrb[140].mxu1  ;;  %v6038_v44 = vpop.f32.mrb[141].mxu0 }
 0x272   : > { %v6039_v39 = vadd.f32 %v6038_v44, %v6037_v37  ;;  %v6078_v48 = vpop.f32.mrb[141].mxu1  ;;  %v6040_v49 = vpop.f32.mrb[142].mxu0 }
 0x273   : > { %4812 = vst [vmem:[%s7571_s7 + $0x20] sm:$0xff] %v4804_v18  ;;  %v4805_v35 = vadd.f32 %v7566_v29, %v4774_v63  ;;  %v6079_v58 = vadd.f32 %v6078_v48, %v6077_v25  ;;  %v6080_v8 = vpop.f32.mrb[142].mxu1  ;;  %v6041_v16 = vpop.f32.mrb[143].mxu0 }
 0x274   : > { %v6042_v42 = vadd.f32 %v6041_v16, %v6040_v49  ;;  %v6081_v28 = vpop.f32.mrb[143].mxu1 }
 0x275   : > { %4813 = vst [vmem:[%s7571_s7 + $0x28] sm:$0xff] %v4805_v35  ;;  %v4763_v1 = vadd.f32 %v6079_v58, %v6039_v39  ;;  %v6082_v61 = vadd.f32 %v6081_v28, %v6080_v8 }
 0x277   : > { %v4775_v40 = vadd.f32 %v4763_v1, %v7558_v33  ;;  %v4766_v54 = vadd.f32 %v6082_v61, %v6042_v42 }
 0x279   : > { %v4806_v4 = vadd.f32 %v7566_v29, %v4775_v40  ;;  %v4776_v56 = vadd.f32 %v4766_v54, %v7561_v17 }
 0x27b   : > { %4814 = vst [vmem:[%s7571_s7 + $0x30] sm:$0xff] %v4806_v4  ;;  %v4807_v33 = vadd.f32 %v7566_v29, %v4776_v56 }
 0x27d   : > { %4815 = vst [vmem:[%s7571_s7 + $0x38] sm:$0xff] %v4807_v33 }
 0x27e   : > { %6521 = shalt.err (!%p6518_p6)
}
 0x27f   : > { %s6522_s26 = scalar_lea.hbm %s7596_s18, 1024  ;;  %s6526_s5 = scalar_lea.hbm %s7654_s3, 2048 }
 0x280   : > { %p6523_p7 = scmp.ne.s32.totalorder %s7596_s18, %s6522_s26  ;;  %p6527_p0 = scmp.lt.u32.totalorder %s7596_s18, %s7654_s3 }
 0x281   : > { %p6528_p1 = scmp.lt.u32.totalorder %s6526_s5, %s6522_s26  ;;  %p6530_p4 = scmp.lt.u32.totalorder %s6522_s26, %s7596_s18 }
 0x282   : > { %p6524_p9 = pnand %p6523_p7, %p7670_p8 }
 0x283   : > { %p6529_p13 = por %p6528_p1, %p6527_p0 }
 0x284   : > { %p6525_p12 = pneg %p6524_p9 }
 0x285   : > { %p6531_p10 = por %p6530_p4, %p6529_p13 }
 0x287   : > { %p6532_p11 = pnand %p6531_p10, %p6525_p12 }
 0x289   : > { %6535 = shalt.err (!%p6532_p11)
}
 0x28a   : > { %s6601_s6 = smov 128   ;;  %s6602_s7 = smov 8  }
 0x28b   : > { %6092 = dma.vmem_to_hbm [thread:$0]  (%p7670_p8), %s7598_s9, 1024, %s7596_s18, %s7605_s15, %s6601_s6, %s6601_s6, %s6602_s7  }
 0x28c PF: > { %p6109_p2 = scmp.ge.s32.totalorder %s6594_s17, 2  ;;  %s4847_s8 = sand.u32 1, %s6574_s12  }
 0x28d   : > { %p7671_p3 = scmp.ne.s32.totalorder %s7660_s24, 0  ;;  %s4848_s10 = scalar_lea.sflag [#allocation5], %s4847_s8 }
 0x28f   : > { %p6102_p5 = pnand %p6109_p2, %p7671_p3 }
 0x291   : > { %6569 = dma.done.wait (!%p6102_p5), %s4848_s10, 1024  }
 0x292   : > { %6571 = vsyncadd (!%p6102_p5), %s4848_s10, 4294966272  ;;  %s18_s17 = sadd.s32 1, %s6594_s17   ;;  %s7672_s12 = smov %s6578_s13 }
 0x293   : > { %p15_p6 = scmp.ge.s32.totalorder %s18_s17, 4   ;;  %s7673_s13 = smov %s6582_s14 }
 0x294   : > { %s7674_s14 = smov %s6676_s25  ;;  %s7675_s15 = smov %s6590_s16 }
 0x295   : > { %s7676_s16 = smov %s7678_s20  ;;  %17 = sbr.rel (!%p15_p6) target bundleno = 6 (0x6), region = 85 }
 0x29c   :  { %4853 = vsyncpa [#allocation4], 1 }
 0x29d   :  { %4855 = vsyncpa [#allocation4 + $0x1], 1 }
 0x29e   :  { %4856 = vsyncpa [#allocation7], 1 }
 0x29f   :  { %4857 = vsyncpa [#allocation5], 1 }
 0x2a0   :  { %4859 = vsyncpa [#allocation5 + $0x1], 1 }

</bundles_post_ra>
